<compile_context>
chip_gen: v7x
topology: tpu7x:2x2x1
jax: 0.10.0
libtpu: 0.0.40
codegen_flags: <defaults>
</compile_context>

<pallas_src>
import math
from functools import partial

import jax
import jax.numpy as jnp
from jax.experimental import pallas as pl
from jax.experimental.pallas import tpu as pltpu

_INV_SQRT2 = 1.0 / math.sqrt(2.0)


def _round_up(x, m):
    return (x + m - 1) // m * m


def _pick_group(cin, cout):
    """Pixel-grouping factor G: pack G pixels per matmul row so the channel block
    presented to the MXU / store unit is up to 256 lanes (lane-dense, full MXU
    width on v6e/v7x; on v5e the 128-wide MXU just takes two passes)."""
    for g in (8, 4, 2, 1):
        if g * max(cin, cout) <= 256:
            return g
    return 1


def _row_tile(rows):
    """bf16-friendly row tiles (multiple of 16), >=2 grid steps when possible so
    both v7x TensorCores stay busy, capped at 1024 to amortize per-step cost."""
    if rows <= 16:
        return 16
    return min(1024, _round_up(pl.cdiv(rows, 2), 16))


# --------------------------------------------------------------------------- #
# Pallas kernels
# --------------------------------------------------------------------------- #
def _linear_kernel(x_ref, w_ref, b_ref, o_ref):
    # o = x @ w + b    x:(TR, G*Cin) bf16   w:(G*Cin, G*Cout) bf16 block-diagonal
    acc = jnp.dot(x_ref[...], w_ref[...], preferred_element_type=jnp.float32)
    o_ref[...] = (acc + b_ref[...]).astype(o_ref.dtype)


def _combine_kernel(spec_ref, x_ref, w_ref, b_ref, o_ref):
    # o = GELU( spec + x @ w + b )   (exact erf GELU, like torch default)
    y = (spec_ref[...].astype(jnp.float32)
         + jnp.dot(x_ref[...], w_ref[...], preferred_element_type=jnp.float32)
         + b_ref[...])
    y = 0.5 * y * (1.0 + jax.lax.erf(y * _INV_SQRT2))
    o_ref[...] = y.astype(o_ref.dtype)


def _fwd_dft_kernel(x_ref, kwc_ref, kws_ref, fc_ref, fs_ref, xr_ref, xi_ref):
    # Truncated 2-D DFT of one batch element (only the retained FNO modes).
    # x:(1,H,W*C) bf16  kwc/kws:(W*C, m2*C) bf16  fc/fs:(K1,H) f32
    x = x_ref[0]
    tr = jnp.dot(x, kwc_ref[...], preferred_element_type=jnp.float32)    # (H, m2*C)
    ti = -jnp.dot(x, kws_ref[...], preferred_element_type=jnp.float32)
    fc = fc_ref[...]
    fs = fs_ref[...]
    xr_ref[0] = (jnp.dot(fc, tr, preferred_element_type=jnp.float32)
                 + jnp.dot(fs, ti, preferred_element_type=jnp.float32))
    xi_ref[0] = (jnp.dot(fc, ti, preferred_element_type=jnp.float32)
                 - jnp.dot(fs, tr, preferred_element_type=jnp.float32))


def _mode_mix_kernel(x_ref, w_ref, o_ref, *, groups_per_step):
    # One real matmul per packed mode-group encodes the complex channel mixing
    # (weights packed as [[wr, wi], [-wi, wr]], block-diagonal over paired modes
    # so the lane dim is 128).  groups_per_step is a Python int -> unrolled.
    for p in range(groups_per_step):
        o_ref[p] = jnp.dot(x_ref[p], w_ref[p], preferred_element_type=jnp.float32)


def _inv_dft_kernel(yr_ref, yi_ref, kc_ref, ks_ref, bc_ref, bs_ref, o_ref):
    # Truncated inverse 2-D DFT of one batch element (zero-filled spectrum implied).
    yr = yr_ref[0]                                                        # (K1, m2*C)
    yi = yi_ref[0]
    gr = (jnp.dot(yr, kc_ref[...], preferred_element_type=jnp.float32)
          - jnp.dot(yi, ks_ref[...], preferred_element_type=jnp.float32))
    gi = (jnp.dot(yr, ks_ref[...], preferred_element_type=jnp.float32)
          + jnp.dot(yi, kc_ref[...], preferred_element_type=jnp.float32))
    y = (jnp.dot(bc_ref[...], gr, preferred_element_type=jnp.float32)
         - jnp.dot(bs_ref[...], gi, preferred_element_type=jnp.float32))  # (H, W*C)
    o_ref[0] = y.astype(o_ref.dtype)


# --------------------------------------------------------------------------- #
# Pallas wrappers
# --------------------------------------------------------------------------- #
def grouped_linear(x2d, lin, out_dtype):
    """(N, Cin) @ (Cin, Cout) + b via Pallas, G pixels packed per row, bf16 in."""
    N, cin = x2d.shape
    G, cout = lin["G"], lin["cout"]
    Np = _round_up(N, G)
    if Np != N:                                    # pad rows instead of dropping to G=1
        x2d = jnp.pad(x2d, ((0, Np - N), (0, 0)))
    rows = Np // G
    gc_in, gc_out = G * cin, G * cout
    xg = x2d.reshape(rows, gc_in).astype(jnp.bfloat16)
    tr_ = _row_tile(rows)
    out = pl.pallas_call(
        _linear_kernel,
        out_shape=jax.ShapeDtypeStruct((rows, gc_out), out_dtype),
        grid=(pl.cdiv(rows, tr_),),
        in_specs=[
            pl.BlockSpec((tr_, gc_in), lambda i: (i, 0)),
            pl.BlockSpec((gc_in, gc_out), lambda i: (0, 0)),
            pl.BlockSpec((1, gc_out), lambda i: (0, 0)),
        ],
        out_specs=pl.BlockSpec((tr_, gc_out), lambda i: (i, 0)),
        compiler_params=pltpu.CompilerParams(dimension_semantics=("parallel",)),
        cost_estimate=pl.CostEstimate(
            flops=2 * rows * gc_in * gc_out,
            transcendentals=0,
            bytes_accessed=2 * rows * (gc_in + gc_out) + 2 * gc_in * gc_out),
    )(xg, lin["wblk"], lin["bblk"])
    out = out.reshape(Np, cout)
    return out[:N] if Np != N else out


def block_combine(spec2d, x2d, lin):
    """GELU(spec + x @ w + b), fused, lane-dense grouped rows, bf16 streams."""
    N, cin = x2d.shape
    G, cout = lin["G"], lin["cout"]
    Np = _round_up(N, G)
    if Np != N:
        spec2d = jnp.pad(spec2d, ((0, Np - N), (0, 0)))
        x2d = jnp.pad(x2d, ((0, Np - N), (0, 0)))
    rows = Np // G
    gc = G * cin
    sg = spec2d.reshape(rows, gc).astype(jnp.bfloat16)
    xg = x2d.reshape(rows, gc).astype(jnp.bfloat16)
    tr_ = _row_tile(rows)
    out = pl.pallas_call(
        _combine_kernel,
        out_shape=jax.ShapeDtypeStruct((rows, gc), jnp.bfloat16),
        grid=(pl.cdiv(rows, tr_),),
        in_specs=[
            pl.BlockSpec((tr_, gc), lambda i: (i, 0)),
            pl.BlockSpec((tr_, gc), lambda i: (i, 0)),
            pl.BlockSpec((gc, gc), lambda i: (0, 0)),
            pl.BlockSpec((1, gc), lambda i: (0, 0)),
        ],
        out_specs=pl.BlockSpec((tr_, gc), lambda i: (i, 0)),
        compiler_params=pltpu.CompilerParams(dimension_semantics=("parallel",)),
        cost_estimate=pl.CostEstimate(
            flops=2 * rows * gc * gc + 8 * rows * gc,
            transcendentals=rows * gc,
            bytes_accessed=2 * rows * 3 * gc + 2 * gc * gc),
    )(sg, xg, lin["wblk"], lin["bblk"])
    out = out.reshape(Np, cout)
    return out[:N] if Np != N else out


def spectral_dft_forward(x3, mats):
    """Truncated 2-D DFT of the retained modes (replaces rfft2 + corner gather)."""
    B, H, WC = x3.shape
    kwc, kws, fc, fs = mats["kwc"], mats["kws"], mats["fc"], mats["fs"]
    K1, m2C = fc.shape[0], kwc.shape[1]
    return pl.pallas_call(
        _fwd_dft_kernel,
        out_shape=(jax.ShapeDtypeStruct((B, K1, m2C), jnp.float32),
                   jax.ShapeDtypeStruct((B, K1, m2C), jnp.float32)),
        grid=(B,),
        in_specs=[
            pl.BlockSpec((1, H, WC), lambda b: (b, 0, 0)),
            pl.BlockSpec((WC, m2C), lambda b: (0, 0)),
            pl.BlockSpec((WC, m2C), lambda b: (0, 0)),
            pl.BlockSpec((K1, H), lambda b: (0, 0)),
            pl.BlockSpec((K1, H), lambda b: (0, 0)),
        ],
        out_specs=(pl.BlockSpec((1, K1, m2C), lambda b: (b, 0, 0)),
                   pl.BlockSpec((1, K1, m2C), lambda b: (b, 0, 0))),
        compiler_params=pltpu.CompilerParams(dimension_semantics=("parallel",)),
        cost_estimate=pl.CostEstimate(
            flops=2 * B * (2 * H * WC * m2C + 4 * K1 * H * m2C),
            transcendentals=0,
            bytes_accessed=2 * B * H * WC + 4 * WC * m2C + 8 * B * K1 * m2C),
    )(x3, kwc, kws, fc, fs)


def spectral_mode_mix(x_groups, w_groups):
    """Per-mode complex channel mixing; modes pre-packed so lane dim is 128."""
    Pg, B, D = x_groups.shape
    steps = 2 if (Pg >= 2 and Pg % 2 == 0) else 1      # 2 steps -> both v7x cores
    mp = Pg // steps
    return pl.pallas_call(
        partial(_mode_mix_kernel, groups_per_step=mp),
        out_shape=jax.ShapeDtypeStruct((Pg, B, D), jnp.float32),
        grid=(steps,),
        in_specs=[
            pl.BlockSpec((mp, B, D), lambda s: (s, 0, 0)),
            pl.BlockSpec((mp, D, D), lambda s: (s, 0, 0)),
        ],
        out_specs=pl.BlockSpec((mp, B, D), lambda s: (s, 0, 0)),
        compiler_params=pltpu.CompilerParams(dimension_semantics=("parallel",)),
        cost_estimate=pl.CostEstimate(
            flops=2 * Pg * B * D * D,
            transcendentals=0,
            bytes_accessed=4 * (2 * Pg * B * D + Pg * D * D)),
    )(x_groups, w_groups)


def spectral_dft_inverse(yr, yi, mats, out_dtype=jnp.bfloat16):
    """Truncated inverse 2-D DFT (replaces zero-fill + scatter + irfft2)."""
    B, K1, m2C = yr.shape
    kc, ks, bc, bs = mats["kc"], mats["ks"], mats["bc"], mats["bs"]
    H, WC = bc.shape[0], kc.shape[1]
    return pl.pallas_call(
        _inv_dft_kernel,
        out_shape=jax.ShapeDtypeStruct((B, H, WC), out_dtype),
        grid=(B,),
        in_specs=[
            pl.BlockSpec((1, K1, m2C), lambda b: (b, 0, 0)),
            pl.BlockSpec((1, K1, m2C), lambda b: (b, 0, 0)),
            pl.BlockSpec((m2C, WC), lambda b: (0, 0)),
            pl.BlockSpec((m2C, WC), lambda b: (0, 0)),
            pl.BlockSpec((H, K1), lambda b: (0, 0)),
            pl.BlockSpec((H, K1), lambda b: (0, 0)),
        ],
        out_specs=pl.BlockSpec((1, H, WC), lambda b: (b, 0, 0)),
        compiler_params=pltpu.CompilerParams(dimension_semantics=("parallel",)),
        cost_estimate=pl.CostEstimate(
            flops=2 * B * (4 * K1 * m2C * WC + 2 * H * K1 * WC),
            transcendentals=0,
            bytes_accessed=8 * B * K1 * m2C + 8 * m2C * WC + 2 * B * H * WC),
    )(yr, yi, kc, ks, bc, bs)


# --------------------------------------------------------------------------- #
# Truncated-DFT operator matrices (shared across layers; tiny, built once/jit)
# --------------------------------------------------------------------------- #
def make_dft_mats(H, W, C, m1, m2):
    assert 2 * m1 <= H and m2 <= W // 2 + 1, "retained modes exceed available freqs"
    k1 = jnp.concatenate([jnp.arange(m1), jnp.arange(H - m1, H)]).astype(jnp.float32)
    hh = jnp.arange(H, dtype=jnp.float32)
    ww = jnp.arange(W, dtype=jnp.float32)
    k2 = jnp.arange(m2, dtype=jnp.float32)
    eye_c = jnp.eye(C, dtype=jnp.float32)

    # forward:  X[k1,k2] = sum_{h,w} x[h,w] e^{-2pi i (k1 h/H + k2 w/W)}
    ang_w = (2.0 * math.pi / W) * jnp.outer(ww, k2)                    # (W, m2)
    kwc = jnp.kron(jnp.cos(ang_w), eye_c).astype(jnp.bfloat16)         # (W*C, m2*C)
    kws = jnp.kron(jnp.sin(ang_w), eye_c).astype(jnp.bfloat16)
    ang_h = (2.0 * math.pi / H) * jnp.outer(k1, hh)                    # (K1, H)
    fc, fs = jnp.cos(ang_h), jnp.sin(ang_h)

    # inverse:  y[h,w] = Re sum_{k1,k2} c(k2)/(HW) Y[k1,k2] e^{+2pi i (...)}
    is_edge = (k2 == 0)
    if W % 2 == 0:
        is_edge = is_edge | (k2 == (W // 2))
    cfac = jnp.where(is_edge, 1.0, 2.0).astype(jnp.float32) / float(H * W)
    ang_wi = (2.0 * math.pi / W) * jnp.outer(k2, ww)                   # (m2, W)
    kc = jnp.kron(cfac[:, None] * jnp.cos(ang_wi), eye_c)              # (m2*C, W*C)
    ks = jnp.kron(cfac[:, None] * jnp.sin(ang_wi), eye_c)
    ang_hi = (2.0 * math.pi / H) * jnp.outer(hh, k1)                   # (H, K1)
    bc, bs = jnp.cos(ang_hi), jnp.sin(ang_hi)
    return dict(kwc=kwc, kws=kws, fc=fc, fs=fs, kc=kc, ks=ks, bc=bc, bs=bs)


# --------------------------------------------------------------------------- #
# FNO forward
# --------------------------------------------------------------------------- #
def fno_block(h2d, bp, mats, B, H, W, C):
    # ---- spectral branch: truncated DFT -> complex mode mix -> inverse DFT ----
    x3 = h2d.reshape(B, H, W * C).astype(jnp.bfloat16)
    xr, xi = spectral_dft_forward(x3, mats)               # (B, K1, m2*C) f32 each
    K1 = xr.shape[1]
    m2 = mats["kc"].shape[0] // C
    P = K1 * m2
    pack = bp["pack"]

    xm = jnp.concatenate(
        [jnp.transpose(xr.reshape(B, P, C), (1, 0, 2)),
         jnp.transpose(xi.reshape(B, P, C), (1, 0, 2))], axis=-1)      # (P, B, 2C)
    xg = xm.reshape(P // pack, pack, B, 2 * C)
    xg = jnp.transpose(xg, (0, 2, 1, 3)).reshape(P // pack, B, pack * 2 * C)

    yg = spectral_mode_mix(xg, bp["w_pairs"])                          # (P//pack, B, pack*2C)

    ym = jnp.transpose(yg.reshape(P // pack, B, pack, 2 * C), (0, 2, 1, 3))
    ym = ym.reshape(P, B, 2 * C)
    yr = jnp.transpose(ym[..., :C], (1, 0, 2)).reshape(B, K1, m2 * C)
    yi = jnp.transpose(ym[..., C:], (1, 0, 2)).reshape(B, K1, m2 * C)

    spec3 = spectral_dft_inverse(yr, yi, mats)                         # (B, H, W*C) bf16
    spec2d = spec3.reshape(B * H * W, C)

    # ---- pointwise branch + combine: GELU(spec + conv1x1(h)) ----
    return block_combine(spec2d, h2d, bp["conv"])                      # (N, C) bf16


def fno_forward(x_nchw, params):
    # match PyTorch: permute(0,2,3,1) -> fc0 -> blocks -> fc1 -> permute back
    x = jnp.transpose(x_nchw, (0, 2, 3, 1)).astype(jnp.float32)        # NHWC
    B, H, W, Cin = x.shape
    width = params["fc0"]["cout"]
    mats = make_dft_mats(H, W, width, params["modes1"], params["modes2"])

    h = grouped_linear(x.reshape(-1, Cin), params["fc0"], jnp.bfloat16)   # (N, width)
    for bp in params["blocks"]:
        h = fno_block(h, bp, mats, B, H, W, width)

    out = grouped_linear(h, params["fc1"], jnp.float32)                   # (N, Cout)
    Cout = params["fc1"]["cout"]
    return jnp.transpose(out.reshape(B, H, W, Cout), (0, 3, 1, 2))        # NCHW


# --------------------------------------------------------------------------- #
# Deterministic parameter init (shapes follow the PyTorch module __init__)
# --------------------------------------------------------------------------- #
def _complex_block_weight(wr, wi):
    """(m1,m2,C,C) real/imag -> (m1*m2, 2C, 2C) real block [[wr, wi], [-wi, wr]]."""
    top = jnp.concatenate([wr, wi], axis=-1)
    bot = jnp.concatenate([-wi, wr], axis=-1)
    blk = jnp.concatenate([top, bot], axis=-2)
    m1, m2, c2, _ = blk.shape
    return blk.reshape(m1 * m2, c2, c2)


def _pack_mode_pairs(w_spec, pack):
    """(P, 2C, 2C) -> (P//pack, pack*2C, pack*2C) block-diag over paired modes."""
    P, d, _ = w_spec.shape
    Pg = P // pack
    ws = w_spec.reshape(Pg, pack, d, d)
    out = jnp.zeros((Pg, pack * d, pack * d), jnp.float32)
    for q in range(pack):
        out = out.at[:, q * d:(q + 1) * d, q * d:(q + 1) * d].set(ws[:, q])
    return out


def _make_grouped_linear(w, b):
    """Precompute (once, at init) the pixel-grouped block-diagonal weight/bias."""
    cin, cout = w.shape
    G = _pick_group(cin, cout)
    wblk = jnp.kron(jnp.eye(G, dtype=jnp.float32), w).astype(jnp.bfloat16)
    bblk = jnp.tile(b, G).reshape(1, G * cout).astype(jnp.float32)
    return dict(G=G, cout=cout, wblk=wblk, bblk=bblk)


def init_params(key, in_channels, out_channels, width, modes1, modes2, layers):
    def linear_init(k, fan_in, fan_out):
        bound = 1.0 / math.sqrt(fan_in)
        kw, kb = jax.random.split(k)
        w = jax.random.uniform(kw, (fan_in, fan_out), jnp.float32, -bound, bound)
        b = jax.random.uniform(kb, (fan_out,), jnp.float32, -bound, bound)
        return w, b

    keys = jax.random.split(key, 2 + layers)
    fc0 = _make_grouped_linear(*linear_init(keys[0], in_channels, width))
    fc1 = _make_grouped_linear(*linear_init(keys[1], width, out_channels))

    P = 2 * modes1 * modes2
    pack = max(1, 128 // (2 * width))          # pair modes up to 128 lanes
    if pack > 1 and P % pack != 0:
        pack = 1

    blocks = []
    scale = 1.0 / (width * width)
    for l in range(layers):
        k1, k2, k3, k4, k5 = jax.random.split(keys[2 + l], 5)
        w1r = scale * jax.random.uniform(k1, (modes1, modes2, width, width), jnp.float32)
        w1i = scale * jax.random.uniform(k2, (modes1, modes2, width, width), jnp.float32)
        w2r = scale * jax.random.uniform(k3, (modes1, modes2, width, width), jnp.float32)
        w2i = scale * jax.random.uniform(k4, (modes1, modes2, width, width), jnp.float32)
        w_spec = jnp.concatenate(
            [_complex_block_weight(w1r, w1i), _complex_block_weight(w2r, w2i)], axis=0)
        conv = _make_grouped_linear(*linear_init(k5, width, width))
        blocks.append(dict(pack=pack, w_pairs=_pack_mode_pairs(w_spec, pack), conv=conv))

    return dict(modes1=modes1, modes2=modes2, fc0=fc0, fc1=fc1, blocks=blocks)


# --------------------------------------------------------------------------- #
if __name__ == "__main__":
    in_channels, out_channels = 4, 3
    width, modes1, modes2, layers = 32, 4, 4, 2
    B, H, W = 2, 16, 16

    key = jax.random.PRNGKey(0)
    kx, kp = jax.random.split(key)
    x = jax.random.normal(kx, (B, in_channels, H, W), dtype=jnp.float32)   # NCHW
    params = init_params(kp, in_channels, out_channels, width, modes1, modes2, layers)

    fwd = jax.jit(lambda inp: fno_forward(inp, params))
    out = jax.block_until_ready(fwd(x))

    assert out.shape == (B, out_channels, H, W), out.shape
    assert bool(jnp.all(jnp.isfinite(out)))
    print("KERNEL_OK")
</pallas_src>

<mosaic_0001>
module attributes {stable_mosaic.version = 11 : i64} {
  func.func @_linear_kernel(%arg0: i32, %arg1: memref<32x32xbf16, #tpu.memory_space<vmem>>, %arg2: memref<32x256xbf16, #tpu.memory_space<vmem>>, %arg3: memref<1x256xf32, #tpu.memory_space<vmem>>, %arg4: memref<32x256xbf16, #tpu.memory_space<vmem>>) attributes {dimension_semantics = [#tpu.dimension_semantics<parallel>], iteration_bounds = array<i64: 2>, scalar_prefetch = 0 : i64, scratch_operands = 0 : i64, tpu.core_type = #tpu.core_type<tc>, window_params = [{transform_indices = @transform_0, window_bounds = array<i64: 32, 32>}, {pipeline_mode = #tpu.pipeline_mode<synchronous>, transform_indices = @transform_1, window_bounds = array<i64: 32, 256>}, {pipeline_mode = #tpu.pipeline_mode<synchronous>, transform_indices = @transform_2, window_bounds = array<i64: 1, 256>}, {transform_indices = @transform_3, window_bounds = array<i64: 32, 256>}]} {
    %c0 = arith.constant 0 : index
    %c0_0 = arith.constant 0 : index
    %0 = vector.load %arg1[%c0, %c0_0] : memref<32x32xbf16, #tpu.memory_space<vmem>>, vector<32x32xbf16>
    %c0_1 = arith.constant 0 : index
    %c0_2 = arith.constant 0 : index
    %1 = vector.load %arg2[%c0_1, %c0_2] : memref<32x256xbf16, #tpu.memory_space<vmem>>, vector<32x256xbf16>
    %cst = arith.constant dense<0.000000e+00> : vector<32x256xf32>
    %2 = tpu.matmul %0, %1, %cst {dimension_numbers = #tpu.dot_dimension_numbers<[1], [0], [0], [1], [0, 0, 1, 1], [], []>} : vector<32x32xbf16>, vector<32x256xbf16>, vector<32x256xf32> -> vector<32x256xf32>
    %c0_3 = arith.constant 0 : index
    %c0_4 = arith.constant 0 : index
    %3 = vector.load %arg3[%c0_3, %c0_4] : memref<1x256xf32, #tpu.memory_space<vmem>>, vector<1x256xf32>
    %4 = vector.broadcast %3 : vector<1x256xf32> to vector<32x256xf32>
    %5 = arith.addf %2, %4 : vector<32x256xf32>
    %6 = arith.truncf %5 : vector<32x256xf32> to vector<32x256xbf16>
    %c0_5 = arith.constant 0 : index
    %c0_6 = arith.constant 0 : index
    %7 = vector.load %arg4[%c0_5, %c0_6] : memref<32x256xbf16, #tpu.memory_space<vmem>>, vector<32x256xbf16>
    tpu.vector_store %arg4[%c0_5, %c0_6], %6 {strides = array<i32>} : memref<32x256xbf16, #tpu.memory_space<vmem>>, vector<32x256xbf16>,
    return
  }
  func.func @transform_0(%arg0: i32) -> (i32, i32) {
    %c0_i32 = arith.constant 0 : i32
    %c0_i32_0 = arith.constant 0 : i32
    return %arg0, %c0_i32 : i32, i32
  }
  func.func @transform_1(%arg0: i32) -> (i32, i32) {
    %c0_i32 = arith.constant 0 : i32
    %c0_i32_0 = arith.constant 0 : i32
    %c0_i32_1 = arith.constant 0 : i32
    return %c0_i32, %c0_i32_0 : i32, i32
  }
  func.func @transform_2(%arg0: i32) -> (i32, i32) {
    %c0_i32 = arith.constant 0 : i32
    %c0_i32_0 = arith.constant 0 : i32
    %c0_i32_1 = arith.constant 0 : i32
    return %c0_i32, %c0_i32_0 : i32, i32
  }
  func.func @transform_3(%arg0: i32) -> (i32, i32) {
    %c0_i32 = arith.constant 0 : i32
    %c0_i32_0 = arith.constant 0 : i32
    return %arg0, %c0_i32 : i32, i32
  }
}

module attributes {stable_mosaic.version = 11 : i64} {
  func.func @_fwd_dft_kernel(%arg0: i32, %arg1: memref<1x16x512xbf16, #tpu.memory_space<vmem>>, %arg2: memref<512x128xbf16, #tpu.memory_space<vmem>>, %arg3: memref<512x128xbf16, #tpu.memory_space<vmem>>, %arg4: memref<8x16xf32, #tpu.memory_space<vmem>>, %arg5: memref<8x16xf32, #tpu.memory_space<vmem>>, %arg6: memref<1x8x128xf32, #tpu.memory_space<vmem>>, %arg7: memref<1x8x128xf32, #tpu.memory_space<vmem>>) attributes {dimension_semantics = [#tpu.dimension_semantics<parallel>], iteration_bounds = array<i64: 2>, scalar_prefetch = 0 : i64, scratch_operands = 0 : i64, tpu.core_type = #tpu.core_type<tc>, window_params = [{transform_indices = @transform_0, window_bounds = array<i64: 1, 16, 512>}, {pipeline_mode = #tpu.pipeline_mode<synchronous>, transform_indices = @transform_1, window_bounds = array<i64: 512, 128>}, {pipeline_mode = #tpu.pipeline_mode<synchronous>, transform_indices = @transform_2, window_bounds = array<i64: 512, 128>}, {pipeline_mode = #tpu.pipeline_mode<synchronous>, transform_indices = @transform_3, window_bounds = array<i64: 8, 16>}, {pipeline_mode = #tpu.pipeline_mode<synchronous>, transform_indices = @transform_4, window_bounds = array<i64: 8, 16>}, {transform_indices = @transform_5, window_bounds = array<i64: 1, 8, 128>}, {transform_indices = @transform_6, window_bounds = array<i64: 1, 8, 128>}]} {
    %c0 = arith.constant 0 : index
    %c0_0 = arith.constant 0 : index
    %c0_1 = arith.constant 0 : index
    %0 = vector.load %arg1[%c0, %c0_0, %c0_1] : memref<1x16x512xbf16, #tpu.memory_space<vmem>>, vector<1x16x512xbf16>
    %1 = vector.shape_cast %0 : vector<1x16x512xbf16> to vector<16x512xbf16>
    %c0_2 = arith.constant 0 : index
    %c0_3 = arith.constant 0 : index
    %2 = vector.load %arg2[%c0_2, %c0_3] : memref<512x128xbf16, #tpu.memory_space<vmem>>, vector<512x128xbf16>
    %cst = arith.constant dense<0.000000e+00> : vector<16x128xf32>
    %3 = tpu.matmul %1, %2, %cst {dimension_numbers = #tpu.dot_dimension_numbers<[1], [0], [0], [1], [0, 0, 1, 1], [], []>} : vector<16x512xbf16>, vector<512x128xbf16>, vector<16x128xf32> -> vector<16x128xf32>
    %c0_4 = arith.constant 0 : index
    %c0_5 = arith.constant 0 : index
    %4 = vector.load %arg3[%c0_4, %c0_5] : memref<512x128xbf16, #tpu.memory_space<vmem>>, vector<512x128xbf16>
    %cst_6 = arith.constant dense<0.000000e+00> : vector<16x128xf32>
    %5 = tpu.matmul %1, %4, %cst_6 {dimension_numbers = #tpu.dot_dimension_numbers<[1], [0], [0], [1], [0, 0, 1, 1], [], []>} : vector<16x512xbf16>, vector<512x128xbf16>, vector<16x128xf32> -> vector<16x128xf32>
    %cst_7 = arith.constant 0.000000e+00 : f32
    %6 = vector.broadcast %cst_7 : f32 to vector<16x128xf32>
    %7 = arith.subf %6, %5 : vector<16x128xf32>
    %c0_8 = arith.constant 0 : index
    %c0_9 = arith.constant 0 : index
    %8 = vector.load %arg4[%c0_8, %c0_9] : memref<8x16xf32, #tpu.memory_space<vmem>>, vector<8x16xf32>
    %c0_10 = arith.constant 0 : index
    %c0_11 = arith.constant 0 : index
    %9 = vector.load %arg5[%c0_10, %c0_11] : memref<8x16xf32, #tpu.memory_space<vmem>>, vector<8x16xf32>
    %cst_12 = arith.constant dense<0.000000e+00> : vector<8x128xf32>
    %10 = tpu.matmul %8, %3, %cst_12 {dimension_numbers = #tpu.dot_dimension_numbers<[1], [0], [0], [1], [0, 0, 1, 1], [], []>} : vector<8x16xf32>, vector<16x128xf32>, vector<8x128xf32> -> vector<8x128xf32>
    %cst_13 = arith.constant dense<0.000000e+00> : vector<8x128xf32>
    %11 = tpu.matmul %9, %7, %cst_13 {dimension_numbers = #tpu.dot_dimension_numbers<[1], [0], [0], [1], [0, 0, 1, 1], [], []>} : vector<8x16xf32>, vector<16x128xf32>, vector<8x128xf32> -> vector<8x128xf32>
    %12 = arith.addf %10, %11 : vector<8x128xf32>
    %c0_14 = arith.constant 0 : index
    %c0_15 = arith.constant 0 : index
    %c0_16 = arith.constant 0 : index
    %13 = vector.load %arg6[%c0_14, %c0_15, %c0_16] : memref<1x8x128xf32, #tpu.memory_space<vmem>>, vector<1x8x128xf32>
    %14 = vector.shape_cast %13 : vector<1x8x128xf32> to vector<8x128xf32>
    %15 = vector.shape_cast %12 : vector<8x128xf32> to vector<1x8x128xf32>
    tpu.vector_store %arg6[%c0_14, %c0_15, %c0_16], %15 {strides = array<i32>} : memref<1x8x128xf32, #tpu.memory_space<vmem>>, vector<1x8x128xf32>,
    %cst_17 = arith.constant dense<0.000000e+00> : vector<8x128xf32>
    %16 = tpu.matmul %8, %7, %cst_17 {dimension_numbers = #tpu.dot_dimension_numbers<[1], [0], [0], [1], [0, 0, 1, 1], [], []>} : vector<8x16xf32>, vector<16x128xf32>, vector<8x128xf32> -> vector<8x128xf32>
    %cst_18 = arith.constant dense<0.000000e+00> : vector<8x128xf32>
    %17 = tpu.matmul %9, %3, %cst_18 {dimension_numbers = #tpu.dot_dimension_numbers<[1], [0], [0], [1], [0, 0, 1, 1], [], []>} : vector<8x16xf32>, vector<16x128xf32>, vector<8x128xf32> -> vector<8x128xf32>
    %18 = arith.subf %16, %17 : vector<8x128xf32>
    %c0_19 = arith.constant 0 : index
    %c0_20 = arith.constant 0 : index
    %c0_21 = arith.constant 0 : index
    %19 = vector.load %arg7[%c0_19, %c0_20, %c0_21] : memref<1x8x128xf32, #tpu.memory_space<vmem>>, vector<1x8x128xf32>
    %20 = vector.shape_cast %19 : vector<1x8x128xf32> to vector<8x128xf32>
    %21 = vector.shape_cast %18 : vector<8x128xf32> to vector<1x8x128xf32>
    tpu.vector_store %arg7[%c0_19, %c0_20, %c0_21], %21 {strides = array<i32>} : memref<1x8x128xf32, #tpu.memory_space<vmem>>, vector<1x8x128xf32>,
    return
  }
  func.func @transform_0(%arg0: i32) -> (i32, i32, i32) {
    %c0_i32 = arith.constant 0 : i32
    %c0_i32_0 = arith.constant 0 : i32
    %c0_i32_1 = arith.constant 0 : i32
    return %arg0, %c0_i32, %c0_i32_0 : i32, i32, i32
  }
  func.func @transform_1(%arg0: i32) -> (i32, i32) {
    %c0_i32 = arith.constant 0 : i32
    %c0_i32_0 = arith.constant 0 : i32
    %c0_i32_1 = arith.constant 0 : i32
    return %c0_i32, %c0_i32_0 : i32, i32
  }
  func.func @transform_2(%arg0: i32) -> (i32, i32) {
    %c0_i32 = arith.constant 0 : i32
    %c0_i32_0 = arith.constant 0 : i32
    %c0_i32_1 = arith.constant 0 : i32
    return %c0_i32, %c0_i32_0 : i32, i32
  }
  func.func @transform_3(%arg0: i32) -> (i32, i32) {
    %c0_i32 = arith.constant 0 : i32
    %c0_i32_0 = arith.constant 0 : i32
    %c0_i32_1 = arith.constant 0 : i32
    return %c0_i32, %c0_i32_0 : i32, i32
  }
  func.func @transform_4(%arg0: i32) -> (i32, i32) {
    %c0_i32 = arith.constant 0 : i32
    %c0_i32_0 = arith.constant 0 : i32
    %c0_i32_1 = arith.constant 0 : i32
    return %c0_i32, %c0_i32_0 : i32, i32
  }
  func.func @transform_5(%arg0: i32) -> (i32, i32, i32) {
    %c0_i32 = arith.constant 0 : i32
    %c0_i32_0 = arith.constant 0 : i32
    %c0_i32_1 = arith.constant 0 : i32
    return %arg0, %c0_i32, %c0_i32_0 : i32, i32, i32
  }
  func.func @transform_6(%arg0: i32) -> (i32, i32, i32) {
    %c0_i32 = arith.constant 0 : i32
    %c0_i32_0 = arith.constant 0 : i32
    %c0_i32_1 = arith.constant 0 : i32
    return %arg0, %c0_i32, %c0_i32_0 : i32, i32, i32
  }
}

module attributes {stable_mosaic.version = 11 : i64} {
  func.func @_mode_mix_kernel(%arg0: i32, %arg1: memref<8x2x128xf32, #tpu.memory_space<vmem>>, %arg2: memref<8x128x128xf32, #tpu.memory_space<vmem>>, %arg3: memref<8x2x128xf32, #tpu.memory_space<vmem>>) attributes {dimension_semantics = [#tpu.dimension_semantics<parallel>], iteration_bounds = array<i64: 2>, scalar_prefetch = 0 : i64, scratch_operands = 0 : i64, tpu.core_type = #tpu.core_type<tc>, window_params = [{transform_indices = @transform_0, window_bounds = array<i64: 8, 2, 128>}, {transform_indices = @transform_1, window_bounds = array<i64: 8, 128, 128>}, {transform_indices = @transform_2, window_bounds = array<i64: 8, 2, 128>}]} {
    %c0 = arith.constant 0 : index
    %c0_0 = arith.constant 0 : index
    %c0_1 = arith.constant 0 : index
    %0 = vector.load %arg1[%c0, %c0_0, %c0_1] : memref<8x2x128xf32, #tpu.memory_space<vmem>>, vector<1x2x128xf32>
    %1 = vector.shape_cast %0 : vector<1x2x128xf32> to vector<2x128xf32>
    %c0_2 = arith.constant 0 : index
    %c0_3 = arith.constant 0 : index
    %c0_4 = arith.constant 0 : index
    %2 = vector.load %arg2[%c0_2, %c0_3, %c0_4] : memref<8x128x128xf32, #tpu.memory_space<vmem>>, vector<1x128x128xf32>
    %3 = vector.shape_cast %2 : vector<1x128x128xf32> to vector<128x128xf32>
    %cst = arith.constant dense<0.000000e+00> : vector<2x128xf32>
    %4 = tpu.matmul %1, %3, %cst {dimension_numbers = #tpu.dot_dimension_numbers<[1], [0], [0], [1], [0, 0, 1, 1], [], []>} : vector<2x128xf32>, vector<128x128xf32>, vector<2x128xf32> -> vector<2x128xf32>
    %c0_5 = arith.constant 0 : index
    %c0_6 = arith.constant 0 : index
    %c0_7 = arith.constant 0 : index
    %5 = vector.load %arg3[%c0_5, %c0_6, %c0_7] : memref<8x2x128xf32, #tpu.memory_space<vmem>>, vector<1x2x128xf32>
    %6 = vector.shape_cast %5 : vector<1x2x128xf32> to vector<2x128xf32>
    %7 = vector.shape_cast %4 : vector<2x128xf32> to vector<1x2x128xf32>
    tpu.vector_store %arg3[%c0_5, %c0_6, %c0_7], %7 {strides = array<i32>} : memref<8x2x128xf32, #tpu.memory_space<vmem>>, vector<1x2x128xf32>,
    %c1 = arith.constant 1 : index
    %c0_8 = arith.constant 0 : index
    %c0_9 = arith.constant 0 : index
    %8 = vector.load %arg1[%c1, %c0_8, %c0_9] : memref<8x2x128xf32, #tpu.memory_space<vmem>>, vector<1x2x128xf32>
    %9 = vector.shape_cast %8 : vector<1x2x128xf32> to vector<2x128xf32>
    %c1_10 = arith.constant 1 : index
    %c0_11 = arith.constant 0 : index
    %c0_12 = arith.constant 0 : index
    %10 = vector.load %arg2[%c1_10, %c0_11, %c0_12] : memref<8x128x128xf32, #tpu.memory_space<vmem>>, vector<1x128x128xf32>
    %11 = vector.shape_cast %10 : vector<1x128x128xf32> to vector<128x128xf32>
    %cst_13 = arith.constant dense<0.000000e+00> : vector<2x128xf32>
    %12 = tpu.matmul %9, %11, %cst_13 {dimension_numbers = #tpu.dot_dimension_numbers<[1], [0], [0], [1], [0, 0, 1, 1], [], []>} : vector<2x128xf32>, vector<128x128xf32>, vector<2x128xf32> -> vector<2x128xf32>
    %c1_14 = arith.constant 1 : index
    %c0_15 = arith.constant 0 : index
    %c0_16 = arith.constant 0 : index
    %13 = vector.load %arg3[%c1_14, %c0_15, %c0_16] : memref<8x2x128xf32, #tpu.memory_space<vmem>>, vector<1x2x128xf32>
    %14 = vector.shape_cast %13 : vector<1x2x128xf32> to vector<2x128xf32>
    %15 = vector.shape_cast %12 : vector<2x128xf32> to vector<1x2x128xf32>
    tpu.vector_store %arg3[%c1_14, %c0_15, %c0_16], %15 {strides = array<i32>} : memref<8x2x128xf32, #tpu.memory_space<vmem>>, vector<1x2x128xf32>,
    %c2 = arith.constant 2 : index
    %c0_17 = arith.constant 0 : index
    %c0_18 = arith.constant 0 : index
    %16 = vector.load %arg1[%c2, %c0_17, %c0_18] : memref<8x2x128xf32, #tpu.memory_space<vmem>>, vector<1x2x128xf32>
    %17 = vector.shape_cast %16 : vector<1x2x128xf32> to vector<2x128xf32>
    %c2_19 = arith.constant 2 : index
    %c0_20 = arith.constant 0 : index
    %c0_21 = arith.constant 0 : index
    %18 = vector.load %arg2[%c2_19, %c0_20, %c0_21] : memref<8x128x128xf32, #tpu.memory_space<vmem>>, vector<1x128x128xf32>
    %19 = vector.shape_cast %18 : vector<1x128x128xf32> to vector<128x128xf32>
    %cst_22 = arith.constant dense<0.000000e+00> : vector<2x128xf32>
    %20 = tpu.matmul %17, %19, %cst_22 {dimension_numbers = #tpu.dot_dimension_numbers<[1], [0], [0], [1], [0, 0, 1, 1], [], []>} : vector<2x128xf32>, vector<128x128xf32>, vector<2x128xf32> -> vector<2x128xf32>
    %c2_23 = arith.constant 2 : index
    %c0_24 = arith.constant 0 : index
    %c0_25 = arith.constant 0 : index
    %21 = vector.load %arg3[%c2_23, %c0_24, %c0_25] : memref<8x2x128xf32, #tpu.memory_space<vmem>>, vector<1x2x128xf32>
    %22 = vector.shape_cast %21 : vector<1x2x128xf32> to vector<2x128xf32>
    %23 = vector.shape_cast %20 : vector<2x128xf32> to vector<1x2x128xf32>
    tpu.vector_store %arg3[%c2_23, %c0_24, %c0_25], %23 {strides = array<i32>} : memref<8x2x128xf32, #tpu.memory_space<vmem>>, vector<1x2x128xf32>,
    %c3 = arith.constant 3 : index
    %c0_26 = arith.constant 0 : index
    %c0_27 = arith.constant 0 : index
    %24 = vector.load %arg1[%c3, %c0_26, %c0_27] : memref<8x2x128xf32, #tpu.memory_space<vmem>>, vector<1x2x128xf32>
    %25 = vector.shape_cast %24 : vector<1x2x128xf32> to vector<2x128xf32>
    %c3_28 = arith.constant 3 : index
    %c0_29 = arith.constant 0 : index
    %c0_30 = arith.constant 0 : index
    %26 = vector.load %arg2[%c3_28, %c0_29, %c0_30] : memref<8x128x128xf32, #tpu.memory_space<vmem>>, vector<1x128x128xf32>
    %27 = vector.shape_cast %26 : vector<1x128x128xf32> to vector<128x128xf32>
    %cst_31 = arith.constant dense<0.000000e+00> : vector<2x128xf32>
    %28 = tpu.matmul %25, %27, %cst_31 {dimension_numbers = #tpu.dot_dimension_numbers<[1], [0], [0], [1], [0, 0, 1, 1], [], []>} : vector<2x128xf32>, vector<128x128xf32>, vector<2x128xf32> -> vector<2x128xf32>
    %c3_32 = arith.constant 3 : index
    %c0_33 = arith.constant 0 : index
    %c0_34 = arith.constant 0 : index
    %29 = vector.load %arg3[%c3_32, %c0_33, %c0_34] : memref<8x2x128xf32, #tpu.memory_space<vmem>>, vector<1x2x128xf32>
    %30 = vector.shape_cast %29 : vector<1x2x128xf32> to vector<2x128xf32>
    %31 = vector.shape_cast %28 : vector<2x128xf32> to vector<1x2x128xf32>
    tpu.vector_store %arg3[%c3_32, %c0_33, %c0_34], %31 {strides = array<i32>} : memref<8x2x128xf32, #tpu.memory_space<vmem>>, vector<1x2x128xf32>,
    %c4 = arith.constant 4 : index
    %c0_35 = arith.constant 0 : index
    %c0_36 = arith.constant 0 : index
    %32 = vector.load %arg1[%c4, %c0_35, %c0_36] : memref<8x2x128xf32, #tpu.memory_space<vmem>>, vector<1x2x128xf32>
    %33 = vector.shape_cast %32 : vector<1x2x128xf32> to vector<2x128xf32>
    %c4_37 = arith.constant 4 : index
    %c0_38 = arith.constant 0 : index
    %c0_39 = arith.constant 0 : index
    %34 = vector.load %arg2[%c4_37, %c0_38, %c0_39] : memref<8x128x128xf32, #tpu.memory_space<vmem>>, vector<1x128x128xf32>
    %35 = vector.shape_cast %34 : vector<1x128x128xf32> to vector<128x128xf32>
    %cst_40 = arith.constant dense<0.000000e+00> : vector<2x128xf32>
    %36 = tpu.matmul %33, %35, %cst_40 {dimension_numbers = #tpu.dot_dimension_numbers<[1], [0], [0], [1], [0, 0, 1, 1], [], []>} : vector<2x128xf32>, vector<128x128xf32>, vector<2x128xf32> -> vector<2x128xf32>
    %c4_41 = arith.constant 4 : index
    %c0_42 = arith.constant 0 : index
    %c0_43 = arith.constant 0 : index
    %37 = vector.load %arg3[%c4_41, %c0_42, %c0_43] : memref<8x2x128xf32, #tpu.memory_space<vmem>>, vector<1x2x128xf32>
    %38 = vector.shape_cast %37 : vector<1x2x128xf32> to vector<2x128xf32>
    %39 = vector.shape_cast %36 : vector<2x128xf32> to vector<1x2x128xf32>
    tpu.vector_store %arg3[%c4_41, %c0_42, %c0_43], %39 {strides = array<i32>} : memref<8x2x128xf32, #tpu.memory_space<vmem>>, vector<1x2x128xf32>,
    %c5 = arith.constant 5 : index
    %c0_44 = arith.constant 0 : index
    %c0_45 = arith.constant 0 : index
    %40 = vector.load %arg1[%c5, %c0_44, %c0_45] : memref<8x2x128xf32, #tpu.memory_space<vmem>>, vector<1x2x128xf32>
    %41 = vector.shape_cast %40 : vector<1x2x128xf32> to vector<2x128xf32>
    %c5_46 = arith.constant 5 : index
    %c0_47 = arith.constant 0 : index
    %c0_48 = arith.constant 0 : index
    %42 = vector.load %arg2[%c5_46, %c0_47, %c0_48] : memref<8x128x128xf32, #tpu.memory_space<vmem>>, vector<1x128x128xf32>
    %43 = vector.shape_cast %42 : vector<1x128x128xf32> to vector<128x128xf32>
    %cst_49 = arith.constant dense<0.000000e+00> : vector<2x128xf32>
    %44 = tpu.matmul %41, %43, %cst_49 {dimension_numbers = #tpu.dot_dimension_numbers<[1], [0], [0], [1], [0, 0, 1, 1], [], []>} : vector<2x128xf32>, vector<128x128xf32>, vector<2x128xf32> -> vector<2x128xf32>
    %c5_50 = arith.constant 5 : index
    %c0_51 = arith.constant 0 : index
    %c0_52 = arith.constant 0 : index
    %45 = vector.load %arg3[%c5_50, %c0_51, %c0_52] : memref<8x2x128xf32, #tpu.memory_space<vmem>>, vector<1x2x128xf32>
    %46 = vector.shape_cast %45 : vector<1x2x128xf32> to vector<2x128xf32>
    %47 = vector.shape_cast %44 : vector<2x128xf32> to vector<1x2x128xf32>
    tpu.vector_store %arg3[%c5_50, %c0_51, %c0_52], %47 {strides = array<i32>} : memref<8x2x128xf32, #tpu.memory_space<vmem>>, vector<1x2x128xf32>,
    %c6 = arith.constant 6 : index
    %c0_53 = arith.constant 0 : index
    %c0_54 = arith.constant 0 : index
    %48 = vector.load %arg1[%c6, %c0_53, %c0_54] : memref<8x2x128xf32, #tpu.memory_space<vmem>>, vector<1x2x128xf32>
    %49 = vector.shape_cast %48 : vector<1x2x128xf32> to vector<2x128xf32>
    %c6_55 = arith.constant 6 : index
    %c0_56 = arith.constant 0 : index
    %c0_57 = arith.constant 0 : index
    %50 = vector.load %arg2[%c6_55, %c0_56, %c0_57] : memref<8x128x128xf32, #tpu.memory_space<vmem>>, vector<1x128x128xf32>
    %51 = vector.shape_cast %50 : vector<1x128x128xf32> to vector<128x128xf32>
    %cst_58 = arith.constant dense<0.000000e+00> : vector<2x128xf32>
    %52 = tpu.matmul %49, %51, %cst_58 {dimension_numbers = #tpu.dot_dimension_numbers<[1], [0], [0], [1], [0, 0, 1, 1], [], []>} : vector<2x128xf32>, vector<128x128xf32>, vector<2x128xf32> -> vector<2x128xf32>
    %c6_59 = arith.constant 6 : index
    %c0_60 = arith.constant 0 : index
    %c0_61 = arith.constant 0 : index
    %53 = vector.load %arg3[%c6_59, %c0_60, %c0_61] : memref<8x2x128xf32, #tpu.memory_space<vmem>>, vector<1x2x128xf32>
    %54 = vector.shape_cast %53 : vector<1x2x128xf32> to vector<2x128xf32>
    %55 = vector.shape_cast %52 : vector<2x128xf32> to vector<1x2x128xf32>
    tpu.vector_store %arg3[%c6_59, %c0_60, %c0_61], %55 {strides = array<i32>} : memref<8x2x128xf32, #tpu.memory_space<vmem>>, vector<1x2x128xf32>,
    %c7 = arith.constant 7 : index
    %c0_62 = arith.constant 0 : index
    %c0_63 = arith.constant 0 : index
    %56 = vector.load %arg1[%c7, %c0_62, %c0_63] : memref<8x2x128xf32, #tpu.memory_space<vmem>>, vector<1x2x128xf32>
    %57 = vector.shape_cast %56 : vector<1x2x128xf32> to vector<2x128xf32>
    %c7_64 = arith.constant 7 : index
    %c0_65 = arith.constant 0 : index
    %c0_66 = arith.constant 0 : index
    %58 = vector.load %arg2[%c7_64, %c0_65, %c0_66] : memref<8x128x128xf32, #tpu.memory_space<vmem>>, vector<1x128x128xf32>
    %59 = vector.shape_cast %58 : vector<1x128x128xf32> to vector<128x128xf32>
    %cst_67 = arith.constant dense<0.000000e+00> : vector<2x128xf32>
    %60 = tpu.matmul %57, %59, %cst_67 {dimension_numbers = #tpu.dot_dimension_numbers<[1], [0], [0], [1], [0, 0, 1, 1], [], []>} : vector<2x128xf32>, vector<128x128xf32>, vector<2x128xf32> -> vector<2x128xf32>
    %c7_68 = arith.constant 7 : index
    %c0_69 = arith.constant 0 : index
    %c0_70 = arith.constant 0 : index
    %61 = vector.load %arg3[%c7_68, %c0_69, %c0_70] : memref<8x2x128xf32, #tpu.memory_space<vmem>>, vector<1x2x128xf32>
    %62 = vector.shape_cast %61 : vector<1x2x128xf32> to vector<2x128xf32>
    %63 = vector.shape_cast %60 : vector<2x128xf32> to vector<1x2x128xf32>
    tpu.vector_store %arg3[%c7_68, %c0_69, %c0_70], %63 {strides = array<i32>} : memref<8x2x128xf32, #tpu.memory_space<vmem>>, vector<1x2x128xf32>,
    return
  }
  func.func @transform_0(%arg0: i32) -> (i32, i32, i32) {
    %c0_i32 = arith.constant 0 : i32
    %c0_i32_0 = arith.constant 0 : i32
    %c0_i32_1 = arith.constant 0 : i32
    return %arg0, %c0_i32, %c0_i32_0 : i32, i32, i32
  }
  func.func @transform_1(%arg0: i32) -> (i32, i32, i32) {
    %c0_i32 = arith.constant 0 : i32
    %c0_i32_0 = arith.constant 0 : i32
    %c0_i32_1 = arith.constant 0 : i32
    return %arg0, %c0_i32, %c0_i32_0 : i32, i32, i32
  }
  func.func @transform_2(%arg0: i32) -> (i32, i32, i32) {
    %c0_i32 = arith.constant 0 : i32
    %c0_i32_0 = arith.constant 0 : i32
    %c0_i32_1 = arith.constant 0 : i32
    return %arg0, %c0_i32, %c0_i32_0 : i32, i32, i32
  }
}

module attributes {stable_mosaic.version = 11 : i64} {
  func.func @_inv_dft_kernel(%arg0: i32, %arg1: memref<1x8x128xf32, #tpu.memory_space<vmem>>, %arg2: memref<1x8x128xf32, #tpu.memory_space<vmem>>, %arg3: memref<128x512xf32, #tpu.memory_space<vmem>>, %arg4: memref<128x512xf32, #tpu.memory_space<vmem>>, %arg5: memref<16x8xf32, #tpu.memory_space<vmem>>, %arg6: memref<16x8xf32, #tpu.memory_space<vmem>>, %arg7: memref<1x16x512xbf16, #tpu.memory_space<vmem>>) attributes {dimension_semantics = [#tpu.dimension_semantics<parallel>], iteration_bounds = array<i64: 2>, scalar_prefetch = 0 : i64, scratch_operands = 0 : i64, tpu.core_type = #tpu.core_type<tc>, window_params = [{transform_indices = @transform_0, window_bounds = array<i64: 1, 8, 128>}, {transform_indices = @transform_1, window_bounds = array<i64: 1, 8, 128>}, {pipeline_mode = #tpu.pipeline_mode<synchronous>, transform_indices = @transform_2, window_bounds = array<i64: 128, 512>}, {pipeline_mode = #tpu.pipeline_mode<synchronous>, transform_indices = @transform_3, window_bounds = array<i64: 128, 512>}, {pipeline_mode = #tpu.pipeline_mode<synchronous>, transform_indices = @transform_4, window_bounds = array<i64: 16, 8>}, {pipeline_mode = #tpu.pipeline_mode<synchronous>, transform_indices = @transform_5, window_bounds = array<i64: 16, 8>}, {transform_indices = @transform_6, window_bounds = array<i64: 1, 16, 512>}]} {
    %c0 = arith.constant 0 : index
    %c0_0 = arith.constant 0 : index
    %c0_1 = arith.constant 0 : index
    %0 = vector.load %arg1[%c0, %c0_0, %c0_1] : memref<1x8x128xf32, #tpu.memory_space<vmem>>, vector<1x8x128xf32>
    %1 = vector.shape_cast %0 : vector<1x8x128xf32> to vector<8x128xf32>
    %c0_2 = arith.constant 0 : index
    %c0_3 = arith.constant 0 : index
    %c0_4 = arith.constant 0 : index
    %2 = vector.load %arg2[%c0_2, %c0_3, %c0_4] : memref<1x8x128xf32, #tpu.memory_space<vmem>>, vector<1x8x128xf32>
    %3 = vector.shape_cast %2 : vector<1x8x128xf32> to vector<8x128xf32>
    %c0_5 = arith.constant 0 : index
    %c0_6 = arith.constant 0 : index
    %4 = vector.load %arg3[%c0_5, %c0_6] : memref<128x512xf32, #tpu.memory_space<vmem>>, vector<128x512xf32>
    %cst = arith.constant dense<0.000000e+00> : vector<8x512xf32>
    %5 = tpu.matmul %1, %4, %cst {dimension_numbers = #tpu.dot_dimension_numbers<[1], [0], [0], [1], [0, 0, 1, 1], [], []>} : vector<8x128xf32>, vector<128x512xf32>, vector<8x512xf32> -> vector<8x512xf32>
    %c0_7 = arith.constant 0 : index
    %c0_8 = arith.constant 0 : index
    %6 = vector.load %arg4[%c0_7, %c0_8] : memref<128x512xf32, #tpu.memory_space<vmem>>, vector<128x512xf32>
    %cst_9 = arith.constant dense<0.000000e+00> : vector<8x512xf32>
    %7 = tpu.matmul %3, %6, %cst_9 {dimension_numbers = #tpu.dot_dimension_numbers<[1], [0], [0], [1], [0, 0, 1, 1], [], []>} : vector<8x128xf32>, vector<128x512xf32>, vector<8x512xf32> -> vector<8x512xf32>
    %8 = arith.subf %5, %7 : vector<8x512xf32>
    %c0_10 = arith.constant 0 : index
    %c0_11 = arith.constant 0 : index
    %9 = vector.load %arg4[%c0_10, %c0_11] : memref<128x512xf32, #tpu.memory_space<vmem>>, vector<128x512xf32>
    %cst_12 = arith.constant dense<0.000000e+00> : vector<8x512xf32>
    %10 = tpu.matmul %1, %9, %cst_12 {dimension_numbers = #tpu.dot_dimension_numbers<[1], [0], [0], [1], [0, 0, 1, 1], [], []>} : vector<8x128xf32>, vector<128x512xf32>, vector<8x512xf32> -> vector<8x512xf32>
    %c0_13 = arith.constant 0 : index
    %c0_14 = arith.constant 0 : index
    %11 = vector.load %arg3[%c0_13, %c0_14] : memref<128x512xf32, #tpu.memory_space<vmem>>, vector<128x512xf32>
    %cst_15 = arith.constant dense<0.000000e+00> : vector<8x512xf32>
    %12 = tpu.matmul %3, %11, %cst_15 {dimension_numbers = #tpu.dot_dimension_numbers<[1], [0], [0], [1], [0, 0, 1, 1], [], []>} : vector<8x128xf32>, vector<128x512xf32>, vector<8x512xf32> -> vector<8x512xf32>
    %13 = arith.addf %10, %12 : vector<8x512xf32>
    %c0_16 = arith.constant 0 : index
    %c0_17 = arith.constant 0 : index
    %14 = vector.load %arg5[%c0_16, %c0_17] : memref<16x8xf32, #tpu.memory_space<vmem>>, vector<16x8xf32>
    %cst_18 = arith.constant dense<0.000000e+00> : vector<16x512xf32>
    %15 = tpu.matmul %14, %8, %cst_18 {dimension_numbers = #tpu.dot_dimension_numbers<[1], [0], [0], [1], [0, 0, 1, 1], [], []>} : vector<16x8xf32>, vector<8x512xf32>, vector<16x512xf32> -> vector<16x512xf32>
    %c0_19 = arith.constant 0 : index
    %c0_20 = arith.constant 0 : index
    %16 = vector.load %arg6[%c0_19, %c0_20] : memref<16x8xf32, #tpu.memory_space<vmem>>, vector<16x8xf32>
    %cst_21 = arith.constant dense<0.000000e+00> : vector<16x512xf32>
    %17 = tpu.matmul %16, %13, %cst_21 {dimension_numbers = #tpu.dot_dimension_numbers<[1], [0], [0], [1], [0, 0, 1, 1], [], []>} : vector<16x8xf32>, vector<8x512xf32>, vector<16x512xf32> -> vector<16x512xf32>
    %18 = arith.subf %15, %17 : vector<16x512xf32>
    %19 = arith.truncf %18 : vector<16x512xf32> to vector<16x512xbf16>
    %c0_22 = arith.constant 0 : index
    %c0_23 = arith.constant 0 : index
    %c0_24 = arith.constant 0 : index
    %20 = vector.load %arg7[%c0_22, %c0_23, %c0_24] : memref<1x16x512xbf16, #tpu.memory_space<vmem>>, vector<1x16x512xbf16>
    %21 = vector.shape_cast %20 : vector<1x16x512xbf16> to vector<16x512xbf16>
    %22 = vector.shape_cast %19 : vector<16x512xbf16> to vector<1x16x512xbf16>
    tpu.vector_store %arg7[%c0_22, %c0_23, %c0_24], %22 {strides = array<i32>} : memref<1x16x512xbf16, #tpu.memory_space<vmem>>, vector<1x16x512xbf16>,
    return
  }
  func.func @transform_0(%arg0: i32) -> (i32, i32, i32) {
    %c0_i32 = arith.constant 0 : i32
    %c0_i32_0 = arith.constant 0 : i32
    %c0_i32_1 = arith.constant 0 : i32
    return %arg0, %c0_i32, %c0_i32_0 : i32, i32, i32
  }
  func.func @transform_1(%arg0: i32) -> (i32, i32, i32) {
    %c0_i32 = arith.constant 0 : i32
    %c0_i32_0 = arith.constant 0 : i32
    %c0_i32_1 = arith.constant 0 : i32
    return %arg0, %c0_i32, %c0_i32_0 : i32, i32, i32
  }
  func.func @transform_2(%arg0: i32) -> (i32, i32) {
    %c0_i32 = arith.constant 0 : i32
    %c0_i32_0 = arith.constant 0 : i32
    %c0_i32_1 = arith.constant 0 : i32
    return %c0_i32, %c0_i32_0 : i32, i32
  }
  func.func @transform_3(%arg0: i32) -> (i32, i32) {
    %c0_i32 = arith.constant 0 : i32
    %c0_i32_0 = arith.constant 0 : i32
    %c0_i32_1 = arith.constant 0 : i32
    return %c0_i32, %c0_i32_0 : i32, i32
  }
  func.func @transform_4(%arg0: i32) -> (i32, i32) {
    %c0_i32 = arith.constant 0 : i32
    %c0_i32_0 = arith.constant 0 : i32
    %c0_i32_1 = arith.constant 0 : i32
    return %c0_i32, %c0_i32_0 : i32, i32
  }
  func.func @transform_5(%arg0: i32) -> (i32, i32) {
    %c0_i32 = arith.constant 0 : i32
    %c0_i32_0 = arith.constant 0 : i32
    %c0_i32_1 = arith.constant 0 : i32
    return %c0_i32, %c0_i32_0 : i32, i32
  }
  func.func @transform_6(%arg0: i32) -> (i32, i32, i32) {
    %c0_i32 = arith.constant 0 : i32
    %c0_i32_0 = arith.constant 0 : i32
    %c0_i32_1 = arith.constant 0 : i32
    return %arg0, %c0_i32, %c0_i32_0 : i32, i32, i32
  }
}

module attributes {stable_mosaic.version = 11 : i64} {
  func.func @_combine_kernel(%arg0: i32, %arg1: memref<32x256xbf16, #tpu.memory_space<vmem>>, %arg2: memref<32x256xbf16, #tpu.memory_space<vmem>>, %arg3: memref<256x256xbf16, #tpu.memory_space<vmem>>, %arg4: memref<1x256xf32, #tpu.memory_space<vmem>>, %arg5: memref<32x256xbf16, #tpu.memory_space<vmem>>) attributes {dimension_semantics = [#tpu.dimension_semantics<parallel>], iteration_bounds = array<i64: 2>, scalar_prefetch = 0 : i64, scratch_operands = 0 : i64, tpu.core_type = #tpu.core_type<tc>, window_params = [{transform_indices = @transform_0, window_bounds = array<i64: 32, 256>}, {transform_indices = @transform_1, window_bounds = array<i64: 32, 256>}, {pipeline_mode = #tpu.pipeline_mode<synchronous>, transform_indices = @transform_2, window_bounds = array<i64: 256, 256>}, {pipeline_mode = #tpu.pipeline_mode<synchronous>, transform_indices = @transform_3, window_bounds = array<i64: 1, 256>}, {transform_indices = @transform_4, window_bounds = array<i64: 32, 256>}]} {
    %c0 = arith.constant 0 : index
    %c0_0 = arith.constant 0 : index
    %0 = vector.load %arg1[%c0, %c0_0] : memref<32x256xbf16, #tpu.memory_space<vmem>>, vector<32x256xbf16>
    %1 = arith.extf %0 : vector<32x256xbf16> to vector<32x256xf32>
    %c0_1 = arith.constant 0 : index
    %c0_2 = arith.constant 0 : index
    %2 = vector.load %arg2[%c0_1, %c0_2] : memref<32x256xbf16, #tpu.memory_space<vmem>>, vector<32x256xbf16>
    %c0_3 = arith.constant 0 : index
    %c0_4 = arith.constant 0 : index
    %3 = vector.load %arg3[%c0_3, %c0_4] : memref<256x256xbf16, #tpu.memory_space<vmem>>, vector<256x256xbf16>
    %cst = arith.constant dense<0.000000e+00> : vector<32x256xf32>
    %4 = tpu.matmul %2, %3, %cst {dimension_numbers = #tpu.dot_dimension_numbers<[1], [0], [0], [1], [0, 0, 1, 1], [], []>} : vector<32x256xbf16>, vector<256x256xbf16>, vector<32x256xf32> -> vector<32x256xf32>
    %5 = arith.addf %1, %4 : vector<32x256xf32>
    %c0_5 = arith.constant 0 : index
    %c0_6 = arith.constant 0 : index
    %6 = vector.load %arg4[%c0_5, %c0_6] : memref<1x256xf32, #tpu.memory_space<vmem>>, vector<1x256xf32>
    %7 = vector.broadcast %6 : vector<1x256xf32> to vector<32x256xf32>
    %8 = arith.addf %5, %7 : vector<32x256xf32>
    %cst_7 = arith.constant 5.000000e-01 : f32
    %9 = vector.broadcast %cst_7 : f32 to vector<32x256xf32>
    %10 = arith.mulf %9, %8 : vector<32x256xf32>
    %cst_8 = arith.constant 0.707106769 : f32
    %11 = vector.broadcast %cst_8 : f32 to vector<32x256xf32>
    %12 = arith.mulf %8, %11 : vector<32x256xf32>
    %13 = math.erf %12 : vector<32x256xf32>
    %cst_9 = arith.constant 1.000000e+00 : f32
    %14 = vector.broadcast %cst_9 : f32 to vector<32x256xf32>
    %15 = arith.addf %14, %13 : vector<32x256xf32>
    %16 = arith.mulf %10, %15 : vector<32x256xf32>
    %17 = arith.truncf %16 : vector<32x256xf32> to vector<32x256xbf16>
    %c0_10 = arith.constant 0 : index
    %c0_11 = arith.constant 0 : index
    %18 = vector.load %arg5[%c0_10, %c0_11] : memref<32x256xbf16, #tpu.memory_space<vmem>>, vector<32x256xbf16>
    tpu.vector_store %arg5[%c0_10, %c0_11], %17 {strides = array<i32>} : memref<32x256xbf16, #tpu.memory_space<vmem>>, vector<32x256xbf16>,
    return
  }
  func.func @transform_0(%arg0: i32) -> (i32, i32) {
    %c0_i32 = arith.constant 0 : i32
    %c0_i32_0 = arith.constant 0 : i32
    return %arg0, %c0_i32 : i32, i32
  }
  func.func @transform_1(%arg0: i32) -> (i32, i32) {
    %c0_i32 = arith.constant 0 : i32
    %c0_i32_0 = arith.constant 0 : i32
    return %arg0, %c0_i32 : i32, i32
  }
  func.func @transform_2(%arg0: i32) -> (i32, i32) {
    %c0_i32 = arith.constant 0 : i32
    %c0_i32_0 = arith.constant 0 : i32
    %c0_i32_1 = arith.constant 0 : i32
    return %c0_i32, %c0_i32_0 : i32, i32
  }
  func.func @transform_3(%arg0: i32) -> (i32, i32) {
    %c0_i32 = arith.constant 0 : i32
    %c0_i32_0 = arith.constant 0 : i32
    %c0_i32_1 = arith.constant 0 : i32
    return %c0_i32, %c0_i32_0 : i32, i32
  }
  func.func @transform_4(%arg0: i32) -> (i32, i32) {
    %c0_i32 = arith.constant 0 : i32
    %c0_i32_0 = arith.constant 0 : i32
    return %arg0, %c0_i32 : i32, i32
  }
}

module attributes {stable_mosaic.version = 11 : i64} {
  func.func @_linear_kernel(%arg0: i32, %arg1: memref<32x256xbf16, #tpu.memory_space<vmem>>, %arg2: memref<256x24xbf16, #tpu.memory_space<vmem>>, %arg3: memref<1x24xf32, #tpu.memory_space<vmem>>, %arg4: memref<32x24xf32, #tpu.memory_space<vmem>>) attributes {dimension_semantics = [#tpu.dimension_semantics<parallel>], iteration_bounds = array<i64: 2>, scalar_prefetch = 0 : i64, scratch_operands = 0 : i64, tpu.core_type = #tpu.core_type<tc>, window_params = [{transform_indices = @transform_0, window_bounds = array<i64: 32, 256>}, {pipeline_mode = #tpu.pipeline_mode<synchronous>, transform_indices = @transform_1, window_bounds = array<i64: 256, 24>}, {pipeline_mode = #tpu.pipeline_mode<synchronous>, transform_indices = @transform_2, window_bounds = array<i64: 1, 24>}, {transform_indices = @transform_3, window_bounds = array<i64: 32, 24>}]} {
    %c0 = arith.constant 0 : index
    %c0_0 = arith.constant 0 : index
    %0 = vector.load %arg1[%c0, %c0_0] : memref<32x256xbf16, #tpu.memory_space<vmem>>, vector<32x256xbf16>
    %c0_1 = arith.constant 0 : index
    %c0_2 = arith.constant 0 : index
    %1 = vector.load %arg2[%c0_1, %c0_2] : memref<256x24xbf16, #tpu.memory_space<vmem>>, vector<256x24xbf16>
    %cst = arith.constant dense<0.000000e+00> : vector<32x24xf32>
    %2 = tpu.matmul %0, %1, %cst {dimension_numbers = #tpu.dot_dimension_numbers<[1], [0], [0], [1], [0, 0, 1, 1], [], []>} : vector<32x256xbf16>, vector<256x24xbf16>, vector<32x24xf32> -> vector<32x24xf32>
    %c0_3 = arith.constant 0 : index
    %c0_4 = arith.constant 0 : index
    %3 = vector.load %arg3[%c0_3, %c0_4] : memref<1x24xf32, #tpu.memory_space<vmem>>, vector<1x24xf32>
    %4 = vector.broadcast %3 : vector<1x24xf32> to vector<32x24xf32>
    %5 = arith.addf %2, %4 : vector<32x24xf32>
    %c0_5 = arith.constant 0 : index
    %c0_6 = arith.constant 0 : index
    %6 = vector.load %arg4[%c0_5, %c0_6] : memref<32x24xf32, #tpu.memory_space<vmem>>, vector<32x24xf32>
    tpu.vector_store %arg4[%c0_5, %c0_6], %5 {strides = array<i32>} : memref<32x24xf32, #tpu.memory_space<vmem>>, vector<32x24xf32>,
    return
  }
  func.func @transform_0(%arg0: i32) -> (i32, i32) {
    %c0_i32 = arith.constant 0 : i32
    %c0_i32_0 = arith.constant 0 : i32
    return %arg0, %c0_i32 : i32, i32
  }
  func.func @transform_1(%arg0: i32) -> (i32, i32) {
    %c0_i32 = arith.constant 0 : i32
    %c0_i32_0 = arith.constant 0 : i32
    %c0_i32_1 = arith.constant 0 : i32
    return %c0_i32, %c0_i32_0 : i32, i32
  }
  func.func @transform_2(%arg0: i32) -> (i32, i32) {
    %c0_i32 = arith.constant 0 : i32
    %c0_i32_0 = arith.constant 0 : i32
    %c0_i32_1 = arith.constant 0 : i32
    return %c0_i32, %c0_i32_0 : i32, i32
  }
  func.func @transform_3(%arg0: i32) -> (i32, i32) {
    %c0_i32 = arith.constant 0 : i32
    %c0_i32_0 = arith.constant 0 : i32
    return %arg0, %c0_i32 : i32, i32
  }
}

</mosaic_0001>

<bundles_post_ra>
// kernel: _lambda_.10
= control target key start
LH: loop header
LB: loop body
LE: loop exit
PB: predicated region body
PF: predicated region fallthrough
CT: control target
= control target key end

     0   :  { %s452_s12 = smov 0   ;;  %s488_s0 = inlined_call_operand.vmem [shape: bf16[64,32], index: 0, kind: input, shape index: {}]   ;;  %s489_s1 = inlined_call_operand.vmem [shape: bf16[32,256], index: 1, kind: input, shape index: {}]   ;;  %s490_s2 = inlined_call_operand.vmem [shape: f32[1,256], index: 2, kind: input, shape index: {}]   ;;  %s491_s3 = inlined_call_operand.vmem [shape: bf16[64,256], index: 3, kind: output, shape index: {}]  }
   0x1 LB: > { %s373_s13 = sadd.s32 4294967295, %s429_s12   ;;  %p377_p0 = scmp.ge.s32.totalorder %s429_s12, 1  ;;  %s429_s12 = sphi %s452_s12, %s13_s12  }
   0x2   : > { %p138_p1 = scmp.lt.s32.totalorder %s429_s12, 3 }
   0x4   : > { %p139_p2 = pnand %p377_p0, %p138_p1 }
   0x5   : > { %v415_v0 = vld [vmem:[%s489_s1 + $0x4] ss:$8 sps:$4 sm:$0xff] (!%p139_p2)   ;;  %s378_s16 = sshll.u32 (!%p139_p2), %s373_s13, 2  ;;  %v417_v1 = vld [vmem:[%s489_s1] ss:$8 sps:$4 sm:$0xff] (!%p139_p2)   ;;  %v431_v2 = vmov (!%p139_p2), 0   ;;  %v187_v7 = vlaneseq (!%p139_p2) }
   0x6   : > { %142 = sbr.rel (%p139_p2) target bundleno = 237 (0xed), region = 32  ;;  %266 = vmatprep.mubr.bf16.mxu0 (!%p139_p2), %v431_v2  ;;  %276 = vmatprep.mubr.bf16.mxu1 (!%p139_p2), %v431_v2  ;;  %p164_p3 = scmp.lt.s32.totalorder (!%p139_p2), %s378_s16, 7  ;;  %v418_v3 = vld [vmem:[%s489_s1 + $0x14] ss:$8 sps:$4 sm:$0xff] (!%p139_p2)   ;;  %v420_v4 = vld [vmem:[%s489_s1 + $0x10] ss:$8 sps:$4 sm:$0xff] (!%p139_p2)  }
   0x7   : > { %234 = vmatprep.subr.bf16.mxu0 (!%p139_p2), %v415_v0  ;;  %402 = vmatprep.subr.bf16.mxu1 (!%p139_p2), %v415_v0  ;;  %vm227_vm0 = vcmask (!%p139_p2), 261120   ;;  %v188_v8 = vshrl.u32 (!%p139_p2), %v187_v7, 7  ;;  %v185_v10 = vld [vmem:[%s490_s2] sm:$0x3] (!%p139_p2) }
   0x8   : > { %235 = vmatpush1.bf16.msra.mxu0 (!%p139_p2), %v417_v1  ;;  %404 = vmatpush1.bf16.msra.mxu1 (!%p139_p2), %v417_v1 }
   0x9   : > { %236 = vmatprep.subr.bf16.mxu0 (!%p139_p2), %v418_v3  ;;  %403 = vmatprep.subr.bf16.mxu1 (!%p139_p2), %v418_v3  ;;  %v189_v9 = vsub.s32 (!%p139_p2), 0, %v188_v8  ;;  %v193_v11 = vsub.s32 (!%p139_p2), 1, %v188_v8 }
   0xb   : > { %v190_v12 = vrot.slane (!%p139_p2), %v185_v10, %v189_v9  ;;  %v194_v13 = vrot.slane (!%p139_p2), %v185_v10, %v193_v11 }
   0xc   : > { %237 = vmatpush1.bf16.msra.mxu0 (!%p139_p2), %v420_v4  ;;  %405 = vmatpush1.bf16.msra.mxu1 (!%p139_p2), %v420_v4 }
   0xd   : > { %s493_s16 = smov (!%p164_p3, %s378_s16), 7 }
   0xe   : > { %s379_s23 = sshll.u32 %s493_s16, 2  ;;  %s397_s29 = sshll.u32 %s493_s16, 3 }
   0xf   : > { %s167_s26 = scalar_lea.vmem %s488_s0, %s379_s23  ;;  %s174_s5 = scalar_lea.vmem %s491_s3, %s397_s29 }
  0x10   : > { %v421_v5 = vld [vmem:[%s167_s26] sm:$0xff]   ;;  %v422_v6 = vld [vmem:[%s167_s26 + $0x8] sm:$0xff]  }
  0x11   : > { %389 = vmatmul.mubr.msk.bf16.vlgmr.msra.gmra.mrb[0].mxu0 %vm227_vm0, %v421_v5  ;;  %390 = vmatmul.mubr.msk.bf16.vlgmr.msra.gmra.mrb[0].mxu1 %vm227_vm0, %v422_v6 }
  0xe4   : > { %v268_v14 = vpop.f32.mrb[0].mxu0  ;;  %v278_v15 = vpop.f32.mrb[0].mxu1 }
  0xe5   : > { %v269_v16 = vadd.f32 %v268_v14, %v190_v12  ;;  %v279_v17 = vadd.f32 %v278_v15, %v190_v12  ;;  %v270_v18 = vpop.f32.mrb[1].mxu0  ;;  %v280_v19 = vpop.f32.mrb[1].mxu1 }
  0xe6   : > { %v271_v20 = vadd.f32 %v270_v18, %v194_v13  ;;  %v281_v21 = vadd.f32 %v280_v19, %v194_v13  ;;  %v272_v22 = vpop.f32.mrb[2].mxu0  ;;  %v282_v23 = vpop.f32.mrb[2].mxu1 }
  0xe7   : > { %v273_v24 = vadd.f32 %v272_v22, %v190_v12  ;;  %v283_v25 = vadd.f32 %v282_v23, %v190_v12  ;;  %v274_v26 = vpop.f32.mrb[3].mxu0  ;;  %v284_v27 = vpop.f32.mrb[3].mxu1 }
  0xe8   : > { %v398_v28 = vpack.c.bf16 %v271_v20, %v269_v16  ;;  %v400_v29 = vpack.c.bf16 %v281_v21, %v279_v17  ;;  %v275_v30 = vadd.f32 %v274_v26, %v194_v13  ;;  %v285_v31 = vadd.f32 %v284_v27, %v194_v13 }
  0xea   : > { %311 = vst [vmem:[%s174_s5] sm:$0xff] %v398_v28  ;;  %v399_v32 = vpack.c.bf16 %v275_v30, %v273_v24  ;;  %v401_v33 = vpack.c.bf16 %v285_v31, %v283_v25  ;;  %313 = vst [vmem:[%s174_s5 + $0x10] sm:$0xff] %v400_v29 }
  0xec   : > { %312 = vst [vmem:[%s174_s5 + $0x8] sm:$0xff] %v399_v32  ;;  %314 = vst [vmem:[%s174_s5 + $0x18] sm:$0xff] %v401_v33 }
  0xed PF: > { %s13_s12 = sadd.s32 1, %s429_s12  }
  0xee   : > { %p10_p4 = scmp.ge.s32.totalorder %s13_s12, 4  }
  0xf0   :  { %12 = sbr.rel (!%p10_p4) target bundleno = 1 (0x1), region = 62 }

// kernel: _lambda_.11
= control target key start
LH: loop header
LB: loop body
LE: loop exit
PB: predicated region body
PF: predicated region fallthrough
CT: control target
= control target key end

     0   :  { %s1693_s21 = smov 0   ;;  %s1931_s0 = inlined_call_operand.vmem [shape: bf16[2,16,512], index: 0, kind: input, shape index: {}]   ;;  %s1932_s1 = inlined_call_operand.vmem [shape: bf16[512,128], index: 1, kind: input, shape index: {}]   ;;  %s1933_s2 = inlined_call_operand.vmem [shape: bf16[512,128], index: 2, kind: input, shape index: {}]   ;;  %s1934_s3 = inlined_call_operand.vmem [shape: f32[8,16], index: 3, kind: input, shape index: {}]   ;;  %s1935_s4 = inlined_call_operand.vmem [shape: f32[8,16], index: 4, kind: input, shape index: {}]   ;;  %s1936_s5 = inlined_call_operand.vmem [shape: f32[2,8,128], index: 5, kind: output, shape index: {0}]   ;;  %s1937_s6 = inlined_call_operand.vmem [shape: f32[2,8,128], index: 6, kind: output, shape index: {1}]  }
   0x1 LB: > { %s1340_s22 = sadd.s32 4294967295, %s1653_s21   ;;  %p1344_p0 = scmp.ge.s32.totalorder %s1653_s21, 1  ;;  %s1653_s21 = sphi %s1693_s21, %s17_s21  }
   0x2   : > { %p215_p1 = scmp.lt.s32.totalorder %s1653_s21, 3 }
   0x4   : > { %p216_p2 = pnand %p1344_p0, %p215_p1 }
   0x5   : > { %v1577_v0 = vld [vmem:[%s1932_s1 + $0x40] sm:$0xff] (!%p216_p2)   ;;  %v1581_v4 = vld [vmem:[%s1932_s1 + $0x48] sm:$0xff] (!%p216_p2)   ;;  %v1585_v8 = vld [vmem:[%s1932_s1 + $0x50] sm:$0xff] (!%p216_p2)   ;;  %p248_p3 = scmp.lt.s32.totalorder (!%p216_p2), %s1340_s22, 1  ;;  %vm1656_vm0 = vmmov (!%p216_p2), 0   ;;  %vm966_vm1 = vcmask (!%p216_p2), 130048  }
   0x6   : > { %219 = sbr.rel (%p216_p2) target bundleno = 520 (0x208), region = 40  ;;  %v1578_v1 = vld [vmem:[%s1932_s1 + $0xc0] sm:$0xff] (!%p216_p2)   ;;  %1424 = vmatprep.subr.bf16.mxu0 (!%p216_p2), %v1577_v0  ;;  %v1582_v5 = vld [vmem:[%s1932_s1 + $0xc8] sm:$0xff] (!%p216_p2)   ;;  %v1586_v9 = vld [vmem:[%s1932_s1 + $0xd0] sm:$0xff] (!%p216_p2)  }
   0x7   : > { %v1579_v2 = vld [vmem:[%s1932_s1] sm:$0xff] (!%p216_p2)   ;;  %1446 = vmatprep.subr.bf16.mxu1 (!%p216_p2), %v1578_v1  ;;  %v1583_v6 = vld [vmem:[%s1932_s1 + $0x8] sm:$0xff] (!%p216_p2)   ;;  %v1587_v10 = vld [vmem:[%s1932_s1 + $0x10] sm:$0xff] (!%p216_p2)  }
   0x8   : > { %v1580_v3 = vld [vmem:[%s1932_s1 + $0x80] sm:$0xff] (!%p216_p2)   ;;  %1425 = vmatpush3.bf16.msra.mxu0 (!%p216_p2), %v1579_v2  ;;  %v1584_v7 = vld [vmem:[%s1932_s1 + $0x88] sm:$0xff] (!%p216_p2)   ;;  %v1588_v11 = vld [vmem:[%s1932_s1 + $0x90] sm:$0xff] (!%p216_p2)  }
   0x9   : > { %1447 = vmatpush3.bf16.msra.mxu1 (!%p216_p2), %v1580_v3  ;;  %1426 = vmatprep.subr.bf16.mxu0 (!%p216_p2), %v1581_v4  ;;  %v1589_v12 = vld [vmem:[%s1932_s1 + $0x58] sm:$0xff] (!%p216_p2)   ;;  %v1593_v16 = vld [vmem:[%s1932_s1 + $0x60] sm:$0xff] (!%p216_p2)   ;;  %v1597_v20 = vld [vmem:[%s1932_s1 + $0x68] sm:$0xff] (!%p216_p2)   ;;  %v1655_v4 = vmov (!%p216_p2), 0.0|0.0  }
   0xa   : > { %1448 = vmatprep.subr.bf16.mxu1 (!%p216_p2), %v1582_v5  ;;  %v1590_v13 = vld [vmem:[%s1932_s1 + $0xd8] sm:$0xff] (!%p216_p2)   ;;  %v1594_v17 = vld [vmem:[%s1932_s1 + $0xe0] sm:$0xff] (!%p216_p2)   ;;  %v1598_v21 = vld [vmem:[%s1932_s1 + $0xe8] sm:$0xff] (!%p216_p2)   ;;  %v1657_v5 = vmov (!%p216_p2), 0.0  }
   0xb   : > { %v1591_v14 = vld [vmem:[%s1932_s1 + $0x18] sm:$0xff] (!%p216_p2)   ;;  %v1595_v18 = vld [vmem:[%s1932_s1 + $0x20] sm:$0xff] (!%p216_p2)   ;;  %v1599_v22 = vld [vmem:[%s1932_s1 + $0x28] sm:$0xff] (!%p216_p2)  }
   0xc   : > { %1427 = vmatpush3.bf16.msra.mxu0 (!%p216_p2), %v1583_v6  ;;  %v1592_v15 = vld [vmem:[%s1932_s1 + $0x98] sm:$0xff] (!%p216_p2)   ;;  %v1596_v19 = vld [vmem:[%s1932_s1 + $0xa0] sm:$0xff] (!%p216_p2)   ;;  %v1600_v23 = vld [vmem:[%s1932_s1 + $0xa8] sm:$0xff] (!%p216_p2)  }
   0xd   : > { %1449 = vmatpush3.bf16.msra.mxu1 %v1584_v7  ;;  %1428 = vmatprep.subr.bf16.mxu0 %v1585_v8  ;;  %s1939_s22 = smov (!%p248_p3, %s1340_s22), 1  ;;  %v1601_v24 = vld [vmem:[%s1932_s1 + $0x70] sm:$0xff]   ;;  %v1605_v28 = vld [vmem:[%s1932_s1 + $0x78] sm:$0xff]   ;;  %v1615_v36 = vld [vmem:[%s1933_s2 + $0x40] sm:$0xff]  }
   0xe   : > { %1450 = vmatprep.subr.bf16.mxu1 %v1586_v9  ;;  %v1602_v25 = vld [vmem:[%s1932_s1 + $0xf0] sm:$0xff]   ;;  %s1423_s9 = sshll.u32 %s1939_s22, 5  ;;  %v1606_v29 = vld [vmem:[%s1932_s1 + $0xf8] sm:$0xff]   ;;  %v1616_v37 = vld [vmem:[%s1933_s2 + $0xc0] sm:$0xff]   ;;  %s1347_s27 = sshll.u32 %s1939_s22, 3 }
   0xf   : > { %v1603_v26 = vld [vmem:[%s1932_s1 + $0x30] sm:$0xff]   ;;  %s252_s18 = scalar_lea.vmem %s1931_s0, %s1423_s9  ;;  %v1607_v30 = vld [vmem:[%s1932_s1 + $0x38] sm:$0xff]   ;;  %v1617_v38 = vld [vmem:[%s1933_s2] sm:$0xff]   ;;  %s260_s30 = scalar_lea.vmem %s1937_s6, %s1347_s27 }
  0x10   : > { %1429 = vmatpush3.bf16.msra.mxu0 %v1587_v10  ;;  %v1604_v27 = vld [vmem:[%s1932_s1 + $0xb0] sm:$0xff]   ;;  %v1608_v31 = vld [vmem:[%s1932_s1 + $0xb8] sm:$0xff]   ;;  %v1618_v39 = vld [vmem:[%s1933_s2 + $0x80] sm:$0xff]   ;;  %s256_s9 = scalar_lea.vmem %s1936_s5, %s1347_s27 }
  0x11   : > { %1451 = vmatpush3.bf16.msra.mxu1 %v1588_v11  ;;  %1430 = vmatprep.subr.bf16.mxu0 %v1589_v12  ;;  %v1807_v32 = vld [vmem:[%s252_s18] ss:$16 sps:$4 sm:$0xff]   ;;  %v1611_v33 = vld [vmem:[%s252_s18 + $0x4] ss:$16 sps:$4 sm:$0xff]   ;;  %v1809_v34 = vld [vmem:[%s252_s18 + $0x8] ss:$16 sps:$4 sm:$0xff]  }
  0x12   : > { %1452 = vmatprep.subr.bf16.mxu1 %v1590_v13  ;;  %v1614_v35 = vld [vmem:[%s252_s18 + $0xc] ss:$16 sps:$4 sm:$0xff]   ;;  %574 = vmatprep.mubr.bf16.mxu0 %v1611_v33  ;;  %v1623_v44 = vld [vmem:[%s1933_s2 + $0x50] sm:$0xff]   ;;  %v1631_v52 = vld [vmem:[%s1933_s2 + $0x60] sm:$0xff]  }
  0x13   : > { %615 = vmatprep.mubr.bf16.mxu1 %v1614_v35  ;;  %v1619_v40 = vld [vmem:[%s1933_s2 + $0x48] sm:$0xff]   ;;  %v1624_v45 = vld [vmem:[%s1933_s2 + $0xd0] sm:$0xff]   ;;  %v1627_v48 = vld [vmem:[%s1933_s2 + $0x58] sm:$0xff]  }
  0x14   : > { %1431 = vmatpush3.bf16.msra.mxu0 %v1591_v14  ;;  %v1620_v41 = vld [vmem:[%s1933_s2 + $0xc8] sm:$0xff]   ;;  %v1625_v46 = vld [vmem:[%s1933_s2 + $0x10] sm:$0xff]   ;;  %v1628_v49 = vld [vmem:[%s1933_s2 + $0xd8] sm:$0xff]  }
  0x15   : > { %1453 = vmatpush3.bf16.msra.mxu1 %v1592_v15  ;;  %1432 = vmatprep.subr.bf16.mxu0 %v1593_v16  ;;  %v1621_v42 = vld [vmem:[%s1933_s2 + $0x8] sm:$0xff]   ;;  %v1626_v47 = vld [vmem:[%s1933_s2 + $0x90] sm:$0xff]   ;;  %v1629_v50 = vld [vmem:[%s1933_s2 + $0x18] sm:$0xff]  }
  0x16   : > { %1454 = vmatprep.subr.bf16.mxu1 %v1594_v17  ;;  %v1622_v43 = vld [vmem:[%s1933_s2 + $0x88] sm:$0xff]   ;;  %v1630_v51 = vld [vmem:[%s1933_s2 + $0x98] sm:$0xff]   ;;  %v1632_v53 = vld [vmem:[%s1933_s2 + $0xe0] sm:$0xff]  }
  0x17   : > { %v1633_v54 = vld [vmem:[%s1933_s2 + $0x20] sm:$0xff]   ;;  %v1635_v56 = vld [vmem:[%s1933_s2 + $0x68] sm:$0xff]   ;;  %v1639_v60 = vld [vmem:[%s1933_s2 + $0x70] sm:$0xff]  }
  0x18   : > { %1433 = vmatpush3.bf16.msra.mxu0 %v1595_v18  ;;  %v1634_v55 = vld [vmem:[%s1933_s2 + $0xa0] sm:$0xff]   ;;  %v1636_v57 = vld [vmem:[%s1933_s2 + $0xe8] sm:$0xff]   ;;  %v1640_v61 = vld [vmem:[%s1933_s2 + $0xf0] sm:$0xff]  }
  0x19   : > { %1455 = vmatpush3.bf16.msra.mxu1 %v1596_v19  ;;  %1434 = vmatprep.subr.bf16.mxu0 %v1597_v20  ;;  %v1637_v58 = vld [vmem:[%s1933_s2 + $0x28] sm:$0xff]   ;;  %v1641_v62 = vld [vmem:[%s1933_s2 + $0x30] sm:$0xff]   ;;  %v1643_v0 = vld [vmem:[%s1933_s2 + $0x78] sm:$0xff]  }
  0x1a   : > { %1456 = vmatprep.subr.bf16.mxu1 %v1598_v21  ;;  %v1638_v59 = vld [vmem:[%s1933_s2 + $0xa8] sm:$0xff]   ;;  %v1642_v63 = vld [vmem:[%s1933_s2 + $0xb0] sm:$0xff]   ;;  %v1644_v1 = vld [vmem:[%s1933_s2 + $0xf8] sm:$0xff]  }
  0x1b   : > { %v1645_v2 = vld [vmem:[%s1933_s2 + $0x38] sm:$0xff]  }
  0x1c   : > { %1435 = vmatpush3.bf16.msra.mxu0 %v1599_v22  ;;  %v1646_v3 = vld [vmem:[%s1933_s2 + $0xb8] sm:$0xff]  }
  0x1d   : > { %1457 = vmatpush3.bf16.msra.mxu1 %v1600_v23  ;;  %1436 = vmatprep.subr.bf16.mxu0 %v1601_v24 }
  0x1e   : > { %1458 = vmatprep.subr.bf16.mxu1 %v1602_v25 }
  0x20   : > { %1437 = vmatpush3.bf16.msra.mxu0 %v1603_v26 }
  0x21   : > { %1459 = vmatpush3.bf16.msra.mxu1 %v1604_v27  ;;  %1438 = vmatprep.subr.bf16.mxu0 %v1605_v28 }
  0x22   : > { %1460 = vmatprep.subr.bf16.mxu1 %v1606_v29 }
  0x24   : > { %1439 = vmatpush3.bf16.msra.mxu0 %v1607_v30 }
  0x25   : > { %1461 = vmatpush3.bf16.msra.mxu1 %v1608_v31  ;;  %1468 = vmatprep.subr.bf16.mxu0 %v1615_v36 }
  0x26   : > { %1490 = vmatprep.subr.bf16.mxu1 %v1616_v37 }
  0x27   : > { %575 = vmatmul.mubr.bf16.vlgmr.msra.gmra.mrb[0].mxu0 %v1807_v32 }
  0x28   : > { %616 = vmatmul.mubr.bf16.vlgmr.msra.gmra.mrb[0].mxu1 %v1809_v34  ;;  %912 = vmatprep.mubr.bf16.mxu0 %v1611_v33 }
  0x29   : > { %1469 = vmatpush3.bf16.msra.mxu0 %v1617_v38  ;;  %953 = vmatprep.mubr.bf16.mxu1 %v1614_v35  ;;  %v965_v38 = vld [vmem:[%s1935_s4] sm:$0xff] }
  0x2a   : > { %1491 = vmatpush3.bf16.msra.mxu1 %v1618_v39  ;;  %1470 = vmatprep.subr.bf16.mxu0 %v1619_v40  ;;  %v964_v39 = vld [vmem:[%s1934_s3] sm:$0xff] }
  0x2b   : > { %1492 = vmatprep.subr.bf16.mxu1 %v1620_v41 }
  0x2d   : > { %1471 = vmatpush3.bf16.msra.mxu0 %v1621_v42 }
  0x2e   : > { %1493 = vmatpush3.bf16.msra.mxu1 %v1622_v43  ;;  %1472 = vmatprep.subr.bf16.mxu0 %v1623_v44 }
  0x2f   : > { %1494 = vmatprep.subr.bf16.mxu1 %v1624_v45 }
  0x31   : > { %1473 = vmatpush3.bf16.msra.mxu0 %v1625_v46 }
  0x32   : > { %1495 = vmatpush3.bf16.msra.mxu1 %v1626_v47  ;;  %1474 = vmatprep.subr.bf16.mxu0 %v1627_v48 }
  0x33   : > { %1496 = vmatprep.subr.bf16.mxu1 %v1628_v49 }
  0x35   : > { %1475 = vmatpush3.bf16.msra.mxu0 %v1629_v50 }
  0x36   : > { %1497 = vmatpush3.bf16.msra.mxu1 %v1630_v51  ;;  %1476 = vmatprep.subr.bf16.mxu0 %v1631_v52 }
  0x37   : > { %1498 = vmatprep.subr.bf16.mxu1 %v1632_v53 }
  0x39   : > { %1477 = vmatpush3.bf16.msra.mxu0 %v1633_v54 }
  0x3a   : > { %1499 = vmatpush3.bf16.msra.mxu1 %v1634_v55  ;;  %1478 = vmatprep.subr.bf16.mxu0 %v1635_v56 }
  0x3b   : > { %1500 = vmatprep.subr.bf16.mxu1 %v1636_v57 }
  0x3d   : > { %1479 = vmatpush3.bf16.msra.mxu0 %v1637_v58 }
  0x3e   : > { %1501 = vmatpush3.bf16.msra.mxu1 %v1638_v59  ;;  %1480 = vmatprep.subr.bf16.mxu0 %v1639_v60 }
  0x3f   : > { %1502 = vmatprep.subr.bf16.mxu1 %v1640_v61 }
  0x41   : > { %1481 = vmatpush3.bf16.msra.mxu0 %v1641_v62 }
  0x42   : > { %1503 = vmatpush3.bf16.msra.mxu1 %v1642_v63  ;;  %1482 = vmatprep.subr.bf16.mxu0 %v1643_v0 }
  0x43   : > { %1504 = vmatprep.subr.bf16.mxu1 %v1644_v1 }
  0x45   : > { %1483 = vmatpush3.bf16.msra.mxu0 %v1645_v2 }
  0x46   : > { %1505 = vmatpush3.bf16.msra.mxu1 %v1646_v3  ;;  %1552 = vmatprep.subr.bf16.mxu0 %v1655_v4 }
  0x47   : > { %1558 = vmatprep.subr.bf16.mxu1 %v1655_v4 }
  0x48   : > { %913 = vmatmul.mubr.bf16.vlgmr.msra.gmra.mrb[4].mxu0 %v1807_v32 }
  0x49   : > { %954 = vmatmul.mubr.bf16.vlgmr.msra.gmra.mrb[4].mxu1 %v1809_v34  ;;  %1528 = vmatprep.mubr.msk.f32.mxu0 %vm1656_vm0, %v1657_v5 }
  0x4a   : > { %1542 = vmatprep.mubr.msk.f32.mxu1 %vm1656_vm0, %v1657_v5 }
  0xfa   : > { %v1440_v6 = vpop.f32.mrb[0].mxu0 }
  0xfb   : > { %v1462_v7 = vpop.f32.mrb[0].mxu1  ;;  %v1441_v8 = vpop.f32.mrb[1].mxu0 }
  0xfc   : > { %v1442_v9 = vadd.f32 %v1441_v8, %v1440_v6  ;;  %v1463_v10 = vpop.f32.mrb[1].mxu1  ;;  %v1443_v11 = vpop.f32.mrb[2].mxu0 }
  0xfd   : > { %v1464_v12 = vadd.f32 %v1463_v10, %v1462_v7  ;;  %v1465_v13 = vpop.f32.mrb[2].mxu1  ;;  %v1444_v14 = vpop.f32.mrb[3].mxu0 }
  0xfe   : > { %v1445_v15 = vadd.f32 %v1444_v14, %v1443_v11  ;;  %v1466_v16 = vpop.f32.mrb[3].mxu1 }
  0xff   : > { %v618_v17 = vadd.f32 %v1464_v12, %v1442_v9  ;;  %v1467_v18 = vadd.f32 %v1466_v16, %v1465_v13 }
 0x101   : > { %v621_v19 = vadd.f32 %v1467_v18, %v1445_v15 }
 0x103   : > { %v1556_v20 = vpack.c.bf16 %v621_v19, %v618_v17 }
 0x11b   : > { %v1484_v21 = vpop.f32.mrb[4].mxu0 }
 0x11c   : > { %v1506_v22 = vpop.f32.mrb[4].mxu1  ;;  %v1485_v23 = vpop.f32.mrb[5].mxu0 }
 0x11d   : > { %v1486_v24 = vadd.f32 %v1485_v23, %v1484_v21  ;;  %v1507_v25 = vpop.f32.mrb[5].mxu1  ;;  %v1487_v26 = vpop.f32.mrb[6].mxu0 }
 0x11e   : > { %v1508_v27 = vadd.f32 %v1507_v25, %v1506_v22  ;;  %v1509_v28 = vpop.f32.mrb[6].mxu1  ;;  %v1488_v29 = vpop.f32.mrb[7].mxu0 }
 0x11f   : > { %v1489_v30 = vadd.f32 %v1488_v29, %v1487_v26  ;;  %v1510_v31 = vpop.f32.mrb[7].mxu1 }
 0x120   : > { %v956_v32 = vadd.f32 %v1508_v27, %v1486_v24  ;;  %v1511_v33 = vadd.f32 %v1510_v31, %v1509_v28 }
 0x122   : > { %v959_v34 = vadd.f32 %v1511_v33, %v1489_v30  ;;  %v962_v35 = vsub.f32 0.0, %v956_v32 }
 0x124   : > { %v963_v36 = vsub.f32 0.0, %v959_v34 }
 0x126   : > { %v1553_v37 = vpack.c.bf16 %v963_v36, %v962_v35 }
 0x128   : > { %1554 = vmatpush3.bf16.msra.mxu0 %v1553_v37  ;;  %1560 = vmatpush3.bf16.msra.mxu1 %v1553_v37 }
 0x129   : > { %1555 = vmatprep.subr.bf16.mxu0 %v1655_v4  ;;  %1561 = vmatprep.subr.bf16.mxu1 %v1655_v4 }
 0x12b   : > { %1529 = vmatmul.mubr.msk.f32.vlgmr.msra.gmra.mrb[8].mxu0 %vm966_vm1, %v965_v38  ;;  %1543 = vmatmul.mubr.msk.f32.vlgmr.msra.gmra.mrb[8].mxu1 %vm966_vm1, %v964_v39 }
 0x12c   : > { %1557 = vmatpush3.bf16.msra.mxu0 %v1556_v20  ;;  %1563 = vmatpush3.bf16.msra.mxu1 %v1556_v20 }
 0x12d   : > { %1549 = vmatprep.mubr.msk.f32.mxu1 %vm1656_vm0, %v1657_v5  ;;  %1535 = vmatprep.mubr.msk.f32.mxu0 %vm1656_vm0, %v1657_v5 }
 0x12f   : > { %1550 = vmatmul.mubr.msk.f32.vlgmr.msra.gmra.mrb[10].mxu1 %vm966_vm1, %v965_v38 }
 0x133   : > { %1536 = vmatmul.mubr.msk.f32.vlgmr.msra.gmra.mrb[8].mxu0 %vm966_vm1, %v964_v39 }
 0x1fe   : > { %v1180_v40 = vpop.f32.mrb[8].mxu1 }
 0x1ff   : > { %v1544_v41 = vpop.f32.mrb[9].mxu1 }
 0x202   : > { %v1250_v42 = vpop.f32.mrb[10].mxu1 }
 0x203   : > { %v1254_v43 = vsub.f32 %v1180_v40, %v1250_v42  ;;  %v1551_v44 = vpop.f32.mrb[11].mxu1 }
 0x205   : > { %1255 = vst [vmem:[%s260_s30] sm:$0xff] %v1254_v43 }
 0x206   : > { %v1109_v45 = vpop.f32.mrb[8].mxu0 }
 0x207   : > { %1113 = vst [vmem:[%s256_s9] sm:$0xff] %v1109_v45  ;;  %v1537_v46 = vpop.f32.mrb[9].mxu0 }
 0x208 PF: > { %s17_s21 = sadd.s32 1, %s1653_s21  }
 0x209   : > { %p14_p4 = scmp.ge.s32.totalorder %s17_s21, 4  }
 0x20b   :  { %16 = sbr.rel (!%p14_p4) target bundleno = 1 (0x1), region = 82 }

// kernel: _lambda_.12
= control target key start
LH: loop header
LB: loop body
LE: loop exit
PB: predicated region body
PF: predicated region fallthrough
CT: control target
= control target key end

     0   :  { %s1751_s9 = smov 0   ;;  %s1999_s0 = inlined_call_operand.vmem [shape: f32[16,2,128], index: 0, kind: input, shape index: {}]   ;;  %s2000_s1 = inlined_call_operand.vmem [shape: f32[16,128,128], index: 1, kind: input, shape index: {}]   ;;  %s2001_s2 = inlined_call_operand.vmem [shape: f32[16,2,128], index: 2, kind: output, shape index: {}]  }
   0x1 LB: > { %s965_s10 = sadd.s32 4294967295, %s1731_s9   ;;  %p969_p0 = scmp.ge.s32.totalorder %s1731_s9, 1  ;;  %s1731_s9 = sphi %s1751_s9, %s12_s9  }
   0x2   : > { %p125_p1 = scmp.lt.s32.totalorder %s1731_s9, 3 }
   0x4   : > { %p126_p2 = pnand %p969_p0, %p125_p1 }
   0x5   : > { %s970_s11 = sshll.u32 (!%p126_p2), %s965_s10, 3  ;;  %v1733_v0 = vmov (!%p126_p2), 0.0|0.0   ;;  %vm1734_vm0 = vmmov (!%p126_p2), 0   ;;  %v1735_v1 = vmov (!%p126_p2), 0.0  }
   0x6   : > { %129 = sbr.rel (%p126_p2) target bundleno = 360 (0x168), region = 28  ;;  %1522 = vmatprep.subr.bf16.mxu0 (!%p126_p2), %v1733_v0  ;;  %1546 = vmatprep.subr.bf16.mxu1 (!%p126_p2), %v1733_v0  ;;  %p154_p3 = scmp.lt.s32.totalorder (!%p126_p2), %s970_s11, 15 }
   0x7   : > { %1274 = vmatprep.mubr.msk.f32.mxu0 (!%p126_p2), %vm1734_vm0, %v1735_v1  ;;  %1309 = vmatprep.mubr.msk.f32.mxu1 (!%p126_p2), %vm1734_vm0, %v1735_v1 }
   0xd   : > { %s2003_s11 = smov (!%p154_p3, %s970_s11), 15 }
   0xe   : > { %s1105_s12 = sshll.u32 %s2003_s11, 7  ;;  %s971_s16 = sshll.u32 %s2003_s11, 1 }
   0xf   : > { %s1771_s15 = scalar_lea.vmem %s2000_s1, %s1105_s12  ;;  %s1824_s19 = scalar_lea.vmem %s1999_s0, %s971_s16 }
  0x10   : > { %v173_v2 = vld [vmem:[%s1771_s15] sm:$0xff]  ;;  %v174_v3 = vld [vmem:[%s1771_s15 + $0x8] sm:$0xff]  ;;  %v175_v7 = vld [vmem:[%s1771_s15 + $0x10] sm:$0xff]  ;;  %s170_s22 = scalar_lea.vmem %s2001_s2, %s971_s16 }
  0x11   : > { %v978_v4 = vld [vmem:[%s1771_s15 + $0x80] sm:$0xff]  ;;  %v1523_v5 = vpack.c.bf16 %v174_v3, %v173_v2  ;;  %v979_v6 = vld [vmem:[%s1771_s15 + $0x88] sm:$0xff]  ;;  %v176_v8 = vld [vmem:[%s1771_s15 + $0x18] sm:$0xff] }
  0x12   : > { %v1547_v9 = vpack.c.bf16 %v979_v6, %v978_v4  ;;  %v980_v10 = vld [vmem:[%s1771_s15 + $0x90] sm:$0xff]  ;;  %v981_v11 = vld [vmem:[%s1771_s15 + $0x98] sm:$0xff]  ;;  %v1526_v12 = vpack.c.bf16 %v176_v8, %v175_v7  ;;  %v177_v14 = vld [vmem:[%s1771_s15 + $0x20] sm:$0xff] }
  0x13   : > { %1524 = vmatpush3.bf16.msra.mxu0 %v1523_v5  ;;  %v1550_v13 = vpack.c.bf16 %v981_v11, %v980_v10  ;;  %v178_v15 = vld [vmem:[%s1771_s15 + $0x28] sm:$0xff]  ;;  %v982_v16 = vld [vmem:[%s1771_s15 + $0xa0] sm:$0xff]  ;;  %v179_v20 = vld [vmem:[%s1771_s15 + $0x30] sm:$0xff] }
  0x14   : > { %1548 = vmatpush3.bf16.msra.mxu1 %v1547_v9  ;;  %1525 = vmatprep.subr.bf16.mxu0 %v1733_v0  ;;  %v983_v17 = vld [vmem:[%s1771_s15 + $0xa8] sm:$0xff]  ;;  %v1529_v18 = vpack.c.bf16 %v178_v15, %v177_v14  ;;  %v180_v21 = vld [vmem:[%s1771_s15 + $0x38] sm:$0xff]  ;;  %v984_v22 = vld [vmem:[%s1771_s15 + $0xb0] sm:$0xff] }
  0x15   : > { %1549 = vmatprep.subr.bf16.mxu1 %v1733_v0  ;;  %v1553_v19 = vpack.c.bf16 %v983_v17, %v982_v16  ;;  %v985_v23 = vld [vmem:[%s1771_s15 + $0xb8] sm:$0xff]  ;;  %v1532_v24 = vpack.c.bf16 %v180_v21, %v179_v20  ;;  %v181_v26 = vld [vmem:[%s1771_s15 + $0x40] sm:$0xff]  ;;  %v182_v27 = vld [vmem:[%s1771_s15 + $0x48] sm:$0xff] }
  0x16   : > { %v1556_v25 = vpack.c.bf16 %v985_v23, %v984_v22  ;;  %v986_v28 = vld [vmem:[%s1771_s15 + $0xc0] sm:$0xff]  ;;  %v987_v29 = vld [vmem:[%s1771_s15 + $0xc8] sm:$0xff]  ;;  %v1535_v30 = vpack.c.bf16 %v182_v27, %v181_v26  ;;  %v183_v32 = vld [vmem:[%s1771_s15 + $0x50] sm:$0xff] }
  0x17   : > { %1527 = vmatpush3.bf16.msra.mxu0 %v1526_v12  ;;  %v1559_v31 = vpack.c.bf16 %v987_v29, %v986_v28  ;;  %v184_v33 = vld [vmem:[%s1771_s15 + $0x58] sm:$0xff]  ;;  %v988_v34 = vld [vmem:[%s1771_s15 + $0xd0] sm:$0xff]  ;;  %v185_v38 = vld [vmem:[%s1771_s15 + $0x60] sm:$0xff] }
  0x18   : > { %1551 = vmatpush3.bf16.msra.mxu1 %v1550_v13  ;;  %1528 = vmatprep.subr.bf16.mxu0 %v1733_v0  ;;  %v989_v35 = vld [vmem:[%s1771_s15 + $0xd8] sm:$0xff]  ;;  %v1538_v36 = vpack.c.bf16 %v184_v33, %v183_v32  ;;  %v186_v39 = vld [vmem:[%s1771_s15 + $0x68] sm:$0xff]  ;;  %v990_v40 = vld [vmem:[%s1771_s15 + $0xe0] sm:$0xff] }
  0x19   : > { %1552 = vmatprep.subr.bf16.mxu1 %v1733_v0  ;;  %v1562_v37 = vpack.c.bf16 %v989_v35, %v988_v34  ;;  %v991_v41 = vld [vmem:[%s1771_s15 + $0xe8] sm:$0xff]  ;;  %v1541_v42 = vpack.c.bf16 %v186_v39, %v185_v38  ;;  %v187_v44 = vld [vmem:[%s1771_s15 + $0x70] sm:$0xff]  ;;  %v188_v45 = vld [vmem:[%s1771_s15 + $0x78] sm:$0xff] }
  0x1a   : > { %v1565_v43 = vpack.c.bf16 %v991_v41, %v990_v40  ;;  %v992_v46 = vld [vmem:[%s1771_s15 + $0xf0] sm:$0xff]  ;;  %v993_v47 = vld [vmem:[%s1771_s15 + $0xf8] sm:$0xff]  ;;  %v1544_v48 = vpack.c.bf16 %v188_v45, %v187_v44  ;;  %v996_v50 = vld [vmem:[%s1771_s15 + $0x100] sm:$0xff] }
  0x1b   : > { %1530 = vmatpush3.bf16.msra.mxu0 %v1529_v18  ;;  %v1568_v49 = vpack.c.bf16 %v993_v47, %v992_v46  ;;  %v997_v51 = vld [vmem:[%s1771_s15 + $0x108] sm:$0xff]  ;;  %v1014_v52 = vld [vmem:[%s1771_s15 + $0x180] sm:$0xff]  ;;  %v998_v58 = vld [vmem:[%s1771_s15 + $0x110] sm:$0xff] }
  0x1c   : > { %1554 = vmatpush3.bf16.msra.mxu1 %v1553_v19  ;;  %1531 = vmatprep.subr.bf16.mxu0 %v1733_v0  ;;  %v1015_v53 = vld [vmem:[%s1771_s15 + $0x188] sm:$0xff]  ;;  %v172_v54 = vld [vmem:[%s1824_s19] sm:$0x3]  ;;  %v1571_v55 = vpack.c.bf16 %v997_v51, %v996_v50  ;;  %v977_v56 = vld [vmem:[%s1824_s19 + $0x2] sm:$0x3] }
  0x1d   : > { %1555 = vmatprep.subr.bf16.mxu1 %v1733_v0  ;;  %v1595_v57 = vpack.c.bf16 %v1015_v53, %v1014_v52  ;;  %v999_v59 = vld [vmem:[%s1771_s15 + $0x118] sm:$0xff]  ;;  %v1016_v60 = vld [vmem:[%s1771_s15 + $0x190] sm:$0xff]  ;;  %v1000_v2 = vld [vmem:[%s1771_s15 + $0x120] sm:$0xff] }
  0x1e   : > { %v1017_v61 = vld [vmem:[%s1771_s15 + $0x198] sm:$0xff]  ;;  %v1574_v62 = vpack.c.bf16 %v999_v59, %v998_v58  ;;  %v1001_v3 = vld [vmem:[%s1771_s15 + $0x128] sm:$0xff]  ;;  %v1018_v4 = vld [vmem:[%s1771_s15 + $0x1a0] sm:$0xff] }
  0x1f   : > { %1533 = vmatpush3.bf16.msra.mxu0 %v1532_v24  ;;  %v1598_v63 = vpack.c.bf16 %v1017_v61, %v1016_v60  ;;  %v1019_v5 = vld [vmem:[%s1771_s15 + $0x1a8] sm:$0xff]  ;;  %v1577_v6 = vpack.c.bf16 %v1001_v3, %v1000_v2  ;;  %v1002_v8 = vld [vmem:[%s1771_s15 + $0x130] sm:$0xff]  ;;  %v1003_v9 = vld [vmem:[%s1771_s15 + $0x138] sm:$0xff] }
  0x20   : > { %1557 = vmatpush3.bf16.msra.mxu1 %v1556_v25  ;;  %1534 = vmatprep.subr.bf16.mxu0 %v1733_v0  ;;  %v1601_v7 = vpack.c.bf16 %v1019_v5, %v1018_v4  ;;  %v1020_v10 = vld [vmem:[%s1771_s15 + $0x1b0] sm:$0xff]  ;;  %v1021_v11 = vld [vmem:[%s1771_s15 + $0x1b8] sm:$0xff]  ;;  %v1580_v12 = vpack.c.bf16 %v1003_v9, %v1002_v8  ;;  %v1004_v14 = vld [vmem:[%s1771_s15 + $0x140] sm:$0xff] }
  0x21   : > { %1558 = vmatprep.subr.bf16.mxu1 %v1733_v0  ;;  %v1604_v13 = vpack.c.bf16 %v1021_v11, %v1020_v10  ;;  %v1005_v15 = vld [vmem:[%s1771_s15 + $0x148] sm:$0xff]  ;;  %v1022_v16 = vld [vmem:[%s1771_s15 + $0x1c0] sm:$0xff]  ;;  %v1006_v20 = vld [vmem:[%s1771_s15 + $0x150] sm:$0xff] }
  0x22   : > { %v1023_v17 = vld [vmem:[%s1771_s15 + $0x1c8] sm:$0xff]  ;;  %v1583_v18 = vpack.c.bf16 %v1005_v15, %v1004_v14  ;;  %v1007_v21 = vld [vmem:[%s1771_s15 + $0x158] sm:$0xff]  ;;  %v1024_v22 = vld [vmem:[%s1771_s15 + $0x1d0] sm:$0xff] }
  0x23   : > { %1536 = vmatpush3.bf16.msra.mxu0 %v1535_v30  ;;  %v1607_v19 = vpack.c.bf16 %v1023_v17, %v1022_v16  ;;  %v1025_v23 = vld [vmem:[%s1771_s15 + $0x1d8] sm:$0xff]  ;;  %v1586_v24 = vpack.c.bf16 %v1007_v21, %v1006_v20  ;;  %v1008_v26 = vld [vmem:[%s1771_s15 + $0x160] sm:$0xff]  ;;  %v1009_v27 = vld [vmem:[%s1771_s15 + $0x168] sm:$0xff] }
  0x24   : > { %1560 = vmatpush3.bf16.msra.mxu1 %v1559_v31  ;;  %1537 = vmatprep.subr.bf16.mxu0 %v1733_v0  ;;  %v1610_v25 = vpack.c.bf16 %v1025_v23, %v1024_v22  ;;  %v1026_v28 = vld [vmem:[%s1771_s15 + $0x1e0] sm:$0xff]  ;;  %v1027_v29 = vld [vmem:[%s1771_s15 + $0x1e8] sm:$0xff]  ;;  %v1589_v30 = vpack.c.bf16 %v1009_v27, %v1008_v26  ;;  %v1010_v32 = vld [vmem:[%s1771_s15 + $0x170] sm:$0xff] }
  0x25   : > { %1561 = vmatprep.subr.bf16.mxu1 %v1733_v0  ;;  %v1613_v31 = vpack.c.bf16 %v1027_v29, %v1026_v28  ;;  %v1011_v33 = vld [vmem:[%s1771_s15 + $0x178] sm:$0xff]  ;;  %v1028_v34 = vld [vmem:[%s1771_s15 + $0x1f0] sm:$0xff]  ;;  %v1032_v38 = vld [vmem:[%s1771_s15 + $0x200] sm:$0xff] }
  0x26   : > { %v1029_v35 = vld [vmem:[%s1771_s15 + $0x1f8] sm:$0xff]  ;;  %v1033_v39 = vld [vmem:[%s1771_s15 + $0x208] sm:$0xff]  ;;  %v1050_v40 = vld [vmem:[%s1771_s15 + $0x280] sm:$0xff] }
  0x27   : > { %1539 = vmatpush3.bf16.msra.mxu0 %v1538_v36  ;;  %v1592_v36 = vpack.c.bf16 %v1011_v33, %v1010_v32  ;;  %v1051_v41 = vld [vmem:[%s1771_s15 + $0x288] sm:$0xff]  ;;  %v1013_v44 = vld [vmem:[%s1824_s19 + $0x6] sm:$0x3]  ;;  %v1034_v46 = vld [vmem:[%s1771_s15 + $0x210] sm:$0xff] }
  0x28   : > { %1563 = vmatpush3.bf16.msra.mxu1 %v1562_v37  ;;  %1540 = vmatprep.subr.bf16.mxu0 %v1733_v0  ;;  %v1616_v37 = vpack.c.bf16 %v1029_v35, %v1028_v34  ;;  %v1643_v45 = vpack.c.bf16 %v1051_v41, %v1050_v40  ;;  %v1035_v47 = vld [vmem:[%s1771_s15 + $0x218] sm:$0xff]  ;;  %v1036_v52 = vld [vmem:[%s1771_s15 + $0x220] sm:$0xff]  ;;  %v1037_v53 = vld [vmem:[%s1771_s15 + $0x228] sm:$0xff] }
  0x29   : > { %1564 = vmatprep.subr.bf16.mxu1 %v1733_v0  ;;  %v1622_v50 = vpack.c.bf16 %v1035_v47, %v1034_v46  ;;  %v1038_v58 = vld [vmem:[%s1771_s15 + $0x230] sm:$0xff]  ;;  %v1039_v59 = vld [vmem:[%s1771_s15 + $0x238] sm:$0xff]  ;;  %v1040_v2 = vld [vmem:[%s1771_s15 + $0x240] sm:$0xff] }
  0x2a   : > { %v1056_v60 = vld [vmem:[%s1771_s15 + $0x2b0] sm:$0xff]  ;;  %v1057_v61 = vld [vmem:[%s1771_s15 + $0x2b8] sm:$0xff]  ;;  %v1041_v3 = vld [vmem:[%s1771_s15 + $0x248] sm:$0xff] }
  0x2b   : > { %1542 = vmatpush3.bf16.msra.mxu0 %v1541_v42  ;;  %v995_v42 = vld [vmem:[%s1824_s19 + $0x4] sm:$0x3]  ;;  %v1059_v5 = vld [vmem:[%s1771_s15 + $0x2c8] sm:$0xff]  ;;  %v1042_v8 = vld [vmem:[%s1771_s15 + $0x250] sm:$0xff] }
  0x2c   : > { %1566 = vmatpush3.bf16.msra.mxu1 %v1565_v43  ;;  %1543 = vmatprep.subr.bf16.mxu0 %v1733_v0  ;;  %v1619_v43 = vpack.c.bf16 %v1033_v39, %v1032_v38  ;;  %v1058_v4 = vld [vmem:[%s1771_s15 + $0x2c0] sm:$0xff]  ;;  %v1043_v9 = vld [vmem:[%s1771_s15 + $0x258] sm:$0xff]  ;;  %v1060_v10 = vld [vmem:[%s1771_s15 + $0x2d0] sm:$0xff] }
  0x2d   : > { %1567 = vmatprep.subr.bf16.mxu1 %v1733_v0  ;;  %v1061_v11 = vld [vmem:[%s1771_s15 + $0x2d8] sm:$0xff]  ;;  %v1044_v14 = vld [vmem:[%s1771_s15 + $0x260] sm:$0xff]  ;;  %v1045_v15 = vld [vmem:[%s1771_s15 + $0x268] sm:$0xff] }
  0x2e   : > { %v1062_v16 = vld [vmem:[%s1771_s15 + $0x2e0] sm:$0xff]  ;;  %v1063_v17 = vld [vmem:[%s1771_s15 + $0x2e8] sm:$0xff]  ;;  %v1046_v20 = vld [vmem:[%s1771_s15 + $0x270] sm:$0xff] }
  0x2f   : > { %1545 = vmatpush3.bf16.msra.mxu0 %v1544_v48  ;;  %v1052_v48 = vld [vmem:[%s1771_s15 + $0x290] sm:$0xff]  ;;  %v1047_v21 = vld [vmem:[%s1771_s15 + $0x278] sm:$0xff]  ;;  %v1068_v26 = vld [vmem:[%s1771_s15 + $0x300] sm:$0xff] }
  0x30   : > { %1569 = vmatpush3.bf16.msra.mxu1 %v1568_v49  ;;  %1570 = vmatprep.subr.bf16.mxu0 %v1733_v0  ;;  %v1053_v49 = vld [vmem:[%s1771_s15 + $0x298] sm:$0xff]  ;;  %v1064_v22 = vld [vmem:[%s1771_s15 + $0x2f0] sm:$0xff]  ;;  %v1069_v27 = vld [vmem:[%s1771_s15 + $0x308] sm:$0xff] }
  0x31   : > { %1594 = vmatprep.subr.bf16.mxu1 %v1733_v0  ;;  %v1646_v51 = vpack.c.bf16 %v1053_v49, %v1052_v48  ;;  %v1065_v23 = vld [vmem:[%s1771_s15 + $0x2f8] sm:$0xff]  ;;  %v1086_v28 = vld [vmem:[%s1771_s15 + $0x380] sm:$0xff]  ;;  %v1087_v29 = vld [vmem:[%s1771_s15 + $0x388] sm:$0xff] }
  0x32   : > { %1275 = vmatmul.mubr.f32.vlgmr.msra.gmra.mrb[0].mxu0 %v172_v54  ;;  %v1054_v54 = vld [vmem:[%s1771_s15 + $0x2a0] sm:$0xff]  ;;  %v1049_v32 = vld [vmem:[%s1824_s19 + $0xa] sm:$0x3]  ;;  %v1691_v33 = vpack.c.bf16 %v1087_v29, %v1086_v28  ;;  %v1070_v34 = vld [vmem:[%s1771_s15 + $0x310] sm:$0xff] }
  0x33   : > { %1310 = vmatmul.mubr.f32.vlgmr.msra.gmra.mrb[0].mxu1 %v977_v56  ;;  %1572 = vmatpush3.bf16.msra.mxu0 %v1571_v55  ;;  %v1055_v55 = vld [vmem:[%s1771_s15 + $0x2a8] sm:$0xff]  ;;  %v1625_v56 = vpack.c.bf16 %v1037_v53, %v1036_v52  ;;  %v1071_v35 = vld [vmem:[%s1771_s15 + $0x318] sm:$0xff]  ;;  %v1072_v40 = vld [vmem:[%s1771_s15 + $0x320] sm:$0xff] }
  0x34   : > { %1596 = vmatpush3.bf16.msra.mxu1 %v1595_v57  ;;  %1573 = vmatprep.subr.bf16.mxu0 %v1733_v0  ;;  %v1649_v57 = vpack.c.bf16 %v1055_v55, %v1054_v54  ;;  %v1670_v38 = vpack.c.bf16 %v1071_v35, %v1070_v34  ;;  %v1073_v41 = vld [vmem:[%s1771_s15 + $0x328] sm:$0xff]  ;;  %v1074_v46 = vld [vmem:[%s1771_s15 + $0x330] sm:$0xff]  ;;  %v1075_v47 = vld [vmem:[%s1771_s15 + $0x338] sm:$0xff] }
  0x35   : > { %1597 = vmatprep.subr.bf16.mxu1 %v1733_v0  ;;  %1344 = vmatprep.mubr.msk.f32.mxu0 %vm1734_vm0, %v1735_v1  ;;  %v1092_v48 = vld [vmem:[%s1771_s15 + $0x3b0] sm:$0xff]  ;;  %v1093_v49 = vld [vmem:[%s1771_s15 + $0x3b8] sm:$0xff]  ;;  %v1077_v52 = vld [vmem:[%s1771_s15 + $0x348] sm:$0xff] }
  0x36   : > { %1379 = vmatprep.mubr.msk.f32.mxu1 %vm1734_vm0, %v1735_v1  ;;  %v1094_v53 = vld [vmem:[%s1771_s15 + $0x3c0] sm:$0xff]  ;;  %v1095_v54 = vld [vmem:[%s1771_s15 + $0x3c8] sm:$0xff] }
  0x37   : > { %1575 = vmatpush3.bf16.msra.mxu0 %v1574_v62  ;;  %v1628_v62 = vpack.c.bf16 %v1039_v59, %v1038_v58  ;;  %v1079_v58 = vld [vmem:[%s1771_s15 + $0x358] sm:$0xff]  ;;  %v1096_v59 = vld [vmem:[%s1771_s15 + $0x3d0] sm:$0xff] }
  0x38   : > { %1599 = vmatpush3.bf16.msra.mxu1 %v1598_v63  ;;  %1576 = vmatprep.subr.bf16.mxu0 %v1733_v0  ;;  %v1652_v63 = vpack.c.bf16 %v1057_v61, %v1056_v60  ;;  %v1097_v60 = vld [vmem:[%s1771_s15 + $0x3d8] sm:$0xff] }
  0x39   : > { %1600 = vmatprep.subr.bf16.mxu1 %v1733_v0 }
  0x3b   : > { %1578 = vmatpush3.bf16.msra.mxu0 %v1577_v6  ;;  %v1631_v6 = vpack.c.bf16 %v1041_v3, %v1040_v2  ;;  %v1081_v2 = vld [vmem:[%s1771_s15 + $0x368] sm:$0xff]  ;;  %v1098_v3 = vld [vmem:[%s1771_s15 + $0x3e0] sm:$0xff] }
  0x3c   : > { %1602 = vmatpush3.bf16.msra.mxu1 %v1601_v7  ;;  %1579 = vmatprep.subr.bf16.mxu0 %v1733_v0  ;;  %v1655_v7 = vpack.c.bf16 %v1059_v5, %v1058_v4  ;;  %v1099_v4 = vld [vmem:[%s1771_s15 + $0x3e8] sm:$0xff] }
  0x3d   : > { %1603 = vmatprep.subr.bf16.mxu1 %v1733_v0 }
  0x3f   : > { %1581 = vmatpush3.bf16.msra.mxu0 %v1580_v12  ;;  %v1634_v12 = vpack.c.bf16 %v1043_v9, %v1042_v8  ;;  %v1083_v8 = vld [vmem:[%s1771_s15 + $0x378] sm:$0xff]  ;;  %v1100_v9 = vld [vmem:[%s1771_s15 + $0x3f0] sm:$0xff] }
  0x40   : > { %1605 = vmatpush3.bf16.msra.mxu1 %v1604_v13  ;;  %1582 = vmatprep.subr.bf16.mxu0 %v1733_v0  ;;  %v1658_v13 = vpack.c.bf16 %v1061_v11, %v1060_v10  ;;  %v1101_v10 = vld [vmem:[%s1771_s15 + $0x3f8] sm:$0xff] }
  0x41   : > { %1606 = vmatprep.subr.bf16.mxu1 %v1733_v0 }
  0x43   : > { %1584 = vmatpush3.bf16.msra.mxu0 %v1583_v18  ;;  %v1637_v18 = vpack.c.bf16 %v1045_v15, %v1044_v14  ;;  %v1085_v14 = vld [vmem:[%s1824_s19 + $0xe] sm:$0x3] }
  0x44   : > { %1608 = vmatpush3.bf16.msra.mxu1 %v1607_v19  ;;  %1585 = vmatprep.subr.bf16.mxu0 %v1733_v0  ;;  %v1661_v19 = vpack.c.bf16 %v1063_v17, %v1062_v16 }
  0x45   : > { %1609 = vmatprep.subr.bf16.mxu1 %v1733_v0 }
  0x47   : > { %1587 = vmatpush3.bf16.msra.mxu0 %v1586_v24  ;;  %v1640_v24 = vpack.c.bf16 %v1047_v21, %v1046_v20 }
  0x48   : > { %1611 = vmatpush3.bf16.msra.mxu1 %v1610_v25  ;;  %1588 = vmatprep.subr.bf16.mxu0 %v1733_v0  ;;  %v1664_v25 = vpack.c.bf16 %v1065_v23, %v1064_v22 }
  0x49   : > { %1612 = vmatprep.subr.bf16.mxu1 %v1733_v0 }
  0x4b   : > { %1590 = vmatpush3.bf16.msra.mxu0 %v1589_v30  ;;  %v1031_v30 = vld [vmem:[%s1824_s19 + $0x8] sm:$0x3] }
  0x4c   : > { %1614 = vmatpush3.bf16.msra.mxu1 %v1613_v31  ;;  %1591 = vmatprep.subr.bf16.mxu0 %v1733_v0  ;;  %v1667_v31 = vpack.c.bf16 %v1069_v27, %v1068_v26 }
  0x4d   : > { %1615 = vmatprep.subr.bf16.mxu1 %v1733_v0 }
  0x4f   : > { %1593 = vmatpush3.bf16.msra.mxu0 %v1592_v36  ;;  %v1088_v36 = vld [vmem:[%s1771_s15 + $0x390] sm:$0xff] }
  0x50   : > { %1617 = vmatpush3.bf16.msra.mxu1 %v1616_v37  ;;  %1618 = vmatprep.subr.bf16.mxu0 %v1733_v0  ;;  %v1089_v37 = vld [vmem:[%s1771_s15 + $0x398] sm:$0xff] }
  0x51   : > { %1642 = vmatprep.subr.bf16.mxu1 %v1733_v0  ;;  %v1694_v39 = vpack.c.bf16 %v1089_v37, %v1088_v36 }
  0x52   : > { %1345 = vmatmul.mubr.f32.vlgmr.msra.gmra.mrb[2].mxu0 %v995_v42  ;;  %v1090_v42 = vld [vmem:[%s1771_s15 + $0x3a0] sm:$0xff] }
  0x53   : > { %1380 = vmatmul.mubr.f32.vlgmr.msra.gmra.mrb[2].mxu1 %v1013_v44  ;;  %1620 = vmatpush3.bf16.msra.mxu0 %v1619_v43  ;;  %v1091_v43 = vld [vmem:[%s1771_s15 + $0x3a8] sm:$0xff]  ;;  %v1673_v44 = vpack.c.bf16 %v1073_v41, %v1072_v40 }
  0x54   : > { %1644 = vmatpush3.bf16.msra.mxu1 %v1643_v45  ;;  %1621 = vmatprep.subr.bf16.mxu0 %v1733_v0  ;;  %v1697_v45 = vpack.c.bf16 %v1091_v43, %v1090_v42 }
  0x55   : > { %1645 = vmatprep.subr.bf16.mxu1 %v1733_v0  ;;  %1414 = vmatprep.mubr.msk.f32.mxu0 %vm1734_vm0, %v1735_v1 }
  0x56   : > { %1449 = vmatprep.mubr.msk.f32.mxu1 %vm1734_vm0, %v1735_v1 }
  0x57   : > { %1623 = vmatpush3.bf16.msra.mxu0 %v1622_v50  ;;  %v1700_v50 = vpack.c.bf16 %v1093_v49, %v1092_v48 }
  0x58   : > { %1647 = vmatpush3.bf16.msra.mxu1 %v1646_v51  ;;  %1624 = vmatprep.subr.bf16.mxu0 %v1733_v0  ;;  %v1076_v51 = vld [vmem:[%s1771_s15 + $0x340] sm:$0xff] }
  0x59   : > { %1648 = vmatprep.subr.bf16.mxu1 %v1733_v0  ;;  %v1679_v55 = vpack.c.bf16 %v1077_v52, %v1076_v51 }
  0x5b   : > { %1626 = vmatpush3.bf16.msra.mxu0 %v1625_v56  ;;  %v1703_v56 = vpack.c.bf16 %v1095_v54, %v1094_v53 }
  0x5c   : > { %1650 = vmatpush3.bf16.msra.mxu1 %v1649_v57  ;;  %1627 = vmatprep.subr.bf16.mxu0 %v1733_v0  ;;  %v1078_v57 = vld [vmem:[%s1771_s15 + $0x350] sm:$0xff] }
  0x5d   : > { %1651 = vmatprep.subr.bf16.mxu1 %v1733_v0  ;;  %v1682_v61 = vpack.c.bf16 %v1079_v58, %v1078_v57 }
  0x5f   : > { %1629 = vmatpush3.bf16.msra.mxu0 %v1628_v62  ;;  %v1706_v62 = vpack.c.bf16 %v1097_v60, %v1096_v59 }
  0x60   : > { %1653 = vmatpush3.bf16.msra.mxu1 %v1652_v63  ;;  %1630 = vmatprep.subr.bf16.mxu0 %v1733_v0  ;;  %v1080_v63 = vld [vmem:[%s1771_s15 + $0x360] sm:$0xff] }
  0x61   : > { %1654 = vmatprep.subr.bf16.mxu1 %v1733_v0  ;;  %v1685_v5 = vpack.c.bf16 %v1081_v2, %v1080_v63 }
  0x63   : > { %1632 = vmatpush3.bf16.msra.mxu0 %v1631_v6  ;;  %v1709_v6 = vpack.c.bf16 %v1099_v4, %v1098_v3 }
  0x64   : > { %1656 = vmatpush3.bf16.msra.mxu1 %v1655_v7  ;;  %1633 = vmatprep.subr.bf16.mxu0 %v1733_v0  ;;  %v1082_v7 = vld [vmem:[%s1771_s15 + $0x370] sm:$0xff] }
  0x65   : > { %1657 = vmatprep.subr.bf16.mxu1 %v1733_v0  ;;  %v1688_v11 = vpack.c.bf16 %v1083_v8, %v1082_v7 }
  0x67   : > { %1635 = vmatpush3.bf16.msra.mxu0 %v1634_v12  ;;  %v1712_v12 = vpack.c.bf16 %v1101_v10, %v1100_v9 }
  0x68   : > { %1659 = vmatpush3.bf16.msra.mxu1 %v1658_v13  ;;  %1636 = vmatprep.subr.bf16.mxu0 %v1733_v0  ;;  %v1067_v13 = vld [vmem:[%s1824_s19 + $0xc] sm:$0x3] }
  0x69   : > { %1660 = vmatprep.subr.bf16.mxu1 %v1733_v0 }
  0x6b   : > { %1638 = vmatpush3.bf16.msra.mxu0 %v1637_v18 }
  0x6c   : > { %1662 = vmatpush3.bf16.msra.mxu1 %v1661_v19  ;;  %1639 = vmatprep.subr.bf16.mxu0 %v1733_v0 }
  0x6d   : > { %1663 = vmatprep.subr.bf16.mxu1 %v1733_v0 }
  0x6f   : > { %1641 = vmatpush3.bf16.msra.mxu0 %v1640_v24 }
  0x70   : > { %1665 = vmatpush3.bf16.msra.mxu1 %v1664_v25  ;;  %1666 = vmatprep.subr.bf16.mxu0 %v1733_v0 }
  0x71   : > { %1690 = vmatprep.subr.bf16.mxu1 %v1733_v0 }
  0x72   : > { %1415 = vmatmul.mubr.f32.vlgmr.msra.gmra.mrb[4].mxu0 %v1031_v30 }
  0x73   : > { %1450 = vmatmul.mubr.f32.vlgmr.msra.gmra.mrb[4].mxu1 %v1049_v32  ;;  %1668 = vmatpush3.bf16.msra.mxu0 %v1667_v31 }
  0x74   : > { %1692 = vmatpush3.bf16.msra.mxu1 %v1691_v33  ;;  %1669 = vmatprep.subr.bf16.mxu0 %v1733_v0 }
  0x75   : > { %1693 = vmatprep.subr.bf16.mxu1 %v1733_v0  ;;  %1484 = vmatprep.mubr.msk.f32.mxu0 %vm1734_vm0, %v1735_v1 }
  0x76   : > { %1519 = vmatprep.mubr.msk.f32.mxu1 %vm1734_vm0, %v1735_v1  ;;  %v1676_v1 = vpack.c.bf16 %v1075_v47, %v1074_v46 }
  0x77   : > { %1671 = vmatpush3.bf16.msra.mxu0 %v1670_v38 }
  0x78   : > { %1695 = vmatpush3.bf16.msra.mxu1 %v1694_v39  ;;  %1672 = vmatprep.subr.bf16.mxu0 %v1733_v0 }
  0x79   : > { %1696 = vmatprep.subr.bf16.mxu1 %v1733_v0 }
  0x7b   : > { %1674 = vmatpush3.bf16.msra.mxu0 %v1673_v44 }
  0x7c   : > { %1698 = vmatpush3.bf16.msra.mxu1 %v1697_v45  ;;  %1675 = vmatprep.subr.bf16.mxu0 %v1733_v0 }
  0x7d   : > { %1699 = vmatprep.subr.bf16.mxu1 %v1733_v0 }
  0x7f   : > { %1677 = vmatpush3.bf16.msra.mxu0 %v1676_v1 }
  0x80   : > { %1701 = vmatpush3.bf16.msra.mxu1 %v1700_v50  ;;  %1678 = vmatprep.subr.bf16.mxu0 %v1733_v0 }
  0x81   : > { %1702 = vmatprep.subr.bf16.mxu1 %v1733_v0 }
  0x83   : > { %1680 = vmatpush3.bf16.msra.mxu0 %v1679_v55 }
  0x84   : > { %1704 = vmatpush3.bf16.msra.mxu1 %v1703_v56  ;;  %1681 = vmatprep.subr.bf16.mxu0 %v1733_v0 }
  0x85   : > { %1705 = vmatprep.subr.bf16.mxu1 %v1733_v0 }
  0x87   : > { %1683 = vmatpush3.bf16.msra.mxu0 %v1682_v61 }
  0x88   : > { %1707 = vmatpush3.bf16.msra.mxu1 %v1706_v62  ;;  %1684 = vmatprep.subr.bf16.mxu0 %v1733_v0 }
  0x89   : > { %1708 = vmatprep.subr.bf16.mxu1 %v1733_v0 }
  0x8b   : > { %1686 = vmatpush3.bf16.msra.mxu0 %v1685_v5 }
  0x8c   : > { %1710 = vmatpush3.bf16.msra.mxu1 %v1709_v6  ;;  %1687 = vmatprep.subr.bf16.mxu0 %v1733_v0 }
  0x8d   : > { %1711 = vmatprep.subr.bf16.mxu1 %v1733_v0 }
  0x8f   : > { %1689 = vmatpush3.bf16.msra.mxu0 %v1688_v11 }
  0x90   : > { %1713 = vmatpush3.bf16.msra.mxu1 %v1712_v12 }
  0x92   : > { %1485 = vmatmul.mubr.f32.vlgmr.msra.gmra.mrb[6].mxu0 %v1067_v13 }
  0x93   : > { %1520 = vmatmul.mubr.f32.vlgmr.msra.gmra.mrb[6].mxu1 %v1085_v14 }
 0x105   : > { %v255_v15 = vpop.f32.mrb[0].mxu0 }
 0x106   : > { %259 = vst [vmem:[%s170_s22] sm:$0x3] %v255_v15  ;;  %v345_v16 = vpop.f32.mrb[0].mxu1  ;;  %v1276_v17 = vpop.f32.mrb[1].mxu0 }
 0x107   : > { %994 = vst [vmem:[%s170_s22 + $0x2] sm:$0x3] %v345_v16  ;;  %v1311_v18 = vpop.f32.mrb[1].mxu1 }
 0x125   : > { %v436_v19 = vpop.f32.mrb[2].mxu0 }
 0x126   : > { %1012 = vst [vmem:[%s170_s22 + $0x4] sm:$0x3] %v436_v19  ;;  %v527_v0 = vpop.f32.mrb[2].mxu1  ;;  %v1346_v20 = vpop.f32.mrb[3].mxu0 }
 0x127   : > { %1030 = vst [vmem:[%s170_s22 + $0x6] sm:$0x3] %v527_v0  ;;  %v1381_v21 = vpop.f32.mrb[3].mxu1 }
 0x145   : > { %v618_v22 = vpop.f32.mrb[4].mxu0 }
 0x146   : > { %1048 = vst [vmem:[%s170_s22 + $0x8] sm:$0x3] %v618_v22  ;;  %v709_v23 = vpop.f32.mrb[4].mxu1  ;;  %v1416_v24 = vpop.f32.mrb[5].mxu0 }
 0x147   : > { %1066 = vst [vmem:[%s170_s22 + $0xa] sm:$0x3] %v709_v23  ;;  %v1451_v25 = vpop.f32.mrb[5].mxu1 }
 0x165   : > { %v800_v26 = vpop.f32.mrb[6].mxu0 }
 0x166   : > { %1084 = vst [vmem:[%s170_s22 + $0xc] sm:$0x3] %v800_v26  ;;  %v891_v27 = vpop.f32.mrb[6].mxu1  ;;  %v1486_v28 = vpop.f32.mrb[7].mxu0 }
 0x167   : > { %1102 = vst [vmem:[%s170_s22 + $0xe] sm:$0x3] %v891_v27  ;;  %v1521_v29 = vpop.f32.mrb[7].mxu1 }
 0x168 PF: > { %s12_s9 = sadd.s32 1, %s1731_s9  }
 0x169   : > { %p9_p4 = scmp.ge.s32.totalorder %s12_s9, 4  }
 0x16b   :  { %11 = sbr.rel (!%p9_p4) target bundleno = 1 (0x1), region = 82 }

// kernel: _lambda_.19
= control target key start
LH: loop header
LB: loop body
LE: loop exit
PB: predicated region body
PF: predicated region fallthrough
CT: control target
= control target key end

     0   :  { %s583_s12 = smov 0   ;;  %s658_s0 = inlined_call_operand.vmem [shape: bf16[64,256], index: 0, kind: input, shape index: {}]   ;;  %s659_s1 = inlined_call_operand.vmem [shape: bf16[256,24], index: 1, kind: input, shape index: {}]   ;;  %s660_s2 = inlined_call_operand.vmem [shape: f32[1,24], index: 2, kind: input, shape index: {}]   ;;  %s661_s3 = inlined_call_operand.vmem [shape: f32[64,24], index: 3, kind: output, shape index: {}]  }
   0x1 LB: > { %s447_s13 = sadd.s32 4294967295, %s561_s12   ;;  %p451_p0 = scmp.ge.s32.totalorder %s561_s12, 1  ;;  %s561_s12 = sphi %s583_s12, %s13_s12  }
   0x2   : > { %p139_p1 = scmp.lt.s32.totalorder %s561_s12, 3 }
   0x4   : > { %p140_p2 = pnand %p451_p0, %p139_p1 }
   0x5   : > { %v533_v0 = vld [vmem:[%s659_s1 + $0x40] sm:$0xff] (!%p140_p2)   ;;  %s452_s16 = sshll.u32 (!%p140_p2), %s447_s13, 2  ;;  %v535_v2 = vld [vmem:[%s659_s1 + $0x48] sm:$0xff] (!%p140_p2)   ;;  %v537_v4 = vld [vmem:[%s659_s1 + $0x50] sm:$0xff] (!%p140_p2)   ;;  %vm386_vm0 = vcmask (!%p140_p2), 195584  }
   0x6   : > { %143 = sbr.rel (%p140_p2) target bundleno = 258 (0x102), region = 32  ;;  %v534_v1 = vld [vmem:[%s659_s1] sm:$0xff] (!%p140_p2)   ;;  %481 = vmatprep.subr.bf16.mxu0 (!%p140_p2), %v533_v0  ;;  %509 = vmatprep.subr.bf16.mxu1 (!%p140_p2), %v533_v0  ;;  %v536_v3 = vld [vmem:[%s659_s1 + $0x8] sm:$0xff] (!%p140_p2)   ;;  %p165_p3 = scmp.lt.s32.totalorder (!%p140_p2), %s452_s16, 7  ;;  %v538_v5 = vld [vmem:[%s659_s1 + $0x10] sm:$0xff] (!%p140_p2)  }
   0x7   : > { %482 = vmatpush3.bf16.msra.mxu0 (!%p140_p2), %v534_v1  ;;  %517 = vmatpush3.bf16.msra.mxu1 (!%p140_p2), %v534_v1  ;;  %v539_v6 = vld [vmem:[%s659_s1 + $0x58] sm:$0xff] (!%p140_p2)   ;;  %v541_v8 = vld [vmem:[%s659_s1 + $0x60] sm:$0xff] (!%p140_p2)   ;;  %v543_v10 = vld [vmem:[%s659_s1 + $0x68] sm:$0xff] (!%p140_p2)  }
   0x8   : > { %483 = vmatprep.subr.bf16.mxu0 (!%p140_p2), %v535_v2  ;;  %510 = vmatprep.subr.bf16.mxu1 (!%p140_p2), %v535_v2  ;;  %v540_v7 = vld [vmem:[%s659_s1 + $0x18] sm:$0xff] (!%p140_p2)   ;;  %v542_v9 = vld [vmem:[%s659_s1 + $0x20] sm:$0xff] (!%p140_p2)   ;;  %v544_v13 = vld [vmem:[%s659_s1 + $0x28] sm:$0xff] (!%p140_p2)  }
   0x9   : > { %v545_v14 = vld [vmem:[%s659_s1 + $0x70] sm:$0xff] (!%p140_p2)   ;;  %v547_v16 = vld [vmem:[%s659_s1 + $0x78] sm:$0xff] (!%p140_p2)   ;;  %v457_v22 = vld [vmem:[%s660_s2] ss:$0 sm:$0xff] (!%p140_p2) }
   0xa   : > { %v546_v15 = vld [vmem:[%s659_s1 + $0x30] sm:$0xff] (!%p140_p2)   ;;  %v548_v17 = vld [vmem:[%s659_s1 + $0x38] sm:$0xff] (!%p140_p2)  }
   0xb   : > { %484 = vmatpush3.bf16.msra.mxu0 (!%p140_p2), %v536_v3  ;;  %518 = vmatpush3.bf16.msra.mxu1 (!%p140_p2), %v536_v3 }
   0xc   : > { %485 = vmatprep.subr.bf16.mxu0 (!%p140_p2), %v537_v4  ;;  %511 = vmatprep.subr.bf16.mxu1 (!%p140_p2), %v537_v4 }
   0xd   : > { %s663_s16 = smov (!%p165_p3, %s452_s16), 7 }
   0xe   : > { %s480_s4 = sshll.u32 %s663_s16, 3 }
   0xf   : > { %486 = vmatpush3.bf16.msra.mxu0 %v538_v5  ;;  %519 = vmatpush3.bf16.msra.mxu1 %v538_v5  ;;  %s169_s9 = scalar_lea.vmem %s658_s0, %s480_s4  ;;  %s175_s30 = scalar_lea.vmem %s661_s3, %s480_s4 }
  0x10   : > { %487 = vmatprep.subr.bf16.mxu0 %v539_v6  ;;  %512 = vmatprep.subr.bf16.mxu1 %v539_v6  ;;  %v551_v11 = vld [vmem:[%s169_s9 + $0x4] ss:$8 sps:$4 sm:$0xff]   ;;  %v554_v12 = vld [vmem:[%s169_s9 + $0x14] ss:$8 sps:$4 sm:$0xff]   ;;  %v549_v18 = vld [vmem:[%s169_s9] ss:$8 sps:$4 sm:$0xff]  }
  0x11   : > { %369 = vmatprep.mubr.bf16.mxu0 %v551_v11  ;;  %377 = vmatprep.mubr.bf16.mxu1 %v554_v12  ;;  %v552_v19 = vld [vmem:[%s169_s9 + $0x10] ss:$8 sps:$4 sm:$0xff]  }
  0x13   : > { %488 = vmatpush3.bf16.msra.mxu0 %v540_v7  ;;  %520 = vmatpush3.bf16.msra.mxu1 %v540_v7 }
  0x14   : > { %489 = vmatprep.subr.bf16.mxu0 %v541_v8  ;;  %513 = vmatprep.subr.bf16.mxu1 %v541_v8 }
  0x17   : > { %490 = vmatpush3.bf16.msra.mxu0 %v542_v9  ;;  %521 = vmatpush3.bf16.msra.mxu1 %v542_v9 }
  0x18   : > { %491 = vmatprep.subr.bf16.mxu0 %v543_v10  ;;  %514 = vmatprep.subr.bf16.mxu1 %v543_v10 }
  0x1b   : > { %492 = vmatpush3.bf16.msra.mxu0 %v544_v13  ;;  %522 = vmatpush3.bf16.msra.mxu1 %v544_v13 }
  0x1c   : > { %493 = vmatprep.subr.bf16.mxu0 %v545_v14  ;;  %515 = vmatprep.subr.bf16.mxu1 %v545_v14 }
  0x1f   : > { %494 = vmatpush3.bf16.msra.mxu0 %v546_v15  ;;  %523 = vmatpush3.bf16.msra.mxu1 %v546_v15 }
  0x20   : > { %495 = vmatprep.subr.bf16.mxu0 %v547_v16  ;;  %516 = vmatprep.subr.bf16.mxu1 %v547_v16 }
  0x23   : > { %496 = vmatpush3.bf16.msra.mxu0 %v548_v17  ;;  %524 = vmatpush3.bf16.msra.mxu1 %v548_v17 }
  0x26   : > { %370 = vmatmul.mubr.bf16.vlgmr.msra.gmra.mrb[0].mxu0 %v549_v18  ;;  %378 = vmatmul.mubr.bf16.vlgmr.msra.gmra.mrb[0].mxu1 %v552_v19 }
  0xf9   : > { %v497_v20 = vpop.f32.mrb[0].mxu0  ;;  %v503_v21 = vpop.f32.mrb[0].mxu1 }
  0xfa   : > { %v498_v23 = vpop.f32.mrb[1].mxu0  ;;  %v504_v24 = vpop.f32.mrb[1].mxu1 }
  0xfb   : > { %v499_v25 = vadd.f32 %v498_v23, %v497_v20  ;;  %v505_v26 = vadd.f32 %v504_v24, %v503_v21  ;;  %v500_v27 = vpop.f32.mrb[2].mxu0  ;;  %v506_v28 = vpop.f32.mrb[2].mxu1 }
  0xfc   : > { %v501_v29 = vpop.f32.mrb[3].mxu0  ;;  %v507_v30 = vpop.f32.mrb[3].mxu1 }
  0xfd   : > { %v372_v31 = vadd.f32 %v499_v25, %v457_v22  ;;  %v502_v32 = vadd.f32 %v501_v29, %v500_v27  ;;  %v508_v33 = vadd.f32 %v507_v30, %v506_v28  ;;  %v380_v35 = vadd.f32 %v505_v26, %v457_v22 }
  0xff   : > { %387 = vst.msk [vmem:[%s175_s30] sm:$0xff] %vm386_vm0, %v372_v31  ;;  %v375_v34 = vadd.f32 %v502_v32, %v457_v22  ;;  %v383_v36 = vadd.f32 %v508_v33, %v457_v22  ;;  %389 = vst.msk [vmem:[%s175_s30 + $0x10] sm:$0xff] %vm386_vm0, %v380_v35 }
 0x101   : > { %388 = vst.msk [vmem:[%s175_s30 + $0x8] sm:$0xff] %vm386_vm0, %v375_v34  ;;  %390 = vst.msk [vmem:[%s175_s30 + $0x18] sm:$0xff] %vm386_vm0, %v383_v36 }
 0x102 PF: > { %s13_s12 = sadd.s32 1, %s561_s12  }
 0x103   : > { %p10_p4 = scmp.ge.s32.totalorder %s13_s12, 4  }
 0x105   :  { %12 = sbr.rel (!%p10_p4) target bundleno = 1 (0x1), region = 62 }

// kernel: _lambda_.13
= control target key start
LH: loop header
LB: loop body
LE: loop exit
PB: predicated region body
PF: predicated region fallthrough
CT: control target
= control target key end

     0   :  { %s1737_s21 = smov 0   ;;  %s2457_s0 = inlined_call_operand.vmem [shape: f32[2,8,128], index: 0, kind: input, shape index: {}]   ;;  %s2458_s1 = inlined_call_operand.vmem [shape: f32[2,8,128], index: 1, kind: input, shape index: {}]   ;;  %s2459_s2 = inlined_call_operand.vmem [shape: f32[128,512], index: 2, kind: input, shape index: {}]   ;;  %s2460_s3 = inlined_call_operand.vmem [shape: f32[128,512], index: 3, kind: input, shape index: {}]   ;;  %s2461_s4 = inlined_call_operand.vmem [shape: f32[16,8], index: 4, kind: input, shape index: {}]   ;;  %s2462_s5 = inlined_call_operand.vmem [shape: f32[16,8], index: 5, kind: input, shape index: {}]   ;;  %s2463_s6 = inlined_call_operand.vmem [shape: bf16[2,16,512], index: 6, kind: output, shape index: {}]  }
   0x1 LB: > { %s1396_s22 = sadd.s32 4294967295, %s1699_s21   ;;  %p1400_p0 = scmp.ge.s32.totalorder %s1699_s21, 1  ;;  %s1699_s21 = sphi %s1737_s21, %s16_s21  }
   0x2   : > { %p220_p1 = scmp.lt.s32.totalorder %s1699_s21, 3 }
   0x4   : > { %p221_p2 = pnand %p1400_p0, %p220_p1 }
   0x6   : > { %224 = sbr.rel (%p221_p2) target bundleno = 583 (0x247), region = 44 }
   0xd   : > { %v269_v0 = vld [vmem:[%s2459_s2 + $0x8] sm:$0xff]  ;;  %v271_v2 = vld [vmem:[%s2459_s2 + $0x18] sm:$0xff]  ;;  %v268_v5 = vld [vmem:[%s2459_s2] sm:$0xff]  ;;  %v2464_v7 = vmov 0.0   ;;  %p1961_p3 = scmp.lt.s32.totalorder %s1396_s22, 1  ;;  %vm970_vm0 = vcmask 64512  }
   0xe   : > { %v273_v1 = vld [vmem:[%s2459_s2 + $0x28] sm:$0xff]  ;;  %v275_v4 = vld [vmem:[%s2459_s2 + $0x38] sm:$0xff]  ;;  %v272_v6 = vld [vmem:[%s2459_s2 + $0x20] sm:$0xff]  ;;  %396 = vmatprep.mubr.f32.mxu0 %v2464_v7  ;;  %467 = vmatprep.mubr.f32.mxu1 %v2464_v7 }
   0xf   : > { %v1754_v3 = vpack.c.bf16 %v273_v1, %v269_v0  ;;  %v1767_v8 = vpack.c.bf16 %v275_v4, %v271_v2  ;;  %v1769_v9 = vpack.c.bf16 %v272_v6, %v268_v5  ;;  %v270_v10 = vld [vmem:[%s2459_s2 + $0x10] sm:$0xff]  ;;  %v277_v12 = vld [vmem:[%s2459_s2 + $0x48] sm:$0xff]  ;;  %v279_v15 = vld [vmem:[%s2459_s2 + $0x58] sm:$0xff]  ;;  %s2494_s22 = smov (!%p1961_p3, %s1396_s22), 1 }
  0x10   : > { %v274_v11 = vld [vmem:[%s2459_s2 + $0x30] sm:$0xff]  ;;  %v281_v14 = vld [vmem:[%s2459_s2 + $0x68] sm:$0xff]  ;;  %v283_v16 = vld [vmem:[%s2459_s2 + $0x78] sm:$0xff]  ;;  %s1401_s18 = sshll.u32 %s2494_s22, 3  ;;  %s1419_s12 = sshll.u32 %s2494_s22, 5 }
  0x11   : > { %1425 = vmatprep.subr.bf16.mxu0 %v1754_v3  ;;  %v1781_v13 = vpack.c.bf16 %v274_v11, %v270_v10  ;;  %1457 = vmatprep.subr.bf16.mxu1 %v1767_v8  ;;  %v1794_v17 = vpack.c.bf16 %v281_v14, %v277_v12  ;;  %v1796_v18 = vpack.c.bf16 %v283_v16, %v279_v15  ;;  %v276_v19 = vld [vmem:[%s2459_s2 + $0x40] sm:$0xff]  ;;  %v278_v21 = vld [vmem:[%s2459_s2 + $0x50] sm:$0xff]  ;;  %v285_v24 = vld [vmem:[%s2459_s2 + $0x88] sm:$0xff]  ;;  %s256_s7 = scalar_lea.vmem %s2457_s0, %s1401_s18  ;;  %s260_s28 = scalar_lea.vmem %s2458_s1, %s1401_s18 }
  0x12   : > { %1427 = vmatpush1.bf16.msra.mxu0 %v1769_v9  ;;  %v280_v20 = vld [vmem:[%s2459_s2 + $0x60] sm:$0xff]  ;;  %v282_v23 = vld [vmem:[%s2459_s2 + $0x70] sm:$0xff]  ;;  %v289_v25 = vld [vmem:[%s2459_s2 + $0xa8] sm:$0xff]  ;;  %s265_s15 = scalar_lea.vmem %s2463_s6, %s1419_s12 }
  0x13   : > { %1459 = vmatpush1.bf16.msra.mxu1 %v1781_v13  ;;  %v1808_v22 = vpack.c.bf16 %v280_v20, %v276_v19  ;;  %1429 = vmatprep.subr.bf16.mxu0 %v1794_v17  ;;  %v1821_v26 = vpack.c.bf16 %v282_v23, %v278_v21  ;;  %v1823_v27 = vpack.c.bf16 %v289_v25, %v285_v24  ;;  %v287_v28 = vld [vmem:[%s2459_s2 + $0x98] sm:$0xff]  ;;  %v284_v30 = vld [vmem:[%s2459_s2 + $0x80] sm:$0xff]  ;;  %v286_v33 = vld [vmem:[%s2459_s2 + $0x90] sm:$0xff] }
  0x14   : > { %1461 = vmatprep.subr.bf16.mxu1 %v1796_v18  ;;  %v291_v29 = vld [vmem:[%s2459_s2 + $0xb8] sm:$0xff]  ;;  %v288_v32 = vld [vmem:[%s2459_s2 + $0xa0] sm:$0xff]  ;;  %v290_v34 = vld [vmem:[%s2459_s2 + $0xb0] sm:$0xff] }
  0x15   : > { %v1834_v31 = vpack.c.bf16 %v291_v29, %v287_v28  ;;  %v1846_v35 = vpack.c.bf16 %v288_v32, %v284_v30  ;;  %v293_v36 = vld [vmem:[%s2459_s2 + $0xc8] sm:$0xff]  ;;  %v295_v38 = vld [vmem:[%s2459_s2 + $0xd8] sm:$0xff]  ;;  %v1859_v39 = vpack.c.bf16 %v290_v34, %v286_v33  ;;  %v292_v42 = vld [vmem:[%s2459_s2 + $0xc0] sm:$0xff] }
  0x16   : > { %1431 = vmatpush1.bf16.msra.mxu0 %v1808_v22  ;;  %v297_v37 = vld [vmem:[%s2459_s2 + $0xe8] sm:$0xff]  ;;  %v299_v41 = vld [vmem:[%s2459_s2 + $0xf8] sm:$0xff]  ;;  %v296_v43 = vld [vmem:[%s2459_s2 + $0xe0] sm:$0xff] }
  0x17   : > { %1463 = vmatpush1.bf16.msra.mxu1 %v1821_v26  ;;  %1433 = vmatprep.subr.bf16.mxu0 %v1823_v27  ;;  %v1861_v40 = vpack.c.bf16 %v297_v37, %v293_v36  ;;  %v1873_v44 = vpack.c.bf16 %v299_v41, %v295_v38  ;;  %v294_v45 = vld [vmem:[%s2459_s2 + $0xd0] sm:$0xff]  ;;  %v301_v47 = vld [vmem:[%s2459_s2 + $0x108] sm:$0xff]  ;;  %v303_v49 = vld [vmem:[%s2459_s2 + $0x118] sm:$0xff]  ;;  %v1894_v51 = vpack.c.bf16 %v296_v43, %v292_v42 }
  0x18   : > { %1465 = vmatprep.subr.bf16.mxu1 %v1834_v31  ;;  %v298_v46 = vld [vmem:[%s2459_s2 + $0xf0] sm:$0xff]  ;;  %v305_v48 = vld [vmem:[%s2459_s2 + $0x128] sm:$0xff]  ;;  %v307_v50 = vld [vmem:[%s2459_s2 + $0x138] sm:$0xff] }
  0x19   : > { %v1898_v52 = vpack.c.bf16 %v298_v46, %v294_v45  ;;  %v1900_v53 = vpack.c.bf16 %v305_v48, %v301_v47  ;;  %v300_v54 = vld [vmem:[%s2459_s2 + $0x100] sm:$0xff]  ;;  %v302_v56 = vld [vmem:[%s2459_s2 + $0x110] sm:$0xff]  ;;  %v1912_v57 = vpack.c.bf16 %v307_v50, %v303_v49  ;;  %v309_v59 = vld [vmem:[%s2459_s2 + $0x148] sm:$0xff] }
  0x1a   : > { %1435 = vmatpush1.bf16.msra.mxu0 %v1846_v35  ;;  %v304_v55 = vld [vmem:[%s2459_s2 + $0x120] sm:$0xff]  ;;  %v306_v58 = vld [vmem:[%s2459_s2 + $0x130] sm:$0xff]  ;;  %v313_v60 = vld [vmem:[%s2459_s2 + $0x168] sm:$0xff] }
  0x1b   : > { %1467 = vmatpush1.bf16.msra.mxu1 %v1859_v39  ;;  %1437 = vmatprep.subr.bf16.mxu0 %v1861_v40  ;;  %v311_v61 = vld [vmem:[%s2459_s2 + $0x158] sm:$0xff]  ;;  %v1930_v63 = vpack.c.bf16 %v304_v55, %v300_v54  ;;  %v1934_v0 = vpack.c.bf16 %v306_v58, %v302_v56  ;;  %v1936_v1 = vpack.c.bf16 %v313_v60, %v309_v59  ;;  %v308_v2 = vld [vmem:[%s2459_s2 + $0x140] sm:$0xff]  ;;  %v310_v5 = vld [vmem:[%s2459_s2 + $0x150] sm:$0xff] }
  0x1c   : > { %1469 = vmatprep.subr.bf16.mxu1 %v1873_v44  ;;  %v315_v62 = vld [vmem:[%s2459_s2 + $0x178] sm:$0xff]  ;;  %v312_v4 = vld [vmem:[%s2459_s2 + $0x160] sm:$0xff]  ;;  %v314_v10 = vld [vmem:[%s2459_s2 + $0x170] sm:$0xff] }
  0x1d   : > { %v1948_v6 = vpack.c.bf16 %v315_v62, %v311_v61  ;;  %v317_v11 = vld [vmem:[%s2459_s2 + $0x188] sm:$0xff]  ;;  %v319_v14 = vld [vmem:[%s2459_s2 + $0x198] sm:$0xff]  ;;  %v1972_v16 = vpack.c.bf16 %v312_v4, %v308_v2  ;;  %v1976_v19 = vpack.c.bf16 %v314_v10, %v310_v5  ;;  %v316_v21 = vld [vmem:[%s2459_s2 + $0x180] sm:$0xff] }
  0x1e   : > { %1439 = vmatpush1.bf16.msra.mxu0 %v1894_v51  ;;  %v321_v12 = vld [vmem:[%s2459_s2 + $0x1a8] sm:$0xff]  ;;  %v323_v15 = vld [vmem:[%s2459_s2 + $0x1b8] sm:$0xff]  ;;  %v320_v23 = vld [vmem:[%s2459_s2 + $0x1a0] sm:$0xff] }
  0x1f   : > { %1471 = vmatpush1.bf16.msra.mxu1 %v1898_v52  ;;  %1441 = vmatprep.subr.bf16.mxu0 %v1900_v53  ;;  %v1978_v20 = vpack.c.bf16 %v321_v12, %v317_v11  ;;  %v318_v24 = vld [vmem:[%s2459_s2 + $0x190] sm:$0xff]  ;;  %v1990_v25 = vpack.c.bf16 %v323_v15, %v319_v14  ;;  %v325_v29 = vld [vmem:[%s2459_s2 + $0x1c8] sm:$0xff]  ;;  %v327_v32 = vld [vmem:[%s2459_s2 + $0x1d8] sm:$0xff]  ;;  %v2014_v34 = vpack.c.bf16 %v320_v23, %v316_v21 }
  0x20   : > { %1473 = vmatprep.subr.bf16.mxu1 %v1912_v57  ;;  %v322_v28 = vld [vmem:[%s2459_s2 + $0x1b0] sm:$0xff]  ;;  %v329_v30 = vld [vmem:[%s2459_s2 + $0x1e8] sm:$0xff]  ;;  %v331_v33 = vld [vmem:[%s2459_s2 + $0x1f8] sm:$0xff] }
  0x21   : > { %v2018_v36 = vpack.c.bf16 %v322_v28, %v318_v24  ;;  %v2020_v37 = vpack.c.bf16 %v329_v30, %v325_v29  ;;  %v324_v38 = vld [vmem:[%s2459_s2 + $0x1c0] sm:$0xff]  ;;  %v326_v42 = vld [vmem:[%s2459_s2 + $0x1d0] sm:$0xff]  ;;  %v2032_v43 = vpack.c.bf16 %v331_v33, %v327_v32  ;;  %v475_v46 = vld [vmem:[%s2460_s3 + $0x8] sm:$0xff] }
  0x22   : > { %1443 = vmatpush1.bf16.msra.mxu0 %v1930_v63  ;;  %v328_v41 = vld [vmem:[%s2459_s2 + $0x1e0] sm:$0xff]  ;;  %v330_v45 = vld [vmem:[%s2459_s2 + $0x1f0] sm:$0xff]  ;;  %v479_v47 = vld [vmem:[%s2460_s3 + $0x28] sm:$0xff] }
  0x23   : > { %1475 = vmatpush1.bf16.msra.mxu1 %v1934_v0  ;;  %1445 = vmatprep.subr.bf16.mxu0 %v1936_v1  ;;  %v477_v48 = vld [vmem:[%s2460_s3 + $0x18] sm:$0xff]  ;;  %v2051_v50 = vpack.c.bf16 %v328_v41, %v324_v38  ;;  %v2055_v54 = vpack.c.bf16 %v330_v45, %v326_v42  ;;  %v2062_v55 = vpack.c.bf16 %v479_v47, %v475_v46  ;;  %v474_v56 = vld [vmem:[%s2460_s3] sm:$0xff]  ;;  %v476_v59 = vld [vmem:[%s2460_s3 + $0x10] sm:$0xff] }
  0x24   : > { %1477 = vmatprep.subr.bf16.mxu1 %v1948_v6  ;;  %v481_v49 = vld [vmem:[%s2460_s3 + $0x38] sm:$0xff]  ;;  %v478_v58 = vld [vmem:[%s2460_s3 + $0x20] sm:$0xff]  ;;  %v480_v61 = vld [vmem:[%s2460_s3 + $0x30] sm:$0xff] }
  0x25   : > { %v2074_v60 = vpack.c.bf16 %v481_v49, %v477_v48  ;;  %v483_v62 = vld [vmem:[%s2460_s3 + $0x48] sm:$0xff]  ;;  %v485_v4 = vld [vmem:[%s2460_s3 + $0x58] sm:$0xff]  ;;  %v2092_v10 = vld [vmem:[%s256_s7] sm:$0xff]  ;;  %v2094_v11 = vpack.c.bf16 %v478_v58, %v474_v56  ;;  %v2098_v12 = vpack.c.bf16 %v480_v61, %v476_v59 }
  0x26   : > { %1447 = vmatpush1.bf16.msra.mxu0 %v1972_v16  ;;  %v487_v2 = vld [vmem:[%s2460_s3 + $0x68] sm:$0xff]  ;;  %v489_v5 = vld [vmem:[%s2460_s3 + $0x78] sm:$0xff]  ;;  %2476 = vst [vmem:[#allocation2_spill] sm:$0xff] %v2092_v10  ;;  %v482_v15 = vld [vmem:[%s2460_s3 + $0x40] sm:$0xff] }
  0x27   : > { %1479 = vmatpush1.bf16.msra.mxu1 %v1976_v19  ;;  %1449 = vmatprep.subr.bf16.mxu0 %v1978_v20  ;;  %v2100_v14 = vpack.c.bf16 %v487_v2, %v483_v62  ;;  %v486_v21 = vld [vmem:[%s2460_s3 + $0x60] sm:$0xff]  ;;  %v484_v23 = vld [vmem:[%s2460_s3 + $0x50] sm:$0xff]  ;;  %v2112_v24 = vpack.c.bf16 %v489_v5, %v485_v4  ;;  %v491_v29 = vld [vmem:[%s2460_s3 + $0x88] sm:$0xff] }
  0x28   : > { %1481 = vmatprep.subr.bf16.mxu1 %v1990_v25  ;;  %v488_v28 = vld [vmem:[%s2460_s3 + $0x70] sm:$0xff]  ;;  %v495_v30 = vld [vmem:[%s2460_s3 + $0xa8] sm:$0xff]  ;;  %v493_v32 = vld [vmem:[%s2460_s3 + $0x98] sm:$0xff]  ;;  %v2132_v38 = vpack.c.bf16 %v486_v21, %v482_v15 }
  0x29   : > { %v497_v33 = vld [vmem:[%s2460_s3 + $0xb8] sm:$0xff]  ;;  %v2136_v41 = vpack.c.bf16 %v488_v28, %v484_v23  ;;  %v2138_v42 = vpack.c.bf16 %v495_v30, %v491_v29  ;;  %v490_v45 = vld [vmem:[%s2460_s3 + $0x80] sm:$0xff]  ;;  %v492_v47 = vld [vmem:[%s2460_s3 + $0x90] sm:$0xff] }
  0x2a   : > { %1451 = vmatpush1.bf16.msra.mxu0 %v2014_v34  ;;  %v494_v46 = vld [vmem:[%s2460_s3 + $0xa0] sm:$0xff]  ;;  %v2150_v48 = vpack.c.bf16 %v497_v33, %v493_v32  ;;  %v496_v49 = vld [vmem:[%s2460_s3 + $0xb0] sm:$0xff]  ;;  %v499_v56 = vld [vmem:[%s2460_s3 + $0xc8] sm:$0xff] }
  0x2b   : > { %1483 = vmatpush1.bf16.msra.mxu1 %v2018_v36  ;;  %1453 = vmatprep.subr.bf16.mxu0 %v2020_v37  ;;  %v503_v58 = vld [vmem:[%s2460_s3 + $0xe8] sm:$0xff]  ;;  %v501_v59 = vld [vmem:[%s2460_s3 + $0xd8] sm:$0xff]  ;;  %v2170_v62 = vpack.c.bf16 %v494_v46, %v490_v45  ;;  %v2174_v2 = vpack.c.bf16 %v496_v49, %v492_v47  ;;  %v498_v5 = vld [vmem:[%s2460_s3 + $0xc0] sm:$0xff] }
  0x2c   : > { %1485 = vmatprep.subr.bf16.mxu1 %v2032_v43  ;;  %v505_v61 = vld [vmem:[%s2460_s3 + $0xf8] sm:$0xff]  ;;  %v2176_v4 = vpack.c.bf16 %v503_v58, %v499_v56  ;;  %v502_v15 = vld [vmem:[%s2460_s3 + $0xe0] sm:$0xff]  ;;  %v500_v21 = vld [vmem:[%s2460_s3 + $0xd0] sm:$0xff] }
  0x2d   : > { %v2188_v23 = vpack.c.bf16 %v505_v61, %v501_v59  ;;  %v504_v28 = vld [vmem:[%s2460_s3 + $0xf0] sm:$0xff]  ;;  %v507_v29 = vld [vmem:[%s2460_s3 + $0x108] sm:$0xff]  ;;  %v509_v32 = vld [vmem:[%s2460_s3 + $0x118] sm:$0xff]  ;;  %v2206_v45 = vpack.c.bf16 %v502_v15, %v498_v5 }
  0x2e   : > { %1455 = vmatpush1.bf16.msra.mxu0 %v2051_v50  ;;  %v511_v30 = vld [vmem:[%s2460_s3 + $0x128] sm:$0xff]  ;;  %v513_v33 = vld [vmem:[%s2460_s3 + $0x138] sm:$0xff]  ;;  %v2210_v46 = vpack.c.bf16 %v504_v28, %v500_v21  ;;  %v506_v49 = vld [vmem:[%s2460_s3 + $0x100] sm:$0xff] }
  0x2f   : > { %1487 = vmatpush1.bf16.msra.mxu1 %v2055_v54  ;;  %1489 = vmatprep.subr.bf16.mxu0 %v2062_v55  ;;  %v2212_v47 = vpack.c.bf16 %v511_v30, %v507_v29  ;;  %v510_v56 = vld [vmem:[%s2460_s3 + $0x120] sm:$0xff]  ;;  %v508_v58 = vld [vmem:[%s2460_s3 + $0x110] sm:$0xff]  ;;  %v2224_v59 = vpack.c.bf16 %v513_v33, %v509_v32  ;;  %v515_v5 = vld [vmem:[%s2460_s3 + $0x148] sm:$0xff] }
  0x30   : > { %1521 = vmatprep.subr.bf16.mxu1 %v2074_v60  ;;  %2477 = vst [vmem:[#allocation3_spill] sm:$0xff] %v2210_v46  ;;  %v512_v61 = vld [vmem:[%s2460_s3 + $0x130] sm:$0xff]  ;;  %v519_v15 = vld [vmem:[%s2460_s3 + $0x168] sm:$0xff]  ;;  %v517_v21 = vld [vmem:[%s2460_s3 + $0x158] sm:$0xff]  ;;  %v2242_v29 = vpack.c.bf16 %v510_v56, %v506_v49 }
  0x31   : > { %397 = vmatmul.mubr.f32.vlgmr.msra.gmra.mrb[0].mxu0 %v2092_v10  ;;  %2478 = vst [vmem:[#allocation4_spill] sm:$0xff] %v2212_v47  ;;  %2479 = vst [vmem:[#allocation5_spill] sm:$0xff] %v2224_v59  ;;  %v521_v28 = vld [vmem:[%s2460_s3 + $0x178] sm:$0xff]  ;;  %v2246_v30 = vpack.c.bf16 %v512_v61, %v508_v58  ;;  %v2248_v32 = vpack.c.bf16 %v519_v15, %v515_v5  ;;  %v514_v33 = vld [vmem:[%s2460_s3 + $0x140] sm:$0xff] }
  0x32   : > { %468 = vmatmul.mubr.f32.vlgmr.msra.gmra.mrb[0].mxu1 %v2092_v10  ;;  %1491 = vmatpush1.bf16.msra.mxu0 %v2094_v11  ;;  %2480 = vst [vmem:[#allocation6_spill] sm:$0xff] %v2242_v29  ;;  %v516_v49 = vld [vmem:[%s2460_s3 + $0x150] sm:$0xff]  ;;  %v2260_v56 = vpack.c.bf16 %v521_v28, %v517_v21  ;;  %v523_v61 = vld [vmem:[%s2460_s3 + $0x188] sm:$0xff]  ;;  %v525_v15 = vld [vmem:[%s2460_s3 + $0x198] sm:$0xff] }
  0x33   : > { %1523 = vmatpush1.bf16.msra.mxu1 %v2098_v12  ;;  %1493 = vmatprep.subr.bf16.mxu0 %v2100_v14  ;;  %2481 = vst [vmem:[#allocation7_spill] sm:$0xff] %v2246_v30  ;;  %2482 = vst [vmem:[#allocation8_spill] sm:$0xff] %v2248_v32  ;;  %v520_v58 = vld [vmem:[%s2460_s3 + $0x170] sm:$0xff]  ;;  %v527_v5 = vld [vmem:[%s2460_s3 + $0x1a8] sm:$0xff] }
  0x34   : > { %1525 = vmatprep.subr.bf16.mxu1 %v2112_v24  ;;  %602 = vmatprep.mubr.f32.mxu0 %v2464_v7  ;;  %2483 = vst [vmem:[#allocation9_spill] sm:$0xff] %v2260_v56  ;;  %v529_v21 = vld [vmem:[%s2460_s3 + $0x1b8] sm:$0xff]  ;;  %v2282_v10 = vpack.c.bf16 %v520_v58, %v516_v49  ;;  %v528_v49 = vld [vmem:[%s2460_s3 + $0x1b0] sm:$0xff]  ;;  %v531_v58 = vld [vmem:[%s2460_s3 + $0x1c8] sm:$0xff] }
  0x35   : > { %673 = vmatprep.mubr.f32.mxu1 %v2464_v7  ;;  %v518_v7 = vld [vmem:[%s2460_s3 + $0x160] sm:$0xff] }
  0x36   : > { %1495 = vmatpush1.bf16.msra.mxu0 %v2132_v38  ;;  %v2278_v28 = vpack.c.bf16 %v518_v7, %v514_v33  ;;  %v524_v7 = vld [vmem:[%s2460_s3 + $0x190] sm:$0xff]  ;;  %v2296_v33 = vpack.c.bf16 %v529_v21, %v525_v15  ;;  %v537_v15 = vld [vmem:[%s2460_s3 + $0x1f8] sm:$0xff] }
  0x37   : > { %1527 = vmatpush1.bf16.msra.mxu1 %v2136_v41  ;;  %1497 = vmatprep.subr.bf16.mxu0 %v2138_v42 }
  0x38   : > { %1529 = vmatprep.subr.bf16.mxu1 %v2150_v48 }
  0x3a   : > { %1499 = vmatpush1.bf16.msra.mxu0 %v2170_v62 }
  0x3b   : > { %1531 = vmatpush1.bf16.msra.mxu1 %v2174_v2  ;;  %1501 = vmatprep.subr.bf16.mxu0 %v2176_v4 }
  0x3c   : > { %1533 = vmatprep.subr.bf16.mxu1 %v2188_v23 }
  0x3e   : > { %1503 = vmatpush1.bf16.msra.mxu0 %v2206_v45 }
  0x3f   : > { %1535 = vmatpush1.bf16.msra.mxu1 %v2210_v46  ;;  %1505 = vmatprep.subr.bf16.mxu0 %v2212_v47  ;;  %v522_v47 = vld [vmem:[%s2460_s3 + $0x180] sm:$0xff] }
  0x40   : > { %1537 = vmatprep.subr.bf16.mxu1 %v2224_v59  ;;  %v2284_v59 = vpack.c.bf16 %v527_v5, %v523_v61  ;;  %v526_v46 = vld [vmem:[%s2460_s3 + $0x1a0] sm:$0xff]  ;;  %v535_v61 = vld [vmem:[%s2460_s3 + $0x1e8] sm:$0xff]  ;;  %v533_v5 = vld [vmem:[%s2460_s3 + $0x1d8] sm:$0xff] }
  0x41   : > { %v2314_v21 = vpack.c.bf16 %v526_v46, %v522_v47  ;;  %v2329_v46 = vpack.c.bf16 %v537_v15, %v533_v5  ;;  %v532_v47 = vld [vmem:[%s2460_s3 + $0x1d0] sm:$0xff] }
  0x42   : > { %1507 = vmatpush1.bf16.msra.mxu0 %v2242_v29  ;;  %v534_v29 = vld [vmem:[%s2460_s3 + $0x1e0] sm:$0xff] }
  0x43   : > { %1539 = vmatpush1.bf16.msra.mxu1 %v2246_v30  ;;  %1509 = vmatprep.subr.bf16.mxu0 %v2248_v32  ;;  %v2320_v32 = vpack.c.bf16 %v535_v61, %v531_v58  ;;  %v530_v30 = vld [vmem:[%s2460_s3 + $0x1c0] sm:$0xff] }
  0x44   : > { %1541 = vmatprep.subr.bf16.mxu1 %v2260_v56  ;;  %v2318_v56 = vpack.c.bf16 %v528_v49, %v524_v7  ;;  %v536_v7 = vld [vmem:[%s2460_s3 + $0x1f0] sm:$0xff]  ;;  %v2338_v49 = vpack.c.bf16 %v534_v29, %v530_v30  ;;  %v267_v61 = vld [vmem:[%s260_s28] sm:$0xff]  ;;  %v2484_v29 = vmov 0.0  }
  0x45   : > { %v2342_v58 = vpack.c.bf16 %v536_v7, %v532_v47 }
  0x46   : > { %1511 = vmatpush1.bf16.msra.mxu0 %v2278_v28 }
  0x47   : > { %1543 = vmatpush1.bf16.msra.mxu1 %v2282_v10  ;;  %1513 = vmatprep.subr.bf16.mxu0 %v2284_v59 }
  0x48   : > { %1545 = vmatprep.subr.bf16.mxu1 %v2296_v33 }
  0x4a   : > { %1515 = vmatpush1.bf16.msra.mxu0 %v2314_v21 }
  0x4b   : > { %1547 = vmatpush1.bf16.msra.mxu1 %v2318_v56  ;;  %1517 = vmatprep.subr.bf16.mxu0 %v2320_v32 }
  0x4c   : > { %1549 = vmatprep.subr.bf16.mxu1 %v2329_v46 }
  0x4e   : > { %1519 = vmatpush1.bf16.msra.mxu0 %v2338_v49 }
  0x4f   : > { %1551 = vmatpush1.bf16.msra.mxu1 %v2342_v58  ;;  %1553 = vmatprep.subr.bf16.mxu0 %v1754_v3  ;;  %v2485_v3 = vld [vmem:[#allocation3_spill] sm:$0xff] }
  0x50   : > { %1585 = vmatprep.subr.bf16.mxu1 %v1767_v8  ;;  %v2486_v8 = vld [vmem:[#allocation4_spill] sm:$0xff] }
  0x51   : > { %603 = vmatmul.mubr.f32.vlgmr.msra.gmra.mrb[2].mxu0 %v267_v61 }
  0x52   : > { %674 = vmatmul.mubr.f32.vlgmr.msra.gmra.mrb[2].mxu1 %v267_v61  ;;  %1555 = vmatpush1.bf16.msra.mxu0 %v1769_v9  ;;  %v2487_v9 = vld [vmem:[#allocation5_spill] sm:$0xff] }
  0x53   : > { %1587 = vmatpush1.bf16.msra.mxu1 %v1781_v13  ;;  %1557 = vmatprep.subr.bf16.mxu0 %v1794_v17  ;;  %v2488_v13 = vld [vmem:[#allocation6_spill] sm:$0xff]  ;;  %v2489_v17 = vld [vmem:[#allocation7_spill] sm:$0xff] }
  0x54   : > { %1589 = vmatprep.subr.bf16.mxu1 %v1796_v18  ;;  %748 = vmatprep.mubr.f32.mxu0 %v2484_v29  ;;  %v2490_v18 = vld [vmem:[#allocation8_spill] sm:$0xff] }
  0x55   : > { %819 = vmatprep.mubr.f32.mxu1 %v2484_v29 }
  0x56   : > { %1559 = vmatpush1.bf16.msra.mxu0 %v1808_v22  ;;  %v2491_v22 = vld [vmem:[#allocation9_spill] sm:$0xff] }
  0x57   : > { %1591 = vmatpush1.bf16.msra.mxu1 %v1821_v26  ;;  %1561 = vmatprep.subr.bf16.mxu0 %v1823_v27  ;;  %v2492_v26 = vld [vmem:[#allocation2_spill] sm:$0xff] }
  0x58   : > { %1593 = vmatprep.subr.bf16.mxu1 %v1834_v31 }
  0x5a   : > { %1563 = vmatpush1.bf16.msra.mxu0 %v1846_v35 }
  0x5b   : > { %1595 = vmatpush1.bf16.msra.mxu1 %v1859_v39  ;;  %1565 = vmatprep.subr.bf16.mxu0 %v1861_v40 }
  0x5c   : > { %1597 = vmatprep.subr.bf16.mxu1 %v1873_v44 }
  0x5e   : > { %1567 = vmatpush1.bf16.msra.mxu0 %v1894_v51 }
  0x5f   : > { %1599 = vmatpush1.bf16.msra.mxu1 %v1898_v52  ;;  %1569 = vmatprep.subr.bf16.mxu0 %v1900_v53 }
  0x60   : > { %1601 = vmatprep.subr.bf16.mxu1 %v1912_v57 }
  0x62   : > { %1571 = vmatpush1.bf16.msra.mxu0 %v1930_v63 }
  0x63   : > { %1603 = vmatpush1.bf16.msra.mxu1 %v1934_v0  ;;  %1573 = vmatprep.subr.bf16.mxu0 %v1936_v1  ;;  %v968_v1 = vld [vmem:[%s2461_s4] sm:$0xff] }
  0x64   : > { %1605 = vmatprep.subr.bf16.mxu1 %v1948_v6  ;;  %v969_v6 = vld [vmem:[%s2461_s4 + $0x8] sm:$0xff] }
  0x66   : > { %1575 = vmatpush1.bf16.msra.mxu0 %v1972_v16 }
  0x67   : > { %1607 = vmatpush1.bf16.msra.mxu1 %v1976_v19  ;;  %1577 = vmatprep.subr.bf16.mxu0 %v1978_v20 }
  0x68   : > { %1609 = vmatprep.subr.bf16.mxu1 %v1990_v25  ;;  %v1131_v25 = vld [vmem:[%s2462_s5] sm:$0xff] }
  0x6a   : > { %1579 = vmatpush1.bf16.msra.mxu0 %v2014_v34 }
  0x6b   : > { %1611 = vmatpush1.bf16.msra.mxu1 %v2018_v36  ;;  %1581 = vmatprep.subr.bf16.mxu0 %v2020_v37  ;;  %v1132_v36 = vld [vmem:[%s2462_s5 + $0x8] sm:$0xff] }
  0x6c   : > { %1613 = vmatprep.subr.bf16.mxu1 %v2032_v43 }
  0x6e   : > { %1583 = vmatpush1.bf16.msra.mxu0 %v2051_v50 }
  0x6f   : > { %1615 = vmatpush1.bf16.msra.mxu1 %v2055_v54  ;;  %1617 = vmatprep.subr.bf16.mxu0 %v2062_v55 }
  0x70   : > { %1649 = vmatprep.subr.bf16.mxu1 %v2074_v60 }
  0x71   : > { %749 = vmatmul.mubr.f32.vlgmr.msra.gmra.mrb[4].mxu0 %v267_v61 }
  0x72   : > { %820 = vmatmul.mubr.f32.vlgmr.msra.gmra.mrb[4].mxu1 %v267_v61  ;;  %1619 = vmatpush1.bf16.msra.mxu0 %v2094_v11 }
  0x73   : > { %1651 = vmatpush1.bf16.msra.mxu1 %v2098_v12  ;;  %1621 = vmatprep.subr.bf16.mxu0 %v2100_v14 }
  0x74   : > { %1653 = vmatprep.subr.bf16.mxu1 %v2112_v24  ;;  %890 = vmatprep.mubr.f32.mxu0 %v2484_v29 }
  0x75   : > { %961 = vmatprep.mubr.f32.mxu1 %v2484_v29 }
  0x76   : > { %1623 = vmatpush1.bf16.msra.mxu0 %v2132_v38 }
  0x77   : > { %1655 = vmatpush1.bf16.msra.mxu1 %v2136_v41  ;;  %1625 = vmatprep.subr.bf16.mxu0 %v2138_v42 }
  0x78   : > { %1657 = vmatprep.subr.bf16.mxu1 %v2150_v48 }
  0x7a   : > { %1627 = vmatpush1.bf16.msra.mxu0 %v2170_v62 }
  0x7b   : > { %1659 = vmatpush1.bf16.msra.mxu1 %v2174_v2  ;;  %1629 = vmatprep.subr.bf16.mxu0 %v2176_v4 }
  0x7c   : > { %1661 = vmatprep.subr.bf16.mxu1 %v2188_v23 }
  0x7e   : > { %1631 = vmatpush1.bf16.msra.mxu0 %v2206_v45 }
  0x7f   : > { %1663 = vmatpush1.bf16.msra.mxu1 %v2485_v3  ;;  %1633 = vmatprep.subr.bf16.mxu0 %v2486_v8 }
  0x80   : > { %1665 = vmatprep.subr.bf16.mxu1 %v2487_v9 }
  0x82   : > { %1635 = vmatpush1.bf16.msra.mxu0 %v2488_v13 }
  0x83   : > { %1667 = vmatpush1.bf16.msra.mxu1 %v2489_v17  ;;  %1637 = vmatprep.subr.bf16.mxu0 %v2490_v18 }
  0x84   : > { %1669 = vmatprep.subr.bf16.mxu1 %v2491_v22 }
  0x86   : > { %1639 = vmatpush1.bf16.msra.mxu0 %v2278_v28 }
  0x87   : > { %1671 = vmatpush1.bf16.msra.mxu1 %v2282_v10  ;;  %1641 = vmatprep.subr.bf16.mxu0 %v2284_v59 }
  0x88   : > { %1673 = vmatprep.subr.bf16.mxu1 %v2296_v33 }
  0x8a   : > { %1643 = vmatpush1.bf16.msra.mxu0 %v2314_v21 }
  0x8b   : > { %1675 = vmatpush1.bf16.msra.mxu1 %v2318_v56  ;;  %1645 = vmatprep.subr.bf16.mxu0 %v2320_v32 }
  0x8c   : > { %1677 = vmatprep.subr.bf16.mxu1 %v2329_v46 }
  0x8e   : > { %1647 = vmatpush1.bf16.msra.mxu0 %v2338_v49 }
  0x8f   : > { %1679 = vmatpush1.bf16.msra.mxu1 %v2342_v58 }
  0x91   : > { %891 = vmatmul.mubr.f32.vlgmr.msra.gmra.mrb[4].mxu0 %v2492_v26 }
  0x92   : > { %962 = vmatmul.mubr.f32.vlgmr.msra.gmra.mrb[4].mxu1 %v2492_v26  ;;  %1041 = vmatprep.mubr.f32.mxu0 %v2484_v29 }
  0x93   : > { %1118 = vmatprep.mubr.f32.mxu1 %v2484_v29 }
 0x104   : > { %v398_v27 = vpop.f32.mrb[0].mxu0 }
 0x105   : > { %v469_v31 = vpop.f32.mrb[0].mxu1  ;;  %v400_v35 = vpop.f32.mrb[1].mxu0 }
 0x106   : > { %v471_v39 = vpop.f32.mrb[1].mxu1 }
 0x124   : > { %v604_v40 = vpop.f32.mrb[2].mxu0 }
 0x125   : > { %v680_v44 = vsub.f32 %v398_v27, %v604_v40  ;;  %v675_v51 = vpop.f32.mrb[2].mxu1  ;;  %v606_v52 = vpop.f32.mrb[3].mxu0 }
 0x126   : > { %v682_v53 = vsub.f32 %v469_v31, %v675_v51  ;;  %v681_v57 = vsub.f32 %v400_v35, %v606_v52  ;;  %v677_v63 = vpop.f32.mrb[3].mxu1 }
 0x127   : > { %v683_v0 = vsub.f32 %v471_v39, %v677_v63 }
 0x128   : > { %977 = vmatprep.subr.mxu0 %v681_v57 }
 0x129   : > { %1054 = vmatprep.subr.mxu1 %v683_v0  ;;  %978 = vmatpush1.msra.mxu0 %v680_v44 }
 0x12a   : > { %1055 = vmatpush1.msra.mxu1 %v682_v53  ;;  %1405 = vmatmul.mubr.msk.f32.vlgmr.msra.gmra.mrb[6].mxu0 %vm970_vm0, %v968_v1 }
 0x12b   : > { %1407 = vmatmul.mubr.msk.f32.vlgmr.msra.gmra.mrb[6].mxu1 %vm970_vm0, %v968_v1  ;;  %1047 = vmatprep.mubr.f32.mxu0 %v2484_v29 }
 0x12c   : > { %1124 = vmatprep.mubr.f32.mxu1 %v2484_v29 }
 0x12e   : > { %1406 = vmatmul.mubr.msk.f32.gmra.mrb[8].mxu0 %vm970_vm0, %v969_v6 }
 0x12f   : > { %1408 = vmatmul.mubr.msk.f32.gmra.mrb[8].mxu1 %vm970_vm0, %v969_v6  ;;  %1203 = vmatprep.mubr.f32.mxu0 %v2484_v29 }
 0x130   : > { %1280 = vmatprep.mubr.f32.mxu1 %v2484_v29 }
 0x164   : > { %v892_v16 = vpop.f32.mrb[4].mxu0 }
 0x165   : > { %v963_v19 = vpop.f32.mrb[4].mxu1  ;;  %v894_v20 = vpop.f32.mrb[5].mxu0 }
 0x166   : > { %v965_v34 = vpop.f32.mrb[5].mxu1  ;;  %1139 = vmatprep.subr.mxu0 %v894_v20 }
 0x167   : > { %1216 = vmatprep.subr.mxu1 %v965_v34  ;;  %1140 = vmatpush1.msra.mxu0 %v892_v16 }
 0x168   : > { %1217 = vmatpush1.msra.mxu1 %v963_v19  ;;  %1409 = vmatmul.mubr.msk.f32.vlgmr.msra.gmra.mrb[10].mxu0 %vm970_vm0, %v1131_v25 }
 0x169   : > { %1411 = vmatmul.mubr.msk.f32.vlgmr.msra.gmra.mrb[10].mxu1 %vm970_vm0, %v1131_v25  ;;  %1209 = vmatprep.mubr.f32.mxu0 %v2484_v29 }
 0x16a   : > { %1286 = vmatprep.mubr.f32.mxu1 %v2484_v29 }
 0x16c   : > { %1410 = vmatmul.mubr.msk.f32.gmra.mrb[12].mxu0 %vm970_vm0, %v1132_v36 }
 0x16d   : > { %1412 = vmatmul.mubr.msk.f32.gmra.mrb[12].mxu1 %vm970_vm0, %v1132_v36 }
 0x1fd   : > { %v1043_v37 = vpop.f32.mrb[6].mxu0 }
 0x1fe   : > { %v1120_v43 = vpop.f32.mrb[6].mxu1  ;;  %v1045_v50 = vpop.f32.mrb[7].mxu0 }
 0x1ff   : > { %v1122_v54 = vpop.f32.mrb[7].mxu1 }
 0x201   : > { %v1049_v55 = vpop.f32.mrb[8].mxu0 }
 0x202   : > { %v1126_v60 = vpop.f32.mrb[8].mxu1  ;;  %v1051_v10 = vpop.f32.mrb[9].mxu0 }
 0x203   : > { %v1128_v11 = vpop.f32.mrb[9].mxu1 }
 0x23b   : > { %v1205_v12 = vpop.f32.mrb[10].mxu0 }
 0x23c   : > { %v1293_v14 = vsub.f32 %v1043_v37, %v1205_v12  ;;  %v1282_v24 = vpop.f32.mrb[10].mxu1  ;;  %v1207_v38 = vpop.f32.mrb[11].mxu0 }
 0x23d   : > { %v1295_v41 = vsub.f32 %v1120_v43, %v1282_v24  ;;  %v1294_v42 = vsub.f32 %v1045_v50, %v1207_v38  ;;  %v1284_v48 = vpop.f32.mrb[11].mxu1 }
 0x23e   : > { %v1296_v62 = vsub.f32 %v1122_v54, %v1284_v48 }
 0x23f   : > { %v1420_v2 = vpack.c.bf16 %v1294_v42, %v1293_v14  ;;  %v1211_v4 = vpop.f32.mrb[12].mxu0 }
 0x240   : > { %v1421_v23 = vpack.c.bf16 %v1296_v62, %v1295_v41  ;;  %v1297_v45 = vsub.f32 %v1049_v55, %v1211_v4  ;;  %v1288_v59 = vpop.f32.mrb[12].mxu1  ;;  %v1213_v30 = vpop.f32.mrb[13].mxu0 }
 0x241   : > { %1325 = vst [vmem:[%s265_s15] sm:$0xff] %v1420_v2  ;;  %v1299_v32 = vsub.f32 %v1126_v60, %v1288_v59  ;;  %v1298_v56 = vsub.f32 %v1051_v10, %v1213_v30  ;;  %v1290_v28 = vpop.f32.mrb[13].mxu1 }
 0x242   : > { %1326 = vst [vmem:[%s265_s15 + $0x8] sm:$0xff] %v1421_v23  ;;  %v1300_v33 = vsub.f32 %v1128_v11, %v1290_v28 }
 0x243   : > { %v1422_v5 = vpack.c.bf16 %v1298_v56, %v1297_v45 }
 0x244   : > { %v1423_v15 = vpack.c.bf16 %v1300_v33, %v1299_v32 }
 0x245   : > { %1327 = vst [vmem:[%s265_s15 + $0x10] sm:$0xff] %v1422_v5 }
 0x246   : > { %1328 = vst [vmem:[%s265_s15 + $0x18] sm:$0xff] %v1423_v15 }
 0x247 PF: > { %s16_s21 = sadd.s32 1, %s1699_s21  }
 0x248   : > { %p13_p4 = scmp.ge.s32.totalorder %s16_s21, 4  }
 0x24a   :  { %15 = sbr.rel (!%p13_p4) target bundleno = 1 (0x1), region = 77 }

// kernel: _lambda_.14
= control target key start
LH: loop header
LB: loop body
LE: loop exit
PB: predicated region body
PF: predicated region fallthrough
CT: control target
= control target key end

     0   :  { %s884_s15 = smov 0   ;;  %s1014_s0 = inlined_call_operand.vmem [shape: bf16[64,256], index: 0, kind: input, shape index: {}]   ;;  %s1015_s1 = inlined_call_operand.vmem [shape: bf16[64,256], index: 1, kind: input, shape index: {}]   ;;  %s1016_s2 = inlined_call_operand.vmem [shape: bf16[256,256], index: 2, kind: input, shape index: {}]   ;;  %s1017_s3 = inlined_call_operand.vmem [shape: f32[1,256], index: 3, kind: input, shape index: {}]   ;;  %s1018_s4 = inlined_call_operand.vmem [shape: bf16[64,256], index: 4, kind: output, shape index: {}]  }
   0x1 LB: > { %s678_s16 = sadd.s32 4294967295, %s857_s15   ;;  %p682_p0 = scmp.ge.s32.totalorder %s857_s15, 1  ;;  %s857_s15 = sphi %s884_s15, %s14_s15  }
   0x2   : > { %p176_p1 = scmp.lt.s32.totalorder %s857_s15, 3 }
   0x4   : > { %p177_p2 = pnand %p682_p0, %p176_p1 }
   0x5   : > { %v781_v0 = vld [vmem:[%s1016_s2 + $0x4] ss:$8 sps:$4 sm:$0xff] (!%p177_p2)   ;;  %v783_v1 = vld [vmem:[%s1016_s2] ss:$8 sps:$4 sm:$0xff] (!%p177_p2)   ;;  %v784_v2 = vld [vmem:[%s1016_s2 + $0x14] ss:$8 sps:$4 sm:$0xff] (!%p177_p2)   ;;  %v522_v36 = vlaneseq (!%p177_p2) }
   0x6   : > { %180 = sbr.rel (%p177_p2) target bundleno = 313 (0x139), region = 36  ;;  %459 = vmatprep.subr.bf16.mxu0 (!%p177_p2), %v781_v0  ;;  %741 = vmatprep.subr.bf16.mxu1 (!%p177_p2), %v781_v0  ;;  %v786_v3 = vld [vmem:[%s1016_s2 + $0x10] ss:$8 sps:$4 sm:$0xff] (!%p177_p2)   ;;  %v787_v4 = vld [vmem:[%s1016_s2 + $0x24] ss:$8 sps:$4 sm:$0xff] (!%p177_p2)   ;;  %s683_s27 = sshll.u32 (!%p177_p2), %s678_s16, 2 }
   0x7   : > { %460 = vmatpush1.bf16.msra.mxu0 (!%p177_p2), %v783_v1  ;;  %757 = vmatpush1.bf16.msra.mxu1 (!%p177_p2), %v783_v1  ;;  %v789_v5 = vld [vmem:[%s1016_s2 + $0x20] ss:$8 sps:$4 sm:$0xff] (!%p177_p2)   ;;  %v790_v6 = vld [vmem:[%s1016_s2 + $0x34] ss:$8 sps:$4 sm:$0xff] (!%p177_p2)   ;;  %p211_p3 = scmp.lt.s32.totalorder (!%p177_p2), %s683_s27, 7  ;;  %v523_v37 = vshrl.u32 (!%p177_p2), %v522_v36, 7 }
   0x8   : > { %461 = vmatprep.subr.bf16.mxu0 (!%p177_p2), %v784_v2  ;;  %742 = vmatprep.subr.bf16.mxu1 (!%p177_p2), %v784_v2  ;;  %v792_v7 = vld [vmem:[%s1016_s2 + $0x30] ss:$8 sps:$4 sm:$0xff] (!%p177_p2)   ;;  %v793_v8 = vld [vmem:[%s1016_s2 + $0x44] ss:$8 sps:$4 sm:$0xff] (!%p177_p2)   ;;  %v795_v9 = vld [vmem:[%s1016_s2 + $0x40] ss:$8 sps:$4 sm:$0xff] (!%p177_p2)  }
   0x9   : > { %v796_v10 = vld [vmem:[%s1016_s2 + $0x54] ss:$8 sps:$4 sm:$0xff] (!%p177_p2)   ;;  %v798_v11 = vld [vmem:[%s1016_s2 + $0x50] ss:$8 sps:$4 sm:$0xff] (!%p177_p2)   ;;  %v799_v12 = vld [vmem:[%s1016_s2 + $0x64] ss:$8 sps:$4 sm:$0xff] (!%p177_p2)  }
   0xa   : > { %v801_v14 = vld [vmem:[%s1016_s2 + $0x60] ss:$8 sps:$4 sm:$0xff] (!%p177_p2)   ;;  %v802_v16 = vld [vmem:[%s1016_s2 + $0x74] ss:$8 sps:$4 sm:$0xff] (!%p177_p2)   ;;  %v804_v17 = vld [vmem:[%s1016_s2 + $0x70] ss:$8 sps:$4 sm:$0xff] (!%p177_p2)  }
   0xb   : > { %462 = vmatpush1.bf16.msra.mxu0 (!%p177_p2), %v786_v3  ;;  %758 = vmatpush1.bf16.msra.mxu1 (!%p177_p2), %v786_v3  ;;  %v805_v18 = vld [vmem:[%s1016_s2 + $0x84] ss:$8 sps:$4 sm:$0xff] (!%p177_p2)   ;;  %v807_v19 = vld [vmem:[%s1016_s2 + $0x80] ss:$8 sps:$4 sm:$0xff] (!%p177_p2)   ;;  %v808_v20 = vld [vmem:[%s1016_s2 + $0x94] ss:$8 sps:$4 sm:$0xff] (!%p177_p2)  }
   0xc   : > { %463 = vmatprep.subr.bf16.mxu0 (!%p177_p2), %v787_v4  ;;  %743 = vmatprep.subr.bf16.mxu1 (!%p177_p2), %v787_v4  ;;  %v810_v21 = vld [vmem:[%s1016_s2 + $0x90] ss:$8 sps:$4 sm:$0xff] (!%p177_p2)   ;;  %v811_v22 = vld [vmem:[%s1016_s2 + $0xa4] ss:$8 sps:$4 sm:$0xff] (!%p177_p2)   ;;  %v813_v23 = vld [vmem:[%s1016_s2 + $0xa0] ss:$8 sps:$4 sm:$0xff] (!%p177_p2)  }
   0xd   : > { %s1020_s27 = smov (!%p211_p3, %s683_s27), 7  ;;  %v814_v24 = vld [vmem:[%s1016_s2 + $0xb4] ss:$8 sps:$4 sm:$0xff]   ;;  %v816_v25 = vld [vmem:[%s1016_s2 + $0xb0] ss:$8 sps:$4 sm:$0xff]   ;;  %v524_v40 = vsub.s32 0, %v523_v37 }
   0xe   : > { %s925_s14 = sshll.u32 %s1020_s27, 3  ;;  %v817_v26 = vld [vmem:[%s1016_s2 + $0xc4] ss:$8 sps:$4 sm:$0xff]   ;;  %v819_v27 = vld [vmem:[%s1016_s2 + $0xc0] ss:$8 sps:$4 sm:$0xff]   ;;  %v528_v42 = vsub.s32 1, %v523_v37 }
   0xf   : > { %464 = vmatpush1.bf16.msra.mxu0 %v789_v5  ;;  %759 = vmatpush1.bf16.msra.mxu1 %v789_v5  ;;  %s934_s20 = scalar_lea.vmem %s1015_s1, %s925_s14  ;;  %v820_v28 = vld [vmem:[%s1016_s2 + $0xd4] ss:$8 sps:$4 sm:$0xff]   ;;  %v822_v29 = vld [vmem:[%s1016_s2 + $0xd0] ss:$8 sps:$4 sm:$0xff]   ;;  %v823_v30 = vld [vmem:[%s1016_s2 + $0xe4] ss:$8 sps:$4 sm:$0xff]   ;;  %s215_s16 = scalar_lea.vmem %s1014_s0, %s925_s14 }
  0x10   : > { %465 = vmatprep.subr.bf16.mxu0 %v790_v6  ;;  %744 = vmatprep.subr.bf16.mxu1 %v790_v6  ;;  %v831_v13 = vld [vmem:[%s934_s20 + $0x4] ss:$8 sps:$4 sm:$0xff]   ;;  %v834_v15 = vld [vmem:[%s934_s20 + $0x14] ss:$8 sps:$4 sm:$0xff]   ;;  %v825_v31 = vld [vmem:[%s1016_s2 + $0xe0] ss:$8 sps:$4 sm:$0xff]   ;;  %s229_s21 = scalar_lea.vmem %s1018_s4, %s925_s14 }
  0x11   : > { %491 = vmatprep.mubr.bf16.mxu0 %v831_v13  ;;  %501 = vmatprep.mubr.bf16.mxu1 %v834_v15  ;;  %v826_v32 = vld [vmem:[%s1016_s2 + $0xf4] ss:$8 sps:$4 sm:$0xff]   ;;  %v828_v33 = vld [vmem:[%s1016_s2 + $0xf0] ss:$8 sps:$4 sm:$0xff]   ;;  %v829_v34 = vld [vmem:[%s934_s20] ss:$8 sps:$4 sm:$0xff]  }
  0x12   : > { %v832_v35 = vld [vmem:[%s934_s20 + $0x10] ss:$8 sps:$4 sm:$0xff]   ;;  %v231_v38 = vld [vmem:[%s215_s16] sm:$0xff]  ;;  %v232_v43 = vld [vmem:[%s215_s16 + $0x8] sm:$0xff] }
  0x13   : > { %466 = vmatpush1.bf16.msra.mxu0 %v792_v7  ;;  %760 = vmatpush1.bf16.msra.mxu1 %v792_v7  ;;  %v233_v39 = vld [vmem:[%s215_s16 + $0x10] sm:$0xff]  ;;  %v520_v41 = vld [vmem:[%s1017_s3] sm:$0x3]  ;;  %v234_v44 = vld [vmem:[%s215_s16 + $0x18] sm:$0xff]  ;;  %v235_v45 = vunpack.c.l.bf16 %v231_v38  ;;  %v236_v47 = vunpack.c.h.bf16 %v231_v38  ;;  %v237_v50 = vunpack.c.l.bf16 %v232_v43  ;;  %v238_v55 = vunpack.c.h.bf16 %v232_v43 }
  0x14   : > { %467 = vmatprep.subr.bf16.mxu0 %v793_v8  ;;  %745 = vmatprep.subr.bf16.mxu1 %v793_v8  ;;  %v239_v46 = vunpack.c.l.bf16 %v233_v39  ;;  %v240_v48 = vunpack.c.h.bf16 %v233_v39  ;;  %v525_v49 = vrot.slane %v520_v41, %v524_v40  ;;  %v241_v51 = vunpack.c.l.bf16 %v234_v44 }
  0x15   : > { %v529_v54 = vrot.slane %v520_v41, %v528_v42  ;;  %v242_v56 = vunpack.c.h.bf16 %v234_v44 }
  0x17   : > { %468 = vmatpush1.bf16.msra.mxu0 %v795_v9  ;;  %761 = vmatpush1.bf16.msra.mxu1 %v795_v9 }
  0x18   : > { %469 = vmatprep.subr.bf16.mxu0 %v796_v10  ;;  %746 = vmatprep.subr.bf16.mxu1 %v796_v10 }
  0x1b   : > { %470 = vmatpush1.bf16.msra.mxu0 %v798_v11  ;;  %762 = vmatpush1.bf16.msra.mxu1 %v798_v11 }
  0x1c   : > { %471 = vmatprep.subr.bf16.mxu0 %v799_v12  ;;  %747 = vmatprep.subr.bf16.mxu1 %v799_v12 }
  0x1f   : > { %472 = vmatpush1.bf16.msra.mxu0 %v801_v14  ;;  %763 = vmatpush1.bf16.msra.mxu1 %v801_v14 }
  0x20   : > { %473 = vmatprep.subr.bf16.mxu0 %v802_v16  ;;  %748 = vmatprep.subr.bf16.mxu1 %v802_v16 }
  0x23   : > { %474 = vmatpush1.bf16.msra.mxu0 %v804_v17  ;;  %764 = vmatpush1.bf16.msra.mxu1 %v804_v17 }
  0x24   : > { %475 = vmatprep.subr.bf16.mxu0 %v805_v18  ;;  %749 = vmatprep.subr.bf16.mxu1 %v805_v18 }
  0x27   : > { %476 = vmatpush1.bf16.msra.mxu0 %v807_v19  ;;  %765 = vmatpush1.bf16.msra.mxu1 %v807_v19 }
  0x28   : > { %477 = vmatprep.subr.bf16.mxu0 %v808_v20  ;;  %750 = vmatprep.subr.bf16.mxu1 %v808_v20 }
  0x2b   : > { %478 = vmatpush1.bf16.msra.mxu0 %v810_v21  ;;  %766 = vmatpush1.bf16.msra.mxu1 %v810_v21 }
  0x2c   : > { %479 = vmatprep.subr.bf16.mxu0 %v811_v22  ;;  %751 = vmatprep.subr.bf16.mxu1 %v811_v22 }
  0x2f   : > { %480 = vmatpush1.bf16.msra.mxu0 %v813_v23  ;;  %767 = vmatpush1.bf16.msra.mxu1 %v813_v23 }
  0x30   : > { %481 = vmatprep.subr.bf16.mxu0 %v814_v24  ;;  %752 = vmatprep.subr.bf16.mxu1 %v814_v24 }
  0x33   : > { %482 = vmatpush1.bf16.msra.mxu0 %v816_v25  ;;  %768 = vmatpush1.bf16.msra.mxu1 %v816_v25 }
  0x34   : > { %483 = vmatprep.subr.bf16.mxu0 %v817_v26  ;;  %753 = vmatprep.subr.bf16.mxu1 %v817_v26 }
  0x37   : > { %484 = vmatpush1.bf16.msra.mxu0 %v819_v27  ;;  %769 = vmatpush1.bf16.msra.mxu1 %v819_v27 }
  0x38   : > { %485 = vmatprep.subr.bf16.mxu0 %v820_v28  ;;  %754 = vmatprep.subr.bf16.mxu1 %v820_v28 }
  0x3b   : > { %486 = vmatpush1.bf16.msra.mxu0 %v822_v29  ;;  %770 = vmatpush1.bf16.msra.mxu1 %v822_v29 }
  0x3c   : > { %487 = vmatprep.subr.bf16.mxu0 %v823_v30  ;;  %755 = vmatprep.subr.bf16.mxu1 %v823_v30 }
  0x3f   : > { %488 = vmatpush1.bf16.msra.mxu0 %v825_v31  ;;  %771 = vmatpush1.bf16.msra.mxu1 %v825_v31 }
  0x40   : > { %489 = vmatprep.subr.bf16.mxu0 %v826_v32  ;;  %756 = vmatprep.subr.bf16.mxu1 %v826_v32 }
  0x43   : > { %490 = vmatpush1.bf16.msra.mxu0 %v828_v33  ;;  %772 = vmatpush1.bf16.msra.mxu1 %v828_v33 }
  0x46   : > { %492 = vmatmul.mubr.bf16.vlgmr.msra.gmra.mrb[0].mxu0 %v829_v34  ;;  %502 = vmatmul.mubr.bf16.vlgmr.msra.gmra.mrb[0].mxu1 %v832_v35 }
 0x119   : > { %v493_v52 = vpop.f32.mrb[0].mxu0  ;;  %v503_v53 = vpop.f32.mrb[0].mxu1 }
 0x11a   : > { %v512_v57 = vadd.f32 %v493_v52, %v235_v45  ;;  %v516_v58 = vadd.f32 %v503_v53, %v239_v46  ;;  %v495_v59 = vpop.f32.mrb[1].mxu0  ;;  %v505_v60 = vpop.f32.mrb[1].mxu1 }
 0x11b   : > { %v513_v61 = vadd.f32 %v495_v59, %v236_v47  ;;  %v517_v62 = vadd.f32 %v505_v60, %v240_v48  ;;  %v497_v63 = vpop.f32.mrb[2].mxu0  ;;  %v507_v0 = vpop.f32.mrb[2].mxu1 }
 0x11c   : > { %v532_v1 = vadd.f32 %v525_v49, %v512_v57  ;;  %v536_v2 = vadd.f32 %v525_v49, %v516_v58  ;;  %v514_v3 = vadd.f32 %v497_v63, %v237_v50  ;;  %v518_v4 = vadd.f32 %v507_v0, %v241_v51  ;;  %v499_v5 = vpop.f32.mrb[3].mxu0  ;;  %v509_v6 = vpop.f32.mrb[3].mxu1 }
 0x11d   : > { %v533_v7 = vadd.f32 %v529_v54, %v513_v61  ;;  %v537_v8 = vadd.f32 %v529_v54, %v517_v62  ;;  %v515_v9 = vadd.f32 %v499_v5, %v238_v55  ;;  %v519_v10 = vadd.f32 %v509_v6, %v242_v56 }
 0x11e   : > { %v548_v11 = vmul.f32 0.70710677, %v532_v1  ;;  %v552_v12 = vmul.f32 0.70710677, %v536_v2  ;;  %v534_v15 = vadd.f32 %v525_v49, %v514_v3  ;;  %v538_v16 = vadd.f32 %v525_v49, %v518_v4 }
 0x11f   : > { %v549_v13 = vmul.f32 0.70710677, %v533_v7  ;;  %v553_v14 = vmul.f32 0.70710677, %v537_v8  ;;  %v535_v17 = vadd.f32 %v529_v54, %v515_v9  ;;  %v539_v18 = vadd.f32 %v529_v54, %v519_v10 }
 0x120   : > { %835 = verf.f32 %v548_v11  ;;  %v550_v19 = vmul.f32 0.70710677, %v534_v15  ;;  %v554_v20 = vmul.f32 0.70710677, %v538_v16  ;;  %v540_v25 = vmul.f32 0.5, %v532_v1 }
 0x121   : > { %837 = verf.f32 %v552_v12  ;;  %v551_v21 = vmul.f32 0.70710677, %v535_v17  ;;  %v555_v22 = vmul.f32 0.70710677, %v539_v18  ;;  %v544_v28 = vmul.f32 0.5, %v536_v2 }
 0x122   : > { %839 = verf.f32 %v549_v13  ;;  %v541_v32 = vmul.f32 0.5, %v533_v7  ;;  %v545_v36 = vmul.f32 0.5, %v537_v8  ;;  %v542_v40 = vmul.f32 0.5, %v534_v15 }
 0x123   : > { %841 = verf.f32 %v553_v14  ;;  %v546_v44 = vmul.f32 0.5, %v538_v16  ;;  %v543_v49 = vmul.f32 0.5, %v535_v17  ;;  %v547_v53 = vmul.f32 0.5, %v539_v18 }
 0x124   : > { %843 = verf.f32 %v550_v19 }
 0x125   : > { %845 = verf.f32 %v554_v20 }
 0x126   : > { %847 = verf.f32 %v551_v21 }
 0x127   : > { %849 = verf.f32 %v555_v22 }
 0x12a   : > { %v836_v23 = vpop.eup %835 }
 0x12b   : > { %v838_v24 = vpop.eup %837  ;;  %v564_v26 = vadd.f32 1.0, %v836_v23 }
 0x12c   : > { %v840_v27 = vpop.eup %839  ;;  %v568_v29 = vadd.f32 1.0, %v838_v24 }
 0x12d   : > { %v842_v30 = vpop.eup %841  ;;  %v572_v31 = vmul.f32 %v564_v26, %v540_v25  ;;  %v565_v33 = vadd.f32 1.0, %v840_v27 }
 0x12e   : > { %v844_v34 = vpop.eup %843  ;;  %v576_v35 = vmul.f32 %v568_v29, %v544_v28  ;;  %v569_v37 = vadd.f32 1.0, %v842_v30 }
 0x12f   : > { %v846_v38 = vpop.eup %845  ;;  %v573_v39 = vmul.f32 %v565_v33, %v541_v32  ;;  %v566_v41 = vadd.f32 1.0, %v844_v34 }
 0x130   : > { %v848_v42 = vpop.eup %847  ;;  %v577_v43 = vmul.f32 %v569_v37, %v545_v36  ;;  %v570_v45 = vadd.f32 1.0, %v846_v38 }
 0x131   : > { %v850_v46 = vpop.eup %849  ;;  %v737_v47 = vpack.c.bf16 %v573_v39, %v572_v31  ;;  %v574_v48 = vmul.f32 %v566_v41, %v542_v40  ;;  %v567_v50 = vadd.f32 1.0, %v848_v42 }
 0x132   : > { %v739_v51 = vpack.c.bf16 %v577_v43, %v576_v35  ;;  %v578_v52 = vmul.f32 %v570_v45, %v546_v44  ;;  %v571_v54 = vadd.f32 1.0, %v850_v46 }
 0x133   : > { %604 = vst [vmem:[%s229_s21] sm:$0xff] %v737_v47  ;;  %v575_v55 = vmul.f32 %v567_v50, %v543_v49 }
 0x134   : > { %v579_v56 = vmul.f32 %v571_v54, %v547_v53  ;;  %606 = vst [vmem:[%s229_s21 + $0x10] sm:$0xff] %v739_v51 }
 0x135   : > { %v738_v57 = vpack.c.bf16 %v575_v55, %v574_v48 }
 0x136   : > { %v740_v58 = vpack.c.bf16 %v579_v56, %v578_v52 }
 0x137   : > { %605 = vst [vmem:[%s229_s21 + $0x8] sm:$0xff] %v738_v57 }
 0x138   : > { %607 = vst [vmem:[%s229_s21 + $0x18] sm:$0xff] %v740_v58 }
 0x139 PF: > { %s14_s15 = sadd.s32 1, %s857_s15  }
 0x13a   : > { %p11_p4 = scmp.ge.s32.totalorder %s14_s15, 4  }
 0x13c   :  { %13 = sbr.rel (!%p11_p4) target bundleno = 1 (0x1), region = 69 }

</bundles_post_ra>
